<compile_context>
chip_gen: v5e
topology: v5e:2x2
jax: 0.10.0
libtpu: 0.0.40
codegen_flags: <defaults>
</compile_context>

<pallas_src>
import functools

import jax
import jax.numpy as jnp
from jax.experimental import pallas as pl
from jax.experimental.pallas import tpu as pltpu


LANE = 128      # TPU vreg lane width
SUBLANE = 8


def _round_up(x, m):
    return (x + m - 1) // m * m


def _vmem_limit_bytes(tile_m, k, dims_pad):
    # resident bf16 weights + f32 biases + double-buffered bf16 input tile +
    # double-buffered f32 output tile + intermediate activations, with 2x
    # headroom; clamped so it stays inside v7x's 64 MiB per-core VMEM.
    w_bytes = 0
    d_in = k
    for d in dims_pad:
        w_bytes += d_in * d * 2 + d * 4
        d_in = d
    act_bytes = 2 * tile_m * k * 2 + 2 * tile_m * dims_pad[-1] * 4
    inter = 2 * tile_m * max(dims_pad) * 4
    need = w_bytes + act_bytes + inter
    return int(min(max(2 * need, 32 << 20), 40 << 20))


# ----------------------------- Pallas kernels -----------------------------

def _mlp_kernel(*refs, acts, softmax_cols):
    """Fused matmul chain: x @ W1 (+b1, act1) @ W2 ... with optional row-wise
    softmax over the first `softmax_cols` output columns.

    refs = (x_ref, w1_ref, b1_ref, ..., wL_ref, bL_ref, o_ref).
    All matmuls are bf16 on the MXU with f32 accumulation.
    """
    x_ref, o_ref = refs[0], refs[-1]
    wb_refs = refs[1:-1]
    n_layers = len(acts)

    h = x_ref[...]
    for l in range(n_layers):
        w = wb_refs[2 * l][...]
        b = wb_refs[2 * l + 1][...]                       # (1, N_pad) broadcast
        y = jnp.dot(h, w, preferred_element_type=jnp.float32) + b
        if acts[l] == "relu":
            y = jnp.maximum(y, 0.0)
        h = y.astype(jnp.bfloat16) if l + 1 < n_layers else y

    o = h                                                  # f32
    if softmax_cols:
        # fused row-wise softmax over the first `softmax_cols` columns (class
        # scores); box-regression columns and lane padding pass through raw.
        col = jax.lax.broadcasted_iota(jnp.int32, o.shape, 1)
        is_cls = col < softmax_cols
        logits = jnp.where(is_cls, o, -jnp.inf)
        m = jnp.max(logits, axis=-1, keepdims=True)
        e = jnp.where(is_cls, jnp.exp(logits - m), 0.0)
        p = e / jnp.sum(e, axis=-1, keepdims=True)
        o = jnp.where(is_cls, p, o)
    o_ref[...] = o.astype(o_ref.dtype)


def pallas_mlp(x, layers, acts, *, softmax_cols=0, out_dtype=jnp.float32,
               tile_m_max=512):
    """y = chain of act_l(h @ W_l + b_l).  x:(M,K); layers = [(W,b), ...].

    Hidden / output dims are zero-padded to multiples of 128 (lane-dense
    unmasked stores, padded columns carry exact zeros through the chain), M is
    padded to the row-tile size; padding is sliced back afterwards.  Matmul
    operands are cast to bf16, accumulation stays f32.
    """
    M, K = x.shape
    dims = [w.shape[1] for (w, _) in layers]
    dims_pad = [_round_up(d, LANE) for d in dims]
    tile_m = _round_up(M, SUBLANE) if M <= tile_m_max else tile_m_max
    m_pad = _round_up(M, tile_m)

    xb = jnp.pad(x.astype(jnp.bfloat16), ((0, m_pad - M), (0, 0)))

    padded_args = []
    in_specs = [pl.BlockSpec((tile_m, K), lambda i: (i, 0))]
    d_in, d_in_pad = K, K
    for (w, b), d, dp in zip(layers, dims, dims_pad):
        wp = jnp.pad(w.astype(jnp.bfloat16),
                     ((0, d_in_pad - d_in), (0, dp - d)))
        bp = jnp.pad(b.astype(jnp.float32), (0, dp - d)).reshape(1, dp)
        padded_args += [wp, bp]
        in_specs += [pl.BlockSpec((d_in_pad, dp), lambda i: (0, 0)),
                     pl.BlockSpec((1, dp), lambda i: (0, 0))]
        d_in, d_in_pad = d, dp

    n_pad = dims_pad[-1]
    out = pl.pallas_call(
        functools.partial(_mlp_kernel, acts=tuple(acts),
                          softmax_cols=softmax_cols),
        out_shape=jax.ShapeDtypeStruct((m_pad, n_pad), out_dtype),
        grid=(m_pad // tile_m,),
        in_specs=in_specs,
        out_specs=pl.BlockSpec((tile_m, n_pad), lambda i: (i, 0)),
        compiler_params=pltpu.CompilerParams(
            dimension_semantics=("parallel",),   # shard M across v7x's 2 TCs
            vmem_limit_bytes=_vmem_limit_bytes(tile_m, K, dims_pad)),
    )(xb, *padded_args)
    return out[:M, :dims[-1]]


# ------------------------------ conv via im2col ----------------------------

def im2col(x, kh, kw):
    """'same' stride-1 patch extraction.  x:(B,H,W,C) -> (B*H*W, kh*kw*C)."""
    B, H, W, C = x.shape
    if kh == 1 and kw == 1:
        return x.reshape(B * H * W, C)
    # TODO(synk): for large images (esp. v5e) move im2col into the kernel
    # (halo'd BlockSpec window + in-kernel kh*kw accumulation) to avoid
    # materializing the kh*kw-inflated patch matrix in HBM.
    ph, pw = kh // 2, kw // 2
    xp = jnp.pad(x, ((0, 0), (ph, ph), (pw, pw), (0, 0)))
    cols = [xp[:, i:i + H, j:j + W, :] for i in range(kh) for j in range(kw)]
    return jnp.concatenate(cols, axis=-1).reshape(B * H * W, kh * kw * C)


# ------------------------------- box utilities -----------------------------

def make_anchors(H, W, sizes):
    A = len(sizes)
    ys, xs = jnp.meshgrid(jnp.arange(H, dtype=jnp.float32) + 0.5,
                          jnp.arange(W, dtype=jnp.float32) + 0.5, indexing="ij")
    cx = xs.reshape(-1, 1)
    cy = ys.reshape(-1, 1)
    s = jnp.asarray(sizes, jnp.float32).reshape(1, A)
    x1 = cx - s / 2.0
    y1 = cy - s / 2.0
    x2 = cx + s / 2.0
    y2 = cy + s / 2.0
    return jnp.stack([x1, y1, x2, y2], axis=-1).reshape(H * W * A, 4)


def decode_boxes(anchors, deltas):
    wa = anchors[..., 2] - anchors[..., 0]
    ha = anchors[..., 3] - anchors[..., 1]
    xa = anchors[..., 0] + 0.5 * wa
    ya = anchors[..., 1] + 0.5 * ha
    dx, dy = deltas[..., 0], deltas[..., 1]
    dw = jnp.clip(deltas[..., 2], -4.0, 4.0)
    dh = jnp.clip(deltas[..., 3], -4.0, 4.0)
    xc = dx * wa + xa
    yc = dy * ha + ya
    w = jnp.exp(dw) * wa
    h = jnp.exp(dh) * ha
    return jnp.stack([xc - 0.5 * w, yc - 0.5 * h,
                      xc + 0.5 * w, yc + 0.5 * h], axis=-1)


def clip_boxes(boxes, H, W):
    x1 = jnp.clip(boxes[..., 0], 0.0, float(W))
    y1 = jnp.clip(boxes[..., 1], 0.0, float(H))
    x2 = jnp.clip(boxes[..., 2], 0.0, float(W))
    y2 = jnp.clip(boxes[..., 3], 0.0, float(H))
    return jnp.stack([x1, y1, x2, y2], axis=-1)


def roi_align(feat, boxes, out_size):
    """Bilinear RoI pooling.  feat:(H,W,C), boxes:(K,4) -> (K,S,S,C)."""
    # TODO(synk): dynamic bilinear gather has no clean Pallas path; stays in JAX.
    feat = feat.astype(jnp.float32)
    H, W, C = feat.shape
    K = boxes.shape[0]
    x1, y1, x2, y2 = (boxes[:, 0], boxes[:, 1], boxes[:, 2], boxes[:, 3])
    bw = jnp.maximum(x2 - x1, 1e-3)
    bh = jnp.maximum(y2 - y1, 1e-3)
    grid = (jnp.arange(out_size, dtype=jnp.float32) + 0.5) / out_size
    sx = x1[:, None] + grid[None, :] * bw[:, None] - 0.5     # (K,S)
    sy = y1[:, None] + grid[None, :] * bh[:, None] - 0.5     # (K,S)
    yy = jnp.broadcast_to(sy[:, :, None], (K, out_size, out_size))
    xx = jnp.broadcast_to(sx[:, None, :], (K, out_size, out_size))
    y0 = jnp.floor(yy)
    x0 = jnp.floor(xx)
    ly = yy - y0
    lx = xx - x0
    hy = 1.0 - ly
    hx = 1.0 - lx
    y0i = jnp.clip(y0.astype(jnp.int32), 0, H - 1)
    y1i = jnp.clip(y0i + 1, 0, H - 1)
    x0i = jnp.clip(x0.astype(jnp.int32), 0, W - 1)
    x1i = jnp.clip(x0i + 1, 0, W - 1)
    out = (feat[y0i, x0i] * (hy * hx)[..., None] +
           feat[y0i, x1i] * (hy * lx)[..., None] +
           feat[y1i, x0i] * (ly * hx)[..., None] +
           feat[y1i, x1i] * (ly * lx)[..., None])
    return out


# ------------------------------- parameters --------------------------------

def init_params(key, cin=3, cfeat=16, A=3, num_classes=5, pool=7, hidden=32):
    ks = jax.random.split(key, 8)

    def w(k, shape, scale=0.1):
        return jax.random.normal(k, shape, jnp.float32) * scale

    return {
        "backbone_w": w(ks[0], (3, 3, cin, cfeat)),
        "backbone_b": jnp.zeros((cfeat,), jnp.float32),
        "rpn_conv_w": w(ks[1], (3, 3, cfeat, cfeat)),
        "rpn_conv_b": jnp.zeros((cfeat,), jnp.float32),
        "rpn_cls_w": w(ks[2], (1, 1, cfeat, A)),
        "rpn_cls_b": jnp.zeros((A,), jnp.float32),
        "rpn_bbox_w": w(ks[3], (1, 1, cfeat, 4 * A)),
        "rpn_bbox_b": jnp.zeros((4 * A,), jnp.float32),
        "fc1_w": w(ks[4], (pool * pool * cfeat, hidden), 0.05),
        "fc1_b": jnp.zeros((hidden,), jnp.float32),
        "fc2_w": w(ks[5], (hidden, hidden)),
        "fc2_b": jnp.zeros((hidden,), jnp.float32),
        "cls_w": w(ks[6], (hidden, num_classes)),
        "cls_b": jnp.zeros((num_classes,), jnp.float32),
        "bbox_w": w(ks[7], (hidden, num_classes * 4)),
        "bbox_b": jnp.zeros((num_classes * 4,), jnp.float32),
        "mean": jnp.asarray([0.485, 0.456, 0.406], jnp.float32),
        "std": jnp.asarray([0.229, 0.224, 0.225], jnp.float32),
    }


# ------------------------------ forward pass --------------------------------

def generalized_rcnn_forward(params, images_nchw, *, A=3, num_classes=5,
                             pool=7, topk=8, anchor_sizes=(4.0, 8.0, 12.0)):
    B, C, H, W = images_nchw.shape
    original_image_sizes = [(H, W)] * B          # same as PyTorch's img.shape[-2:]

    # ---- transform (GeneralizedRCNNTransform) ------------------------------
    # Mean subtraction fuses with the NHWC transpose in XLA; the per-channel
    # 1/std scale is folded into the backbone conv weights below (exact,
    # including the zero padding), so no separate normalize kernel is needed.
    # TODO(synk): resize/batching-to-common-size is an identity here.
    x = jnp.transpose(images_nchw, (0, 2, 3, 1)).astype(jnp.float32)   # NHWC
    x = x - params["mean"].reshape(1, 1, 1, C)

    # ---- backbone: 3x3 conv + ReLU (Pallas im2col matmul, 1/std folded) ----
    Cf = params["backbone_w"].shape[-1]
    bb_w = (params["backbone_w"] / params["std"].reshape(1, 1, C, 1))
    patches = im2col(x.astype(jnp.bfloat16), 3, 3)                # (B*H*W, 9C)
    feat_flat = pallas_mlp(
        patches, [(bb_w.reshape(9 * C, Cf), params["backbone_b"])], ["relu"],
        out_dtype=jnp.bfloat16)
    feat = feat_flat.reshape(B, H, W, Cf)
    Hf, Wf = H, W

    # ---- RPN: shared 3x3 conv + ReLU + fused objectness/box 1x1 head -------
    # The intermediate RPN feature map never leaves VMEM: conv + both heads
    # run in one fused Pallas kernel.
    rpn_head_w = jnp.concatenate(
        [params["rpn_cls_w"], params["rpn_bbox_w"]], axis=-1).reshape(Cf, 5 * A)
    rpn_head_b = jnp.concatenate(
        [params["rpn_cls_b"], params["rpn_bbox_b"]], axis=0)
    rpn_patches = im2col(feat, 3, 3)                              # (B*Hf*Wf, 9Cf)
    rpn_out = pallas_mlp(
        rpn_patches,
        [(params["rpn_conv_w"].reshape(9 * Cf, Cf), params["rpn_conv_b"]),
         (rpn_head_w, rpn_head_b)],
        ["relu", None]).reshape(B, Hf, Wf, 5 * A)
    obj = rpn_out[..., :A].reshape(B, Hf * Wf * A)
    deltas = rpn_out[..., A:].reshape(B, Hf * Wf * A, 4)

    anchors = make_anchors(Hf, Wf, anchor_sizes)                          # (N,4)
    prop_boxes = clip_boxes(decode_boxes(anchors[None], deltas), H, W)    # (B,N,4)

    # TODO(synk): NMS proposal filtering has no clean Pallas equivalent; top-k only.
    _, top_idx = jax.lax.top_k(obj, topk)                                 # (B,topk)
    proposals = jnp.take_along_axis(prop_boxes, top_idx[..., None], axis=1)

    # ---- RoI heads: RoIAlign -> fused (fc1 + fc2 + cls/bbox head + softmax) -
    pooled = jax.vmap(lambda f, bx: roi_align(f, bx, pool))(feat, proposals)
    pooled = pooled.reshape(B * topk, pool * pool * Cf)

    head_w = jnp.concatenate([params["cls_w"], params["bbox_w"]], axis=-1)
    head_b = jnp.concatenate([params["cls_b"], params["bbox_b"]], axis=0)
    head_out = pallas_mlp(
        pooled,
        [(params["fc1_w"], params["fc1_b"]),
         (params["fc2_w"], params["fc2_b"]),
         (head_w, head_b)],
        ["relu", "relu", None],
        softmax_cols=num_classes)                         # (B*K, 5*num_classes)
    cls_prob = head_out[:, :num_classes]                  # softmax'd in-kernel
    box_regr = head_out[:, num_classes:].reshape(B * topk, num_classes, 4)

    # pick best foreground class per RoI (class 0 = background)
    fg_prob = cls_prob[:, 1:]
    labels = jnp.argmax(fg_prob, axis=-1) + 1                             # (B*K,)
    scores = jnp.take_along_axis(fg_prob, (labels - 1)[:, None], axis=1)[:, 0]
    sel_idx = jnp.broadcast_to(labels[:, None, None], (B * topk, 1, 4))
    sel_deltas = jnp.take_along_axis(box_regr, sel_idx, axis=1)[:, 0, :]

    flat_props = proposals.reshape(B * topk, 4)
    det_boxes = clip_boxes(decode_boxes(flat_props, sel_deltas), H, W)

    # ---- transform.postprocess: rescale boxes to original image size -------
    oh, ow = original_image_sizes[0]
    scale = jnp.asarray([ow / W, oh / H, ow / W, oh / H], jnp.float32)
    det_boxes = det_boxes * scale[None, :]

    det_boxes = det_boxes.reshape(B, topk, 4)
    scores = scores.reshape(B, topk)
    labels = labels.reshape(B, topk)
    return [{"boxes": det_boxes[b], "scores": scores[b], "labels": labels[b]}
            for b in range(B)]


# ----------------------------------- main -----------------------------------

if __name__ == "__main__":
    key = jax.random.PRNGKey(0)
    kx, kp = jax.random.split(key)
    B, C, H, W = 2, 3, 16, 16
    images = jax.random.uniform(kx, (B, C, H, W), jnp.float32)   # NCHW input
    params = init_params(kp, cin=C)

    forward = jax.jit(generalized_rcnn_forward)
    detections = forward(params, images)

    for det in detections:
        jax.block_until_ready(det["boxes"])
        jax.block_until_ready(det["scores"])
        jax.block_until_ready(det["labels"])

    print("KERNEL_OK")
</pallas_src>

<mosaic_0001>
module attributes {stable_mosaic.version = 11 : i64} {
  func.func @_mlp_kernel(%arg0: i32, %arg1: memref<512x27xbf16, #tpu.memory_space<vmem>>, %arg2: memref<27x128xbf16, #tpu.memory_space<vmem>>, %arg3: memref<1x128xf32, #tpu.memory_space<vmem>>, %arg4: memref<512x128xbf16, #tpu.memory_space<vmem>>) attributes {dimension_semantics = [#tpu.dimension_semantics<parallel>], iteration_bounds = array<i64: 1>, scalar_prefetch = 0 : i64, scratch_operands = 0 : i64, tpu.core_type = #tpu.core_type<tc>, window_params = [{transform_indices = @transform_0, window_bounds = array<i64: 512, 27>}, {pipeline_mode = #tpu.pipeline_mode<synchronous>, transform_indices = @transform_1, window_bounds = array<i64: 27, 128>}, {pipeline_mode = #tpu.pipeline_mode<synchronous>, transform_indices = @transform_2, window_bounds = array<i64: 1, 128>}, {transform_indices = @transform_3, window_bounds = array<i64: 512, 128>}]} {
    %c0 = arith.constant 0 : index
    %c0_0 = arith.constant 0 : index
    %0 = vector.load %arg1[%c0, %c0_0] : memref<512x27xbf16, #tpu.memory_space<vmem>>, vector<512x27xbf16>
    %c0_1 = arith.constant 0 : index
    %c0_2 = arith.constant 0 : index
    %1 = vector.load %arg2[%c0_1, %c0_2] : memref<27x128xbf16, #tpu.memory_space<vmem>>, vector<27x128xbf16>
    %c0_3 = arith.constant 0 : index
    %c0_4 = arith.constant 0 : index
    %2 = vector.load %arg3[%c0_3, %c0_4] : memref<1x128xf32, #tpu.memory_space<vmem>>, vector<1x128xf32>
    %cst = arith.constant dense<0.000000e+00> : vector<512x128xf32>
    %3 = tpu.matmul %0, %1, %cst {dimension_numbers = #tpu.dot_dimension_numbers<[1], [0], [0], [1], [0, 0, 1, 1], [], []>} : vector<512x27xbf16>, vector<27x128xbf16>, vector<512x128xf32> -> vector<512x128xf32>
    %4 = vector.broadcast %2 : vector<1x128xf32> to vector<512x128xf32>
    %5 = arith.addf %3, %4 : vector<512x128xf32>
    %cst_5 = arith.constant 0.000000e+00 : f32
    %6 = vector.broadcast %cst_5 : f32 to vector<512x128xf32>
    %7 = arith.maximumf %5, %6 : vector<512x128xf32>
    %8 = arith.truncf %7 : vector<512x128xf32> to vector<512x128xbf16>
    %c0_6 = arith.constant 0 : index
    %c0_7 = arith.constant 0 : index
    %9 = vector.load %arg4[%c0_6, %c0_7] : memref<512x128xbf16, #tpu.memory_space<vmem>>, vector<512x128xbf16>
    tpu.vector_store %arg4[%c0_6, %c0_7], %8 {strides = array<i32>} : memref<512x128xbf16, #tpu.memory_space<vmem>>, vector<512x128xbf16>,
    return
  }
  func.func @transform_0(%arg0: i32) -> (i32, i32) {
    %c0_i32 = arith.constant 0 : i32
    %c0_i32_0 = arith.constant 0 : i32
    return %arg0, %c0_i32 : i32, i32
  }
  func.func @transform_1(%arg0: i32) -> (i32, i32) {
    %c0_i32 = arith.constant 0 : i32
    %c0_i32_0 = arith.constant 0 : i32
    %c0_i32_1 = arith.constant 0 : i32
    return %c0_i32, %c0_i32_0 : i32, i32
  }
  func.func @transform_2(%arg0: i32) -> (i32, i32) {
    %c0_i32 = arith.constant 0 : i32
    %c0_i32_0 = arith.constant 0 : i32
    %c0_i32_1 = arith.constant 0 : i32
    return %c0_i32, %c0_i32_0 : i32, i32
  }
  func.func @transform_3(%arg0: i32) -> (i32, i32) {
    %c0_i32 = arith.constant 0 : i32
    %c0_i32_0 = arith.constant 0 : i32
    return %arg0, %c0_i32 : i32, i32
  }
}

module attributes {stable_mosaic.version = 11 : i64} {
  func.func @_mlp_kernel(%arg0: i32, %arg1: memref<512x144xbf16, #tpu.memory_space<vmem>>, %arg2: memref<144x128xbf16, #tpu.memory_space<vmem>>, %arg3: memref<1x128xf32, #tpu.memory_space<vmem>>, %arg4: memref<128x128xbf16, #tpu.memory_space<vmem>>, %arg5: memref<1x128xf32, #tpu.memory_space<vmem>>, %arg6: memref<512x128xf32, #tpu.memory_space<vmem>>) attributes {dimension_semantics = [#tpu.dimension_semantics<parallel>], iteration_bounds = array<i64: 1>, scalar_prefetch = 0 : i64, scratch_operands = 0 : i64, tpu.core_type = #tpu.core_type<tc>, window_params = [{transform_indices = @transform_0, window_bounds = array<i64: 512, 144>}, {pipeline_mode = #tpu.pipeline_mode<synchronous>, transform_indices = @transform_1, window_bounds = array<i64: 144, 128>}, {pipeline_mode = #tpu.pipeline_mode<synchronous>, transform_indices = @transform_2, window_bounds = array<i64: 1, 128>}, {pipeline_mode = #tpu.pipeline_mode<synchronous>, transform_indices = @transform_3, window_bounds = array<i64: 128, 128>}, {pipeline_mode = #tpu.pipeline_mode<synchronous>, transform_indices = @transform_4, window_bounds = array<i64: 1, 128>}, {transform_indices = @transform_5, window_bounds = array<i64: 512, 128>}]} {
    %c0 = arith.constant 0 : index
    %c0_0 = arith.constant 0 : index
    %0 = vector.load %arg1[%c0, %c0_0] : memref<512x144xbf16, #tpu.memory_space<vmem>>, vector<512x144xbf16>
    %c0_1 = arith.constant 0 : index
    %c0_2 = arith.constant 0 : index
    %1 = vector.load %arg2[%c0_1, %c0_2] : memref<144x128xbf16, #tpu.memory_space<vmem>>, vector<144x128xbf16>
    %c0_3 = arith.constant 0 : index
    %c0_4 = arith.constant 0 : index
    %2 = vector.load %arg3[%c0_3, %c0_4] : memref<1x128xf32, #tpu.memory_space<vmem>>, vector<1x128xf32>
    %cst = arith.constant dense<0.000000e+00> : vector<512x128xf32>
    %3 = tpu.matmul %0, %1, %cst {dimension_numbers = #tpu.dot_dimension_numbers<[1], [0], [0], [1], [0, 0, 1, 1], [], []>} : vector<512x144xbf16>, vector<144x128xbf16>, vector<512x128xf32> -> vector<512x128xf32>
    %4 = vector.broadcast %2 : vector<1x128xf32> to vector<512x128xf32>
    %5 = arith.addf %3, %4 : vector<512x128xf32>
    %cst_5 = arith.constant 0.000000e+00 : f32
    %6 = vector.broadcast %cst_5 : f32 to vector<512x128xf32>
    %7 = arith.maximumf %5, %6 : vector<512x128xf32>
    %8 = arith.truncf %7 : vector<512x128xf32> to vector<512x128xbf16>
    %c0_6 = arith.constant 0 : index
    %c0_7 = arith.constant 0 : index
    %9 = vector.load %arg4[%c0_6, %c0_7] : memref<128x128xbf16, #tpu.memory_space<vmem>>, vector<128x128xbf16>
    %c0_8 = arith.constant 0 : index
    %c0_9 = arith.constant 0 : index
    %10 = vector.load %arg5[%c0_8, %c0_9] : memref<1x128xf32, #tpu.memory_space<vmem>>, vector<1x128xf32>
    %cst_10 = arith.constant dense<0.000000e+00> : vector<512x128xf32>
    %11 = tpu.matmul %8, %9, %cst_10 {dimension_numbers = #tpu.dot_dimension_numbers<[1], [0], [0], [1], [0, 0, 1, 1], [], []>} : vector<512x128xbf16>, vector<128x128xbf16>, vector<512x128xf32> -> vector<512x128xf32>
    %12 = vector.broadcast %10 : vector<1x128xf32> to vector<512x128xf32>
    %13 = arith.addf %11, %12 : vector<512x128xf32>
    %c0_11 = arith.constant 0 : index
    %c0_12 = arith.constant 0 : index
    %14 = vector.load %arg6[%c0_11, %c0_12] : memref<512x128xf32, #tpu.memory_space<vmem>>, vector<512x128xf32>
    tpu.vector_store %arg6[%c0_11, %c0_12], %13 {strides = array<i32>} : memref<512x128xf32, #tpu.memory_space<vmem>>, vector<512x128xf32>,
    return
  }
  func.func @transform_0(%arg0: i32) -> (i32, i32) {
    %c0_i32 = arith.constant 0 : i32
    %c0_i32_0 = arith.constant 0 : i32
    return %arg0, %c0_i32 : i32, i32
  }
  func.func @transform_1(%arg0: i32) -> (i32, i32) {
    %c0_i32 = arith.constant 0 : i32
    %c0_i32_0 = arith.constant 0 : i32
    %c0_i32_1 = arith.constant 0 : i32
    return %c0_i32, %c0_i32_0 : i32, i32
  }
  func.func @transform_2(%arg0: i32) -> (i32, i32) {
    %c0_i32 = arith.constant 0 : i32
    %c0_i32_0 = arith.constant 0 : i32
    %c0_i32_1 = arith.constant 0 : i32
    return %c0_i32, %c0_i32_0 : i32, i32
  }
  func.func @transform_3(%arg0: i32) -> (i32, i32) {
    %c0_i32 = arith.constant 0 : i32
    %c0_i32_0 = arith.constant 0 : i32
    %c0_i32_1 = arith.constant 0 : i32
    return %c0_i32, %c0_i32_0 : i32, i32
  }
  func.func @transform_4(%arg0: i32) -> (i32, i32) {
    %c0_i32 = arith.constant 0 : i32
    %c0_i32_0 = arith.constant 0 : i32
    %c0_i32_1 = arith.constant 0 : i32
    return %c0_i32, %c0_i32_0 : i32, i32
  }
  func.func @transform_5(%arg0: i32) -> (i32, i32) {
    %c0_i32 = arith.constant 0 : i32
    %c0_i32_0 = arith.constant 0 : i32
    return %arg0, %c0_i32 : i32, i32
  }
}

module attributes {stable_mosaic.version = 11 : i64} {
  func.func @_mlp_kernel(%arg0: i32, %arg1: memref<16x784xbf16, #tpu.memory_space<vmem>>, %arg2: memref<784x128xbf16, #tpu.memory_space<vmem>>, %arg3: memref<1x128xf32, #tpu.memory_space<vmem>>, %arg4: memref<128x128xbf16, #tpu.memory_space<vmem>>, %arg5: memref<1x128xf32, #tpu.memory_space<vmem>>, %arg6: memref<128x128xbf16, #tpu.memory_space<vmem>>, %arg7: memref<1x128xf32, #tpu.memory_space<vmem>>, %arg8: memref<16x128xf32, #tpu.memory_space<vmem>>) attributes {dimension_semantics = [#tpu.dimension_semantics<parallel>], iteration_bounds = array<i64: 1>, scalar_prefetch = 0 : i64, scratch_operands = 0 : i64, tpu.core_type = #tpu.core_type<tc>, window_params = [{transform_indices = @transform_0, window_bounds = array<i64: 16, 784>}, {pipeline_mode = #tpu.pipeline_mode<synchronous>, transform_indices = @transform_1, window_bounds = array<i64: 784, 128>}, {pipeline_mode = #tpu.pipeline_mode<synchronous>, transform_indices = @transform_2, window_bounds = array<i64: 1, 128>}, {pipeline_mode = #tpu.pipeline_mode<synchronous>, transform_indices = @transform_3, window_bounds = array<i64: 128, 128>}, {pipeline_mode = #tpu.pipeline_mode<synchronous>, transform_indices = @transform_4, window_bounds = array<i64: 1, 128>}, {pipeline_mode = #tpu.pipeline_mode<synchronous>, transform_indices = @transform_5, window_bounds = array<i64: 128, 128>}, {pipeline_mode = #tpu.pipeline_mode<synchronous>, transform_indices = @transform_6, window_bounds = array<i64: 1, 128>}, {transform_indices = @transform_7, window_bounds = array<i64: 16, 128>}]} {
    %c0 = arith.constant 0 : index
    %c0_0 = arith.constant 0 : index
    %0 = vector.load %arg1[%c0, %c0_0] : memref<16x784xbf16, #tpu.memory_space<vmem>>, vector<16x784xbf16>
    %c0_1 = arith.constant 0 : index
    %c0_2 = arith.constant 0 : index
    %1 = vector.load %arg2[%c0_1, %c0_2] : memref<784x128xbf16, #tpu.memory_space<vmem>>, vector<784x128xbf16>
    %c0_3 = arith.constant 0 : index
    %c0_4 = arith.constant 0 : index
    %2 = vector.load %arg3[%c0_3, %c0_4] : memref<1x128xf32, #tpu.memory_space<vmem>>, vector<1x128xf32>
    %cst = arith.constant dense<0.000000e+00> : vector<16x128xf32>
    %3 = tpu.matmul %0, %1, %cst {dimension_numbers = #tpu.dot_dimension_numbers<[1], [0], [0], [1], [0, 0, 1, 1], [], []>} : vector<16x784xbf16>, vector<784x128xbf16>, vector<16x128xf32> -> vector<16x128xf32>
    %4 = vector.broadcast %2 : vector<1x128xf32> to vector<16x128xf32>
    %5 = arith.addf %3, %4 : vector<16x128xf32>
    %cst_5 = arith.constant 0.000000e+00 : f32
    %6 = vector.broadcast %cst_5 : f32 to vector<16x128xf32>
    %7 = arith.maximumf %5, %6 : vector<16x128xf32>
    %8 = arith.truncf %7 : vector<16x128xf32> to vector<16x128xbf16>
    %c0_6 = arith.constant 0 : index
    %c0_7 = arith.constant 0 : index
    %9 = vector.load %arg4[%c0_6, %c0_7] : memref<128x128xbf16, #tpu.memory_space<vmem>>, vector<128x128xbf16>
    %c0_8 = arith.constant 0 : index
    %c0_9 = arith.constant 0 : index
    %10 = vector.load %arg5[%c0_8, %c0_9] : memref<1x128xf32, #tpu.memory_space<vmem>>, vector<1x128xf32>
    %cst_10 = arith.constant dense<0.000000e+00> : vector<16x128xf32>
    %11 = tpu.matmul %8, %9, %cst_10 {dimension_numbers = #tpu.dot_dimension_numbers<[1], [0], [0], [1], [0, 0, 1, 1], [], []>} : vector<16x128xbf16>, vector<128x128xbf16>, vector<16x128xf32> -> vector<16x128xf32>
    %12 = vector.broadcast %10 : vector<1x128xf32> to vector<16x128xf32>
    %13 = arith.addf %11, %12 : vector<16x128xf32>
    %cst_11 = arith.constant 0.000000e+00 : f32
    %14 = vector.broadcast %cst_11 : f32 to vector<16x128xf32>
    %15 = arith.maximumf %13, %14 : vector<16x128xf32>
    %16 = arith.truncf %15 : vector<16x128xf32> to vector<16x128xbf16>
    %c0_12 = arith.constant 0 : index
    %c0_13 = arith.constant 0 : index
    %17 = vector.load %arg6[%c0_12, %c0_13] : memref<128x128xbf16, #tpu.memory_space<vmem>>, vector<128x128xbf16>
    %c0_14 = arith.constant 0 : index
    %c0_15 = arith.constant 0 : index
    %18 = vector.load %arg7[%c0_14, %c0_15] : memref<1x128xf32, #tpu.memory_space<vmem>>, vector<1x128xf32>
    %cst_16 = arith.constant dense<0.000000e+00> : vector<16x128xf32>
    %19 = tpu.matmul %16, %17, %cst_16 {dimension_numbers = #tpu.dot_dimension_numbers<[1], [0], [0], [1], [0, 0, 1, 1], [], []>} : vector<16x128xbf16>, vector<128x128xbf16>, vector<16x128xf32> -> vector<16x128xf32>
    %20 = vector.broadcast %18 : vector<1x128xf32> to vector<16x128xf32>
    %21 = arith.addf %19, %20 : vector<16x128xf32>
    %22 = tpu.iota {dimensions = array<i32: 1>} : vector<16x128xi32>
    %c5_i32 = arith.constant 5 : i32
    %23 = vector.broadcast %c5_i32 : i32 to vector<16x128xi32>
    %24 = arith.cmpi slt, %22, %23 : vector<16x128xi32>
    %cst_17 = arith.constant 0xFF800000 : f32
    %25 = vector.broadcast %cst_17 : f32 to vector<16x128xf32>
    %26 = arith.select %24, %21, %25 : vector<16x128xi1>, vector<16x128xf32>
    %cst_18 = arith.constant dense<0xFF800000> : vector<16xf32>
    %27 = vector.multi_reduction <maximumf>, %26, %cst_18 [1] : vector<16x128xf32> to vector<16xf32>
    %28 = vector.shape_cast %27 : vector<16xf32> to vector<16x1xf32>
    %29 = vector.broadcast %28 : vector<16x1xf32> to vector<16x128xf32>
    %30 = arith.subf %26, %29 : vector<16x128xf32>
    %31 = math.exp %30 : vector<16x128xf32>
    %cst_19 = arith.constant 0.000000e+00 : f32
    %32 = vector.broadcast %cst_19 : f32 to vector<16x128xf32>
    %33 = arith.select %24, %31, %32 : vector<16x128xi1>, vector<16x128xf32>
    %cst_20 = arith.constant dense<0.000000e+00> : vector<16xf32>
    %34 = vector.multi_reduction <add>, %33, %cst_20 [1] : vector<16x128xf32> to vector<16xf32>
    %35 = vector.shape_cast %34 : vector<16xf32> to vector<16x1xf32>
    %36 = vector.broadcast %35 : vector<16x1xf32> to vector<16x128xf32>
    %37 = arith.divf %33, %36 : vector<16x128xf32>
    %38 = arith.select %24, %37, %21 : vector<16x128xi1>, vector<16x128xf32>
    %c0_21 = arith.constant 0 : index
    %c0_22 = arith.constant 0 : index
    %39 = vector.load %arg8[%c0_21, %c0_22] : memref<16x128xf32, #tpu.memory_space<vmem>>, vector<16x128xf32>
    tpu.vector_store %arg8[%c0_21, %c0_22], %38 {strides = array<i32>} : memref<16x128xf32, #tpu.memory_space<vmem>>, vector<16x128xf32>,
    return
  }
  func.func @transform_0(%arg0: i32) -> (i32, i32) {
    %c0_i32 = arith.constant 0 : i32
    %c0_i32_0 = arith.constant 0 : i32
    return %arg0, %c0_i32 : i32, i32
  }
  func.func @transform_1(%arg0: i32) -> (i32, i32) {
    %c0_i32 = arith.constant 0 : i32
    %c0_i32_0 = arith.constant 0 : i32
    %c0_i32_1 = arith.constant 0 : i32
    return %c0_i32, %c0_i32_0 : i32, i32
  }
  func.func @transform_2(%arg0: i32) -> (i32, i32) {
    %c0_i32 = arith.constant 0 : i32
    %c0_i32_0 = arith.constant 0 : i32
    %c0_i32_1 = arith.constant 0 : i32
    return %c0_i32, %c0_i32_0 : i32, i32
  }
  func.func @transform_3(%arg0: i32) -> (i32, i32) {
    %c0_i32 = arith.constant 0 : i32
    %c0_i32_0 = arith.constant 0 : i32
    %c0_i32_1 = arith.constant 0 : i32
    return %c0_i32, %c0_i32_0 : i32, i32
  }
  func.func @transform_4(%arg0: i32) -> (i32, i32) {
    %c0_i32 = arith.constant 0 : i32
    %c0_i32_0 = arith.constant 0 : i32
    %c0_i32_1 = arith.constant 0 : i32
    return %c0_i32, %c0_i32_0 : i32, i32
  }
  func.func @transform_5(%arg0: i32) -> (i32, i32) {
    %c0_i32 = arith.constant 0 : i32
    %c0_i32_0 = arith.constant 0 : i32
    %c0_i32_1 = arith.constant 0 : i32
    return %c0_i32, %c0_i32_0 : i32, i32
  }
  func.func @transform_6(%arg0: i32) -> (i32, i32) {
    %c0_i32 = arith.constant 0 : i32
    %c0_i32_0 = arith.constant 0 : i32
    %c0_i32_1 = arith.constant 0 : i32
    return %c0_i32, %c0_i32_0 : i32, i32
  }
  func.func @transform_7(%arg0: i32) -> (i32, i32) {
    %c0_i32 = arith.constant 0 : i32
    %c0_i32_0 = arith.constant 0 : i32
    return %arg0, %c0_i32 : i32, i32
  }
}

</mosaic_0001>

<bundles_post_ra>
// kernel: generalized_rcnn_forward.3
= control target key start
LH: loop header
LB: loop body
LE: loop exit
PB: predicated region body
PF: predicated region fallthrough
CT: control target
= control target key end

     0   :  { %vm355_vm0 = vcmask 1044480   ;;  %vm356_vm1 = vcmask 1045504   ;;  %v1128_v2 = vmov 65535   ;;  %vm258_vm2 = vcmask 220160   ;;  %s1451_s1 = inlined_call_operand.vmem [shape: bf16[27,128], index: 1, kind: input, shape index: {}]   ;;  %s1452_s2 = inlined_call_operand.vmem [shape: f32[1,128], index: 2, kind: input, shape index: {}]   ;;  %s1453_s0 = inlined_call_operand.vmem [shape: bf16[512,27], index: 0, kind: input, shape index: {}]   ;;  %s1454_s3 = inlined_call_operand.vmem [shape: bf16[512,128], index: 3, kind: output, shape index: {}]  }
   0x1   :  { %v861_v0 = vld [vmem:[%s1451_s1 + $0x8] sm:$0xf]  ;;  %v928_v1 = vld [vmem:[%s1451_s1 + $0x8] sm:$0x30]  ;;  %v357_v3 = vsel %vm355_vm0, 4294967295, %v1128_v2  ;;  %v927_v7 = vld [vmem:[%s1451_s1] sm:$0xff] }
   0x2   :  { %v862_v4 = vor.u32 %v928_v1, %v861_v0  ;;  %v358_v5 = vsel %vm356_vm1, %v357_v3, 0  ;;  %v895_v8 = vld [vmem:[%s1453_s0] sm:$0xff]  ;;  %v896_v12 = vld [vmem:[%s1453_s0 + $0x8] sm:$0xff]  ;;  %v897_v16 = vld [vmem:[%s1453_s0 + $0x10] sm:$0xff] }
   0x3   :  { %v903_v9 = vld [vmem:[%s1453_s0 + $0x40] sm:$0xff]  ;;  %v904_v13 = vld [vmem:[%s1453_s0 + $0x48] sm:$0xff]  ;;  %v905_v17 = vld [vmem:[%s1453_s0 + $0x50] sm:$0xff] }
   0x4   :  { %v360_v6 = vand.u32 %v862_v4, %v358_v5  ;;  %v911_v10 = vld [vmem:[%s1453_s0 + $0x80] sm:$0xff]  ;;  %v912_v14 = vld [vmem:[%s1453_s0 + $0x88] sm:$0xff]  ;;  %v913_v18 = vld [vmem:[%s1453_s0 + $0x90] sm:$0xff] }
   0x5   :  { %v919_v11 = vld [vmem:[%s1453_s0 + $0xc0] sm:$0xff]  ;;  %v920_v15 = vld [vmem:[%s1453_s0 + $0xc8] sm:$0xff]  ;;  %v921_v19 = vld [vmem:[%s1453_s0 + $0xd0] sm:$0xff] }
   0x6   :  { %368 = vmatpush.bf16.msra.mxu0 %v360_v6  ;;  %1120 = vmatpush.bf16.msra.mxu1 %v360_v6  ;;  %v898_v20 = vld [vmem:[%s1453_s0 + $0x18] sm:$0xff]  ;;  %v899_v24 = vld [vmem:[%s1453_s0 + $0x20] sm:$0xff]  ;;  %v900_v28 = vld [vmem:[%s1453_s0 + $0x28] sm:$0xff] }
   0x7   :  { %1121 = vmatpush.bf16.msra.mxu2 %v360_v6  ;;  %1122 = vmatpush.bf16.msra.mxu3 %v360_v6  ;;  %v906_v21 = vld [vmem:[%s1453_s0 + $0x58] sm:$0xff]  ;;  %v907_v25 = vld [vmem:[%s1453_s0 + $0x60] sm:$0xff]  ;;  %v908_v29 = vld [vmem:[%s1453_s0 + $0x68] sm:$0xff] }
   0x8   :  { %v914_v22 = vld [vmem:[%s1453_s0 + $0x98] sm:$0xff]  ;;  %v915_v26 = vld [vmem:[%s1453_s0 + $0xa0] sm:$0xff]  ;;  %v916_v30 = vld [vmem:[%s1453_s0 + $0xa8] sm:$0xff] }
   0x9   :  { %v922_v23 = vld [vmem:[%s1453_s0 + $0xd8] sm:$0xff]  ;;  %v923_v27 = vld [vmem:[%s1453_s0 + $0xe0] sm:$0xff]  ;;  %v924_v31 = vld [vmem:[%s1453_s0 + $0xe8] sm:$0xff] }
   0xa   :  { %369 = vmatpush.bf16.msra.mxu0 %v927_v7  ;;  %1123 = vmatpush.bf16.msra.mxu1 %v927_v7  ;;  %v901_v32 = vld [vmem:[%s1453_s0 + $0x30] sm:$0xff]  ;;  %v902_v36 = vld [vmem:[%s1453_s0 + $0x38] sm:$0xff]  ;;  %v1289_v42 = vld [vmem:[%s1452_s2] ss:$0 sm:$0xff] }
   0xb   :  { %1124 = vmatpush.bf16.msra.mxu2 %v927_v7  ;;  %1125 = vmatpush.bf16.msra.mxu3 %v927_v7  ;;  %v909_v33 = vld [vmem:[%s1453_s0 + $0x70] sm:$0xff]  ;;  %v910_v37 = vld [vmem:[%s1453_s0 + $0x78] sm:$0xff] }
   0xc   :  { %v917_v34 = vld [vmem:[%s1453_s0 + $0xb0] sm:$0xff]  ;;  %v918_v38 = vld [vmem:[%s1453_s0 + $0xb8] sm:$0xff] }
   0xd   :  { %863 = vmatmul.msk.bf16.vlgmr.msra.gmra.mxu0 %vm258_vm2, %v895_v8  ;;  %871 = vmatmul.msk.bf16.vlgmr.msra.gmra.mxu1 %vm258_vm2, %v903_v9  ;;  %v925_v35 = vld [vmem:[%s1453_s0 + $0xf0] sm:$0xff]  ;;  %v926_v39 = vld [vmem:[%s1453_s0 + $0xf8] sm:$0xff] }
   0xe   :  { %879 = vmatmul.msk.bf16.vlgmr.msra.gmra.mxu2 %vm258_vm2, %v911_v10  ;;  %887 = vmatmul.msk.bf16.vlgmr.msra.gmra.mxu3 %vm258_vm2, %v919_v11 }
  0x1d   :  { %864 = vmatmul.msk.bf16.gmra.mxu0 %vm258_vm2, %v896_v12  ;;  %872 = vmatmul.msk.bf16.gmra.mxu1 %vm258_vm2, %v904_v13 }
  0x1e   :  { %880 = vmatmul.msk.bf16.gmra.mxu2 %vm258_vm2, %v912_v14  ;;  %888 = vmatmul.msk.bf16.gmra.mxu3 %vm258_vm2, %v920_v15 }
  0x2d   :  { %865 = vmatmul.msk.bf16.gmra.mxu0 %vm258_vm2, %v897_v16  ;;  %873 = vmatmul.msk.bf16.gmra.mxu1 %vm258_vm2, %v905_v17 }
  0x2e   :  { %881 = vmatmul.msk.bf16.gmra.mxu2 %vm258_vm2, %v913_v18  ;;  %889 = vmatmul.msk.bf16.gmra.mxu3 %vm258_vm2, %v921_v19 }
  0x3d   :  { %866 = vmatmul.msk.bf16.gmra.mxu0 %vm258_vm2, %v898_v20  ;;  %874 = vmatmul.msk.bf16.gmra.mxu1 %vm258_vm2, %v906_v21 }
  0x3e   :  { %882 = vmatmul.msk.bf16.gmra.mxu2 %vm258_vm2, %v914_v22  ;;  %890 = vmatmul.msk.bf16.gmra.mxu3 %vm258_vm2, %v922_v23 }
  0x4d   :  { %867 = vmatmul.msk.bf16.gmra.mxu0 %vm258_vm2, %v899_v24  ;;  %875 = vmatmul.msk.bf16.gmra.mxu1 %vm258_vm2, %v907_v25 }
  0x4e   :  { %883 = vmatmul.msk.bf16.gmra.mxu2 %vm258_vm2, %v915_v26  ;;  %891 = vmatmul.msk.bf16.gmra.mxu3 %vm258_vm2, %v923_v27 }
  0x5d   :  { %868 = vmatmul.msk.bf16.gmra.mxu0 %vm258_vm2, %v900_v28  ;;  %876 = vmatmul.msk.bf16.gmra.mxu1 %vm258_vm2, %v908_v29 }
  0x5e   :  { %884 = vmatmul.msk.bf16.gmra.mxu2 %vm258_vm2, %v916_v30  ;;  %892 = vmatmul.msk.bf16.gmra.mxu3 %vm258_vm2, %v924_v31 }
  0x6d   :  { %869 = vmatmul.msk.bf16.gmra.mxu0 %vm258_vm2, %v901_v32  ;;  %877 = vmatmul.msk.bf16.gmra.mxu1 %vm258_vm2, %v909_v33 }
  0x6e   :  { %885 = vmatmul.msk.bf16.gmra.mxu2 %vm258_vm2, %v917_v34  ;;  %893 = vmatmul.msk.bf16.gmra.mxu3 %vm258_vm2, %v925_v35 }
  0x7d   :  { %870 = vmatmul.msk.bf16.gmra.mxu0 %vm258_vm2, %v902_v36  ;;  %878 = vmatmul.msk.bf16.gmra.mxu1 %vm258_vm2, %v910_v37 }
  0x7e   :  { %886 = vmatmul.msk.bf16.gmra.mxu2 %vm258_vm2, %v918_v38  ;;  %894 = vmatmul.msk.bf16.gmra.mxu3 %vm258_vm2, %v926_v39 }
  0x8a   :  { %v371_v40 = vpop.f32.mrf.mxu0  ;;  %v411_v41 = vpop.f32.mrf.mxu1 }
  0x8b   :  { %v372_v43 = vadd.f32 %v1289_v42, %v371_v40  ;;  %v412_v44 = vadd.f32 %v1289_v42, %v411_v41 }
  0x8d   :  { %v531_v51 = vmax.f32 %v372_v43, 0.0  ;;  %v547_v52 = vmax.f32 %v412_v44, 0.0 }
  0x91   :  { %v451_v45 = vpop.f32.mrf.mxu2  ;;  %v491_v46 = vpop.f32.mrf.mxu3 }
  0x92   :  { %v373_v47 = vpop.f32.mrf.mxu0  ;;  %v413_v48 = vpop.f32.mrf.mxu1  ;;  %v452_v57 = vadd.f32 %v1289_v42, %v451_v45  ;;  %v492_v58 = vadd.f32 %v1289_v42, %v491_v46 }
  0x93   :  { %v374_v49 = vadd.f32 %v1289_v42, %v373_v47  ;;  %v414_v50 = vadd.f32 %v1289_v42, %v413_v48 }
  0x94   :  { %v563_v1 = vmax.f32 %v452_v57, 0.0  ;;  %v579_v2 = vmax.f32 %v492_v58, 0.0 }
  0x95   :  { %v532_v53 = vmax.f32 %v374_v49, 0.0  ;;  %v548_v54 = vmax.f32 %v414_v50, 0.0 }
  0x97   :  { %v932_v55 = vpack.c.bf16 %v532_v53, %v531_v51  ;;  %v972_v56 = vpack.c.bf16 %v548_v54, %v547_v52 }
  0x99   :  { %933 = vst [vmem:[%s1454_s3] sm:$0xff] %v932_v55   ;;  %v453_v59 = vpop.f32.mrf.mxu2  ;;  %v493_v60 = vpop.f32.mrf.mxu3 }
  0x9a   :  { %1096 = vst [vmem:[%s1454_s3 + $0x40] sm:$0xff] %v972_v56   ;;  %v454_v61 = vadd.f32 %v1289_v42, %v453_v59  ;;  %v494_v62 = vadd.f32 %v1289_v42, %v493_v60  ;;  %v376_v63 = vpop.f32.mrf.mxu0  ;;  %v416_v0 = vpop.f32.mrf.mxu1 }
  0x9b   :  { %v377_v7 = vadd.f32 %v1289_v42, %v376_v63  ;;  %v417_v8 = vadd.f32 %v1289_v42, %v416_v0 }
  0x9c   :  { %v564_v3 = vmax.f32 %v454_v61, 0.0  ;;  %v580_v4 = vmax.f32 %v494_v62, 0.0 }
  0x9d   :  { %v533_v15 = vmax.f32 %v377_v7, 0.0  ;;  %v549_v16 = vmax.f32 %v417_v8, 0.0 }
  0x9e   :  { %v1012_v5 = vpack.c.bf16 %v564_v3, %v563_v1  ;;  %v1052_v6 = vpack.c.bf16 %v580_v4, %v579_v2 }
  0xa0   :  { %1104 = vst [vmem:[%s1454_s3 + $0x80] sm:$0xff] %v1012_v5  }
  0xa1   :  { %1112 = vst [vmem:[%s1454_s3 + $0xc0] sm:$0xff] %v1052_v6   ;;  %v456_v9 = vpop.f32.mrf.mxu2  ;;  %v496_v10 = vpop.f32.mrf.mxu3 }
  0xa2   :  { %v378_v11 = vpop.f32.mrf.mxu0  ;;  %v418_v12 = vpop.f32.mrf.mxu1  ;;  %v457_v21 = vadd.f32 %v1289_v42, %v456_v9  ;;  %v497_v22 = vadd.f32 %v1289_v42, %v496_v10 }
  0xa3   :  { %v379_v13 = vadd.f32 %v1289_v42, %v378_v11  ;;  %v419_v14 = vadd.f32 %v1289_v42, %v418_v12 }
  0xa4   :  { %v565_v29 = vmax.f32 %v457_v21, 0.0  ;;  %v581_v30 = vmax.f32 %v497_v22, 0.0 }
  0xa5   :  { %v534_v17 = vmax.f32 %v379_v13, 0.0  ;;  %v550_v18 = vmax.f32 %v419_v14, 0.0 }
  0xa7   :  { %v937_v19 = vpack.c.bf16 %v534_v17, %v533_v15  ;;  %v977_v20 = vpack.c.bf16 %v550_v18, %v549_v16 }
  0xa9   :  { %1089 = vst [vmem:[%s1454_s3 + $0x8] sm:$0xff] %v937_v19   ;;  %v458_v23 = vpop.f32.mrf.mxu2  ;;  %v498_v24 = vpop.f32.mrf.mxu3 }
  0xaa   :  { %1097 = vst [vmem:[%s1454_s3 + $0x48] sm:$0xff] %v977_v20   ;;  %v459_v25 = vadd.f32 %v1289_v42, %v458_v23  ;;  %v499_v26 = vadd.f32 %v1289_v42, %v498_v24  ;;  %v381_v27 = vpop.f32.mrf.mxu0  ;;  %v421_v28 = vpop.f32.mrf.mxu1 }
  0xab   :  { %v382_v35 = vadd.f32 %v1289_v42, %v381_v27  ;;  %v422_v36 = vadd.f32 %v1289_v42, %v421_v28 }
  0xac   :  { %v566_v31 = vmax.f32 %v459_v25, 0.0  ;;  %v582_v32 = vmax.f32 %v499_v26, 0.0 }
  0xad   :  { %v535_v44 = vmax.f32 %v382_v35, 0.0  ;;  %v551_v45 = vmax.f32 %v422_v36, 0.0 }
  0xae   :  { %v1017_v33 = vpack.c.bf16 %v566_v31, %v565_v29  ;;  %v1057_v34 = vpack.c.bf16 %v582_v32, %v581_v30 }
  0xb0   :  { %1105 = vst [vmem:[%s1454_s3 + $0x88] sm:$0xff] %v1017_v33  }
  0xb1   :  { %1113 = vst [vmem:[%s1454_s3 + $0xc8] sm:$0xff] %v1057_v34   ;;  %v461_v37 = vpop.f32.mrf.mxu2  ;;  %v501_v38 = vpop.f32.mrf.mxu3 }
  0xb2   :  { %v383_v39 = vpop.f32.mrf.mxu0  ;;  %v423_v40 = vpop.f32.mrf.mxu1  ;;  %v462_v50 = vadd.f32 %v1289_v42, %v461_v37  ;;  %v502_v51 = vadd.f32 %v1289_v42, %v501_v38 }
  0xb3   :  { %v384_v41 = vadd.f32 %v1289_v42, %v383_v39  ;;  %v424_v43 = vadd.f32 %v1289_v42, %v423_v40 }
  0xb4   :  { %v567_v58 = vmax.f32 %v462_v50, 0.0  ;;  %v583_v59 = vmax.f32 %v502_v51, 0.0 }
  0xb5   :  { %v536_v46 = vmax.f32 %v384_v41, 0.0  ;;  %v552_v47 = vmax.f32 %v424_v43, 0.0 }
  0xb7   :  { %v942_v48 = vpack.c.bf16 %v536_v46, %v535_v44  ;;  %v982_v49 = vpack.c.bf16 %v552_v47, %v551_v45 }
  0xb9   :  { %1090 = vst [vmem:[%s1454_s3 + $0x10] sm:$0xff] %v942_v48   ;;  %v463_v52 = vpop.f32.mrf.mxu2  ;;  %v503_v53 = vpop.f32.mrf.mxu3 }
  0xba   :  { %1098 = vst [vmem:[%s1454_s3 + $0x50] sm:$0xff] %v982_v49   ;;  %v464_v54 = vadd.f32 %v1289_v42, %v463_v52  ;;  %v504_v55 = vadd.f32 %v1289_v42, %v503_v53  ;;  %v386_v56 = vpop.f32.mrf.mxu0  ;;  %v426_v57 = vpop.f32.mrf.mxu1 }
  0xbb   :  { %v387_v0 = vadd.f32 %v1289_v42, %v386_v56  ;;  %v427_v1 = vadd.f32 %v1289_v42, %v426_v57 }
  0xbc   :  { %v568_v60 = vmax.f32 %v464_v54, 0.0  ;;  %v584_v61 = vmax.f32 %v504_v55, 0.0 }
  0xbd   :  { %v537_v8 = vmax.f32 %v387_v0, 0.0  ;;  %v553_v9 = vmax.f32 %v427_v1, 0.0 }
  0xbe   :  { %v1022_v62 = vpack.c.bf16 %v568_v60, %v567_v58  ;;  %v1062_v63 = vpack.c.bf16 %v584_v61, %v583_v59 }
  0xc0   :  { %1106 = vst [vmem:[%s1454_s3 + $0x90] sm:$0xff] %v1022_v62  }
  0xc1   :  { %1114 = vst [vmem:[%s1454_s3 + $0xd0] sm:$0xff] %v1062_v63   ;;  %v466_v2 = vpop.f32.mrf.mxu2  ;;  %v506_v3 = vpop.f32.mrf.mxu3 }
  0xc2   :  { %v388_v4 = vpop.f32.mrf.mxu0  ;;  %v428_v5 = vpop.f32.mrf.mxu1  ;;  %v467_v14 = vadd.f32 %v1289_v42, %v466_v2  ;;  %v507_v15 = vadd.f32 %v1289_v42, %v506_v3 }
  0xc3   :  { %v389_v6 = vadd.f32 %v1289_v42, %v388_v4  ;;  %v429_v7 = vadd.f32 %v1289_v42, %v428_v5 }
  0xc4   :  { %v569_v22 = vmax.f32 %v467_v14, 0.0  ;;  %v585_v23 = vmax.f32 %v507_v15, 0.0 }
  0xc5   :  { %v538_v10 = vmax.f32 %v389_v6, 0.0  ;;  %v554_v11 = vmax.f32 %v429_v7, 0.0 }
  0xc7   :  { %v947_v12 = vpack.c.bf16 %v538_v10, %v537_v8  ;;  %v987_v13 = vpack.c.bf16 %v554_v11, %v553_v9 }
  0xc9   :  { %1091 = vst [vmem:[%s1454_s3 + $0x18] sm:$0xff] %v947_v12   ;;  %v468_v16 = vpop.f32.mrf.mxu2  ;;  %v508_v17 = vpop.f32.mrf.mxu3 }
  0xca   :  { %1099 = vst [vmem:[%s1454_s3 + $0x58] sm:$0xff] %v987_v13   ;;  %v469_v18 = vadd.f32 %v1289_v42, %v468_v16  ;;  %v509_v19 = vadd.f32 %v1289_v42, %v508_v17  ;;  %v391_v20 = vpop.f32.mrf.mxu0  ;;  %v431_v21 = vpop.f32.mrf.mxu1 }
  0xcb   :  { %v392_v28 = vadd.f32 %v1289_v42, %v391_v20  ;;  %v432_v29 = vadd.f32 %v1289_v42, %v431_v21 }
  0xcc   :  { %v570_v24 = vmax.f32 %v469_v18, 0.0  ;;  %v586_v25 = vmax.f32 %v509_v19, 0.0 }
  0xcd   :  { %v539_v36 = vmax.f32 %v392_v28, 0.0  ;;  %v555_v37 = vmax.f32 %v432_v29, 0.0 }
  0xce   :  { %v1027_v26 = vpack.c.bf16 %v570_v24, %v569_v22  ;;  %v1067_v27 = vpack.c.bf16 %v586_v25, %v585_v23 }
  0xd0   :  { %1107 = vst [vmem:[%s1454_s3 + $0x98] sm:$0xff] %v1027_v26  }
  0xd1   :  { %1115 = vst [vmem:[%s1454_s3 + $0xd8] sm:$0xff] %v1067_v27   ;;  %v471_v30 = vpop.f32.mrf.mxu2  ;;  %v511_v31 = vpop.f32.mrf.mxu3 }
  0xd2   :  { %v393_v32 = vpop.f32.mrf.mxu0  ;;  %v433_v33 = vpop.f32.mrf.mxu1  ;;  %v472_v43 = vadd.f32 %v1289_v42, %v471_v30  ;;  %v512_v44 = vadd.f32 %v1289_v42, %v511_v31 }
  0xd3   :  { %v394_v34 = vadd.f32 %v1289_v42, %v393_v32  ;;  %v434_v35 = vadd.f32 %v1289_v42, %v433_v33 }
  0xd4   :  { %v571_v51 = vmax.f32 %v472_v43, 0.0  ;;  %v587_v52 = vmax.f32 %v512_v44, 0.0 }
  0xd5   :  { %v540_v38 = vmax.f32 %v394_v34, 0.0  ;;  %v556_v39 = vmax.f32 %v434_v35, 0.0 }
  0xd7   :  { %v952_v40 = vpack.c.bf16 %v540_v38, %v539_v36  ;;  %v992_v41 = vpack.c.bf16 %v556_v39, %v555_v37 }
  0xd9   :  { %1092 = vst [vmem:[%s1454_s3 + $0x20] sm:$0xff] %v952_v40   ;;  %v473_v45 = vpop.f32.mrf.mxu2  ;;  %v513_v46 = vpop.f32.mrf.mxu3 }
  0xda   :  { %1100 = vst [vmem:[%s1454_s3 + $0x60] sm:$0xff] %v992_v41   ;;  %v474_v47 = vadd.f32 %v1289_v42, %v473_v45  ;;  %v514_v48 = vadd.f32 %v1289_v42, %v513_v46  ;;  %v396_v49 = vpop.f32.mrf.mxu0  ;;  %v436_v50 = vpop.f32.mrf.mxu1 }
  0xdb   :  { %v397_v57 = vadd.f32 %v1289_v42, %v396_v49  ;;  %v437_v58 = vadd.f32 %v1289_v42, %v436_v50 }
  0xdc   :  { %v572_v53 = vmax.f32 %v474_v47, 0.0  ;;  %v588_v54 = vmax.f32 %v514_v48, 0.0 }
  0xdd   :  { %v541_v1 = vmax.f32 %v397_v57, 0.0  ;;  %v557_v2 = vmax.f32 %v437_v58, 0.0 }
  0xde   :  { %v1032_v55 = vpack.c.bf16 %v572_v53, %v571_v51  ;;  %v1072_v56 = vpack.c.bf16 %v588_v54, %v587_v52 }
  0xe0   :  { %1108 = vst [vmem:[%s1454_s3 + $0xa0] sm:$0xff] %v1032_v55  }
  0xe1   :  { %1116 = vst [vmem:[%s1454_s3 + $0xe0] sm:$0xff] %v1072_v56   ;;  %v476_v59 = vpop.f32.mrf.mxu2  ;;  %v516_v60 = vpop.f32.mrf.mxu3 }
  0xe2   :  { %v398_v61 = vpop.f32.mrf.mxu0  ;;  %v438_v62 = vpop.f32.mrf.mxu1  ;;  %v477_v7 = vadd.f32 %v1289_v42, %v476_v59  ;;  %v517_v8 = vadd.f32 %v1289_v42, %v516_v60 }
  0xe3   :  { %v399_v63 = vadd.f32 %v1289_v42, %v398_v61  ;;  %v439_v0 = vadd.f32 %v1289_v42, %v438_v62 }
  0xe4   :  { %v573_v15 = vmax.f32 %v477_v7, 0.0  ;;  %v589_v16 = vmax.f32 %v517_v8, 0.0 }
  0xe5   :  { %v542_v3 = vmax.f32 %v399_v63, 0.0  ;;  %v558_v4 = vmax.f32 %v439_v0, 0.0 }
  0xe7   :  { %v957_v5 = vpack.c.bf16 %v542_v3, %v541_v1  ;;  %v997_v6 = vpack.c.bf16 %v558_v4, %v557_v2 }
  0xe9   :  { %1093 = vst [vmem:[%s1454_s3 + $0x28] sm:$0xff] %v957_v5   ;;  %v478_v9 = vpop.f32.mrf.mxu2  ;;  %v518_v10 = vpop.f32.mrf.mxu3 }
  0xea   :  { %1101 = vst [vmem:[%s1454_s3 + $0x68] sm:$0xff] %v997_v6   ;;  %v479_v11 = vadd.f32 %v1289_v42, %v478_v9  ;;  %v519_v12 = vadd.f32 %v1289_v42, %v518_v10  ;;  %v401_v13 = vpop.f32.mrf.mxu0  ;;  %v441_v14 = vpop.f32.mrf.mxu1 }
  0xeb   :  { %v402_v21 = vadd.f32 %v1289_v42, %v401_v13  ;;  %v442_v22 = vadd.f32 %v1289_v42, %v441_v14 }
  0xec   :  { %v574_v17 = vmax.f32 %v479_v11, 0.0  ;;  %v590_v18 = vmax.f32 %v519_v12, 0.0 }
  0xed   :  { %v543_v29 = vmax.f32 %v402_v21, 0.0  ;;  %v559_v30 = vmax.f32 %v442_v22, 0.0 }
  0xee   :  { %v1037_v19 = vpack.c.bf16 %v574_v17, %v573_v15  ;;  %v1077_v20 = vpack.c.bf16 %v590_v18, %v589_v16 }
  0xf0   :  { %1109 = vst [vmem:[%s1454_s3 + $0xa8] sm:$0xff] %v1037_v19  }
  0xf1   :  { %1117 = vst [vmem:[%s1454_s3 + $0xe8] sm:$0xff] %v1077_v20   ;;  %v481_v23 = vpop.f32.mrf.mxu2  ;;  %v521_v24 = vpop.f32.mrf.mxu3 }
  0xf2   :  { %v403_v25 = vpop.f32.mrf.mxu0  ;;  %v443_v26 = vpop.f32.mrf.mxu1  ;;  %v482_v35 = vadd.f32 %v1289_v42, %v481_v23  ;;  %v522_v36 = vadd.f32 %v1289_v42, %v521_v24 }
  0xf3   :  { %v404_v27 = vadd.f32 %v1289_v42, %v403_v25  ;;  %v444_v28 = vadd.f32 %v1289_v42, %v443_v26 }
  0xf4   :  { %v575_v44 = vmax.f32 %v482_v35, 0.0  ;;  %v591_v45 = vmax.f32 %v522_v36, 0.0 }
  0xf5   :  { %v544_v31 = vmax.f32 %v404_v27, 0.0  ;;  %v560_v32 = vmax.f32 %v444_v28, 0.0 }
  0xf7   :  { %v962_v33 = vpack.c.bf16 %v544_v31, %v543_v29  ;;  %v1002_v34 = vpack.c.bf16 %v560_v32, %v559_v30 }
  0xf9   :  { %1094 = vst [vmem:[%s1454_s3 + $0x30] sm:$0xff] %v962_v33   ;;  %v483_v37 = vpop.f32.mrf.mxu2  ;;  %v523_v38 = vpop.f32.mrf.mxu3 }
  0xfa   :  { %1102 = vst [vmem:[%s1454_s3 + $0x70] sm:$0xff] %v1002_v34   ;;  %v484_v39 = vadd.f32 %v1289_v42, %v483_v37  ;;  %v524_v40 = vadd.f32 %v1289_v42, %v523_v38  ;;  %v406_v41 = vpop.f32.mrf.mxu0  ;;  %v446_v43 = vpop.f32.mrf.mxu1 }
  0xfb   :  { %v407_v50 = vadd.f32 %v1289_v42, %v406_v41  ;;  %v447_v51 = vadd.f32 %v1289_v42, %v446_v43 }
  0xfc   :  { %v576_v46 = vmax.f32 %v484_v39, 0.0  ;;  %v592_v47 = vmax.f32 %v524_v40, 0.0 }
  0xfd   :  { %v545_v58 = vmax.f32 %v407_v50, 0.0  ;;  %v561_v59 = vmax.f32 %v447_v51, 0.0 }
  0xfe   :  { %v1042_v48 = vpack.c.bf16 %v576_v46, %v575_v44  ;;  %v1082_v49 = vpack.c.bf16 %v592_v47, %v591_v45 }
 0x100   :  { %1110 = vst [vmem:[%s1454_s3 + $0xb0] sm:$0xff] %v1042_v48  }
 0x101   :  { %1118 = vst [vmem:[%s1454_s3 + $0xf0] sm:$0xff] %v1082_v49   ;;  %v486_v52 = vpop.f32.mrf.mxu2  ;;  %v526_v53 = vpop.f32.mrf.mxu3 }
 0x102   :  { %v408_v54 = vpop.f32.mrf.mxu0  ;;  %v448_v55 = vpop.f32.mrf.mxu1  ;;  %v487_v0 = vadd.f32 %v1289_v42, %v486_v52  ;;  %v527_v1 = vadd.f32 %v1289_v42, %v526_v53 }
 0x103   :  { %v409_v56 = vadd.f32 %v1289_v42, %v408_v54  ;;  %v449_v57 = vadd.f32 %v1289_v42, %v448_v55 }
 0x104   :  { %v577_v6 = vmax.f32 %v487_v0, 0.0  ;;  %v593_v7 = vmax.f32 %v527_v1, 0.0 }
 0x105   :  { %v546_v60 = vmax.f32 %v409_v56, 0.0  ;;  %v562_v61 = vmax.f32 %v449_v57, 0.0 }
 0x107   :  { %v967_v62 = vpack.c.bf16 %v546_v60, %v545_v58  ;;  %v1007_v63 = vpack.c.bf16 %v562_v61, %v561_v59 }
 0x109   :  { %1095 = vst [vmem:[%s1454_s3 + $0x38] sm:$0xff] %v967_v62   ;;  %v488_v2 = vpop.f32.mrf.mxu2  ;;  %v528_v3 = vpop.f32.mrf.mxu3 }
 0x10a   :  { %1103 = vst [vmem:[%s1454_s3 + $0x78] sm:$0xff] %v1007_v63   ;;  %v489_v4 = vadd.f32 %v1289_v42, %v488_v2  ;;  %v529_v5 = vadd.f32 %v1289_v42, %v528_v3 }
 0x10c   :  { %v578_v8 = vmax.f32 %v489_v4, 0.0  ;;  %v594_v9 = vmax.f32 %v529_v5, 0.0 }
 0x10e   :  { %v1047_v10 = vpack.c.bf16 %v578_v8, %v577_v6  ;;  %v1087_v11 = vpack.c.bf16 %v594_v9, %v593_v7 }
 0x110   :  { %1111 = vst [vmem:[%s1454_s3 + $0xb8] sm:$0xff] %v1047_v10  }
 0x111   :  { %1119 = vst [vmem:[%s1454_s3 + $0xf8] sm:$0xff] %v1087_v11  }

// kernel: generalized_rcnn_forward.4
= control target key start
LH: loop header
LB: loop body
LE: loop exit
PB: predicated region body
PF: predicated region fallthrough
CT: control target
= control target key end

     0   :  { %vm449_vm0 = vcmask 130048   ;;  %s2634_s1 = inlined_call_operand.vmem [shape: bf16[144,128], index: 1, kind: input, shape index: {}]   ;;  %s2635_s0 = inlined_call_operand.vmem [shape: bf16[512,144], index: 0, kind: input, shape index: {}]   ;;  %s2636_s2 = inlined_call_operand.vmem [shape: f32[1,128], index: 2, kind: input, shape index: {}]   ;;  %s2637_s3 = inlined_call_operand.vmem [shape: bf16[128,128], index: 3, kind: input, shape index: {}]   ;;  %s2638_s4 = inlined_call_operand.vmem [shape: f32[1,128], index: 4, kind: input, shape index: {}]   ;;  %s2639_s5 = inlined_call_operand.vmem [shape: f32[512,128], index: 5, kind: output, shape index: {}]  }
   0x1   :  { %v1712_v0 = vld [vmem:[%s2634_s1 + $0x38] sm:$0xff]  ;;  %v1713_v1 = vld [vmem:[%s2634_s1 + $0x40] sm:$0xff]  ;;  %v1289_v3 = vld [vmem:[%s2635_s0 + $0x8] sm:$0xf0] }
   0x2   :  { %v1641_v2 = vld [vmem:[%s2635_s0 + $0x4] sm:$0xf]  ;;  %546 = vmatpush.bf16.msra.mxu0 %v1712_v0  ;;  %722 = vmatpush.bf16.msra.mxu1 %v1713_v1  ;;  %v1711_v5 = vld [vmem:[%s2634_s1 + $0x30] sm:$0xff]  ;;  %v1710_v6 = vld [vmem:[%s2634_s1 + $0x28] sm:$0xff] }
   0x3   :  { %v1292_v4 = vor.u32 %v1641_v2, %v1289_v3  ;;  %1722 = vmatpush.bf16.msra.mxu3 %v1712_v0  ;;  %v1709_v7 = vld [vmem:[%s2634_s1 + $0x20] sm:$0xff]  ;;  %v1708_v8 = vld [vmem:[%s2634_s1 + $0x18] sm:$0xff]  ;;  %v1643_v9 = vld [vmem:[%s2635_s0 + $0x14] sm:$0xf] }
   0x4   :  { %v1297_v10 = vld [vmem:[%s2635_s0 + $0x18] sm:$0xf0]  ;;  %v1707_v12 = vld [vmem:[%s2634_s1 + $0x10] sm:$0xff]  ;;  %v1706_v13 = vld [vmem:[%s2634_s1 + $0x8] sm:$0xff] }
   0x5   :  { %1577 = vmatmul.msk.bf16.vlgmr.msra.gmra.mxu1 %vm449_vm0, %v1292_v4  ;;  %v1300_v11 = vor.u32 %v1643_v9, %v1297_v10  ;;  %v1705_v14 = vld [vmem:[%s2634_s1] sm:$0xff]  ;;  %v1642_v16 = vld [vmem:[%s2635_s0 + $0x4] sm:$0xf0]  ;;  %v1305_v19 = vld [vmem:[%s2635_s0 + $0x28] sm:$0xf0] }
   0x6   :  { %547 = vmatpush.bf16.msra.mxu0 %v1711_v5  ;;  %v1287_v15 = vld [vmem:[%s2635_s0] sm:$0xf]  ;;  %v1645_v18 = vld [vmem:[%s2635_s0 + $0x24] sm:$0xf]  ;;  %v1295_v21 = vld [vmem:[%s2635_s0 + $0x10] sm:$0xf] }
   0x7   :  { %1723 = vmatpush.bf16.msra.mxu3 %v1711_v5  ;;  %v1288_v17 = vor.u32 %v1642_v16, %v1287_v15  ;;  %v1308_v20 = vor.u32 %v1645_v18, %v1305_v19  ;;  %v1644_v22 = vld [vmem:[%s2635_s0 + $0x14] sm:$0xf0]  ;;  %v1647_v24 = vld [vmem:[%s2635_s0 + $0x34] sm:$0xf]  ;;  %v1313_v25 = vld [vmem:[%s2635_s0 + $0x38] sm:$0xf0] }
   0x8   :  { %v1296_v23 = vor.u32 %v1644_v22, %v1295_v21  ;;  %v1316_v26 = vor.u32 %v1647_v24, %v1313_v25  ;;  %v1303_v27 = vld [vmem:[%s2635_s0 + $0x20] sm:$0xf]  ;;  %v1646_v28 = vld [vmem:[%s2635_s0 + $0x24] sm:$0xf0]  ;;  %v1649_v30 = vld [vmem:[%s2635_s0 + $0x44] sm:$0xf] }
   0x9   :  { %v1304_v29 = vor.u32 %v1646_v28, %v1303_v27  ;;  %v1321_v31 = vld [vmem:[%s2635_s0 + $0x48] sm:$0xf0]  ;;  %v1311_v33 = vld [vmem:[%s2635_s0 + $0x30] sm:$0xf]  ;;  %v1648_v34 = vld [vmem:[%s2635_s0 + $0x34] sm:$0xf0] }
   0xa   :  { %548 = vmatpush.bf16.msra.mxu0 %v1710_v6  ;;  %v1324_v32 = vor.u32 %v1649_v30, %v1321_v31  ;;  %v1312_v35 = vor.u32 %v1648_v34, %v1311_v33  ;;  %v1651_v36 = vld [vmem:[%s2635_s0 + $0x54] sm:$0xf]  ;;  %v1329_v37 = vld [vmem:[%s2635_s0 + $0x58] sm:$0xf0]  ;;  %v1319_v39 = vld [vmem:[%s2635_s0 + $0x40] sm:$0xf] }
   0xb   :  { %1724 = vmatpush.bf16.msra.mxu3 %v1710_v6  ;;  %v1332_v38 = vor.u32 %v1651_v36, %v1329_v37  ;;  %v1650_v40 = vld [vmem:[%s2635_s0 + $0x44] sm:$0xf0]  ;;  %v1653_v42 = vld [vmem:[%s2635_s0 + $0x64] sm:$0xf]  ;;  %v1337_v43 = vld [vmem:[%s2635_s0 + $0x68] sm:$0xf0] }
   0xc   :  { %v1320_v41 = vor.u32 %v1650_v40, %v1319_v39  ;;  %v1340_v44 = vor.u32 %v1653_v42, %v1337_v43  ;;  %v1327_v45 = vld [vmem:[%s2635_s0 + $0x50] sm:$0xf]  ;;  %v1652_v46 = vld [vmem:[%s2635_s0 + $0x54] sm:$0xf0]  ;;  %v1655_v49 = vld [vmem:[%s2635_s0 + $0x74] sm:$0xf] }
   0xd   :  { %v1721_v47 = vld [vmem:[%s2637_s3 + $0x38] sm:$0xff]  ;;  %v1328_v48 = vor.u32 %v1652_v46, %v1327_v45  ;;  %v1720_v52 = vld [vmem:[%s2637_s3 + $0x30] sm:$0xff]  ;;  %v1719_v53 = vld [vmem:[%s2637_s3 + $0x28] sm:$0xff] }
   0xe   :  { %549 = vmatpush.bf16.msra.mxu0 %v1709_v7  ;;  %1048 = vmatpush.bf16.msra.mxu2 %v1721_v47  ;;  %v1345_v50 = vld [vmem:[%s2635_s0 + $0x78] sm:$0xf0]  ;;  %v1335_v54 = vld [vmem:[%s2635_s0 + $0x60] sm:$0xf]  ;;  %v1654_v55 = vld [vmem:[%s2635_s0 + $0x64] sm:$0xf0] }
   0xf   :  { %1725 = vmatpush.bf16.msra.mxu3 %v1709_v7  ;;  %v1348_v51 = vor.u32 %v1655_v49, %v1345_v50  ;;  %v1718_v56 = vld [vmem:[%s2637_s3 + $0x20] sm:$0xff]  ;;  %v1336_v57 = vor.u32 %v1654_v55, %v1335_v54  ;;  %v1353_v59 = vld [vmem:[%s2635_s0 + $0x88] sm:$0xf0]  ;;  %v1717_v60 = vld [vmem:[%s2637_s3 + $0x18] sm:$0xff] }
  0x10   :  { %v1657_v58 = vld [vmem:[%s2635_s0 + $0x84] sm:$0xf]  ;;  %v1716_v63 = vld [vmem:[%s2637_s3 + $0x10] sm:$0xff]  ;;  %v1715_v0 = vld [vmem:[%s2637_s3 + $0x8] sm:$0xff] }
  0x11   :  { %v1356_v61 = vor.u32 %v1657_v58, %v1353_v59  ;;  %v1343_v2 = vld [vmem:[%s2635_s0 + $0x70] sm:$0xf]  ;;  %v1656_v3 = vld [vmem:[%s2635_s0 + $0x74] sm:$0xf0]  ;;  %v1714_v4 = vld [vmem:[%s2637_s3] sm:$0xff] }
  0x12   :  { %550 = vmatpush.bf16.msra.mxu0 %v1708_v8  ;;  %1049 = vmatpush.bf16.msra.mxu2 %v1720_v52  ;;  %v1344_v5 = vor.u32 %v1656_v3, %v1343_v2  ;;  %v1659_v6 = vld [vmem:[%s2635_s0 + $0x94] sm:$0xf]  ;;  %v1361_v7 = vld [vmem:[%s2635_s0 + $0x98] sm:$0xf0]  ;;  %v1479_v10 = vld [vmem:[%s2635_s0 + $0x180] sm:$0xf] }
  0x13   :  { %1726 = vmatpush.bf16.msra.mxu3 %v1708_v8  ;;  %v1364_v8 = vor.u32 %v1659_v6, %v1361_v7  ;;  %v1658_v15 = vld [vmem:[%s2635_s0 + $0x84] sm:$0xf0]  ;;  %v1661_v18 = vld [vmem:[%s2635_s0 + $0xa4] sm:$0xf]  ;;  %v1369_v19 = vld [vmem:[%s2635_s0 + $0xa8] sm:$0xf0] }
  0x14   :  { %v1372_v21 = vor.u32 %v1661_v18, %v1369_v19  ;;  %v1487_v25 = vld [vmem:[%s2635_s0 + $0x190] sm:$0xf]  ;;  %v1660_v33 = vld [vmem:[%s2635_s0 + $0x94] sm:$0xf0]  ;;  %v1663_v39 = vld [vmem:[%s2635_s0 + $0xb4] sm:$0xf] }
  0x15   :  { %1578 = vmatmul.msk.bf16.gmra.mxu1 %vm449_vm0, %v1300_v11  ;;  %v1690_v11 = vld [vmem:[%s2635_s0 + $0x184] sm:$0xf0]  ;;  %v1377_v40 = vld [vmem:[%s2635_s0 + $0xb8] sm:$0xf0]  ;;  %v1495_v45 = vld [vmem:[%s2635_s0 + $0x1a0] sm:$0xf] }
  0x16   :  { %551 = vmatpush.bf16.msra.mxu0 %v1707_v12  ;;  %1050 = vmatpush.bf16.msra.mxu2 %v1719_v53  ;;  %v1694_v46 = vld [vmem:[%s2635_s0 + $0x1a4] sm:$0xf0]  ;;  %v1665_v59 = vld [vmem:[%s2635_s0 + $0xc4] sm:$0xf]  ;;  %v1696_v2 = vld [vmem:[%s2635_s0 + $0x1b4] sm:$0xf0] }
  0x17   :  { %1727 = vmatpush.bf16.msra.mxu3 %v1707_v12  ;;  %v1480_v12 = vor.u32 %v1690_v11, %v1479_v10  ;;  %v1496_v49 = vor.u32 %v1694_v46, %v1495_v45 }
  0x1a   :  { %552 = vmatpush.bf16.msra.mxu0 %v1706_v13  ;;  %1051 = vmatpush.bf16.msra.mxu2 %v1718_v56 }
  0x1b   :  { %1728 = vmatpush.bf16.msra.mxu3 %v1706_v13 }
  0x1e   :  { %553 = vmatpush.bf16.msra.mxu0 %v1705_v14  ;;  %1052 = vmatpush.bf16.msra.mxu2 %v1717_v60 }
  0x1f   :  { %1729 = vmatpush.bf16.msra.mxu3 %v1705_v14  ;;  %v1351_v14 = vld [vmem:[%s2635_s0 + $0x80] sm:$0xf] }
  0x20   :  { %v1352_v16 = vor.u32 %v1658_v15, %v1351_v14  ;;  %v1667_v15 = vld [vmem:[%s2635_s0 + $0xd4] sm:$0xf] }
  0x21   :  { %554 = vmatmul.bf16.vlgmr.msra.gmra.mxu0 %v1288_v17 }
  0x22   :  { %1053 = vmatpush.bf16.msra.mxu2 %v1716_v63  ;;  %674 = vmatmul.bf16.vlgmr.msra.gmra.mxu3 %v1480_v12 }
  0x23   :  { %1730 = vmatpush.bf16.msrb.mxu3 %v1713_v1 }
  0x25   :  { %1579 = vmatmul.msk.bf16.gmra.mxu1 %vm449_vm0, %v1308_v20  ;;  %v1963_v20 = vld [vmem:[%s2636_s2] ss:$0 sm:$0xff] }
  0x26   :  { %1054 = vmatpush.bf16.msra.mxu2 %v1715_v0 }
  0x27   :  { %1731 = vmatpush.bf16.msra.mxu3 %v1721_v47 }
  0x2a   :  { %1055 = vmatpush.bf16.msra.mxu2 %v1714_v4 }
  0x2b   :  { %1732 = vmatpush.bf16.msra.mxu3 %v1720_v52  ;;  %v1367_v52 = vld [vmem:[%s2635_s0 + $0xa0] sm:$0xf] }
  0x2f   :  { %1733 = vmatpush.bf16.msra.mxu3 %v1719_v53  ;;  %v1662_v53 = vld [vmem:[%s2635_s0 + $0xa4] sm:$0xf0] }
  0x31   :  { %559 = vmatmul.bf16.gmra.mxu0 %v1296_v23 }
  0x33   :  { %1734 = vmatpush.bf16.msra.mxu3 %v1718_v56 }
  0x35   :  { %1580 = vmatmul.msk.bf16.gmra.mxu1 %vm449_vm0, %v1316_v26  ;;  %v1692_v26 = vld [vmem:[%s2635_s0 + $0x194] sm:$0xf0] }
  0x37   :  { %1735 = vmatpush.bf16.msra.mxu3 %v1717_v60  ;;  %v1385_v60 = vld [vmem:[%s2635_s0 + $0xc8] sm:$0xf0] }
  0x3b   :  { %1736 = vmatpush.bf16.msra.mxu3 %v1716_v63 }
  0x3f   :  { %1737 = vmatpush.bf16.msra.mxu3 %v1715_v0 }
  0x41   :  { %564 = vmatmul.bf16.gmra.mxu0 %v1304_v29  ;;  %v1488_v29 = vor.u32 %v1692_v26, %v1487_v25 }
  0x43   :  { %679 = vmatmul.bf16.gmra.mxu3 %v1488_v29  ;;  %v1383_v29 = vld [vmem:[%s2635_s0 + $0xc0] sm:$0xf] }
  0x44   :  { %1738 = vmatpush.bf16.msra.mxu3 %v1714_v4 }
  0x45   :  { %1581 = vmatmul.msk.bf16.gmra.mxu1 %vm449_vm0, %v1324_v32  ;;  %v1359_v32 = vld [vmem:[%s2635_s0 + $0x90] sm:$0xf] }
  0x46   :  { %v1360_v37 = vor.u32 %v1660_v33, %v1359_v32 }
  0x51   :  { %569 = vmatmul.bf16.gmra.mxu0 %v1312_v35 }
  0x53   :  { %684 = vmatmul.bf16.gmra.mxu3 %v1496_v49  ;;  %v1391_v49 = vld [vmem:[%s2635_s0 + $0xd0] sm:$0xf] }
  0x55   :  { %1582 = vmatmul.msk.bf16.gmra.mxu1 %vm449_vm0, %v1332_v38 }
  0x61   :  { %574 = vmatmul.bf16.gmra.mxu0 %v1320_v41  ;;  %v1380_v41 = vor.u32 %v1663_v39, %v1377_v40 }
  0x65   :  { %1583 = vmatmul.msk.bf16.gmra.mxu1 %vm449_vm0, %v1340_v44 }
  0x71   :  { %579 = vmatmul.bf16.gmra.mxu0 %v1328_v48 }
  0x75   :  { %1584 = vmatmul.msk.bf16.gmra.mxu1 %vm449_vm0, %v1348_v51 }
  0x81   :  { %584 = vmatmul.bf16.gmra.mxu0 %v1336_v57  ;;  %v1368_v57 = vor.u32 %v1662_v53, %v1367_v52 }
  0x82   :  { %v724_v62 = vpop.f32.mrf.mxu1 }
  0x85   :  { %1585 = vmatmul.msk.bf16.gmra.mxu1 %vm449_vm0, %v1356_v61  ;;  %v1388_v61 = vor.u32 %v1665_v59, %v1385_v60 }
  0x8a   :  { %v726_v1 = vpop.f32.mrf.mxu1 }
  0x91   :  { %589 = vmatmul.bf16.gmra.mxu0 %v1344_v5 }
  0x92   :  { %v729_v9 = vpop.f32.mrf.mxu1 }
  0x95   :  { %1586 = vmatmul.msk.bf16.gmra.mxu1 %vm449_vm0, %v1364_v8  ;;  %v1375_v8 = vld [vmem:[%s2635_s0 + $0xb0] sm:$0xf] }
  0x9a   :  { %v731_v13 = vpop.f32.mrf.mxu1 }
  0x9e   :  { %v555_v17 = vpop.f32.mrf.mxu0 }
  0x9f   :  { %v556_v23 = vadd.f32 %v1963_v20, %v555_v17 }
  0xa1   :  { %594 = vmatmul.bf16.gmra.mxu0 %v1352_v16  ;;  %v725_v27 = vadd.f32 %v724_v62, %v556_v23  ;;  %v1393_v16 = vld [vmem:[%s2635_s0 + $0xd8] sm:$0xf0]  ;;  %v1698_v23 = vld [vmem:[%s2635_s0 + $0x1c4] sm:$0xf0] }
  0xa2   :  { %v734_v22 = vpop.f32.mrf.mxu1  ;;  %v1396_v17 = vor.u32 %v1667_v15, %v1393_v16 }
  0xa3   :  { %v884_v34 = vmax.f32 %v725_v27, 0.0 }
  0xa5   :  { %1587 = vmatmul.msk.bf16.gmra.mxu1 %vm449_vm0, %v1372_v21 }
  0xa6   :  { %v557_v24 = vpop.f32.mrf.mxu0 }
  0xa7   :  { %v558_v28 = vadd.f32 %v1963_v20, %v557_v24 }
  0xa9   :  { %v727_v30 = vadd.f32 %v726_v1, %v558_v28  ;;  %v1503_v1 = vld [vmem:[%s2635_s0 + $0x1b0] sm:$0xf] }
  0xaa   :  { %v736_v31 = vpop.f32.mrf.mxu1  ;;  %v1504_v5 = vor.u32 %v1696_v2, %v1503_v1 }
  0xab   :  { %v885_v35 = vmax.f32 %v727_v30, 0.0  ;;  %v1666_v30 = vld [vmem:[%s2635_s0 + $0xc4] sm:$0xf0] }
  0xac   :  { %689 = vmatmul.bf16.gmra.mxu3 %v1504_v5  ;;  %v1399_v5 = vld [vmem:[%s2635_s0 + $0xe0] sm:$0xf] }
  0xad   :  { %v948_v36 = vpack.c.bf16 %v885_v35, %v884_v34  ;;  %v1384_v34 = vor.u32 %v1666_v30, %v1383_v29 }
  0xae   :  { %v560_v38 = vpop.f32.mrf.mxu0 }
  0xaf   :  { %1056 = vmatmul.bf16.vlgmr.msra.gmra.mxu2 %v948_v36  ;;  %v561_v43 = vadd.f32 %v1963_v20, %v560_v38  ;;  %v1669_v36 = vld [vmem:[%s2635_s0 + $0xe4] sm:$0xf] }
  0xb1   :  { %599 = vmatmul.bf16.gmra.mxu0 %v1360_v37  ;;  %v730_v47 = vadd.f32 %v729_v9, %v561_v43  ;;  %v1664_v9 = vld [vmem:[%s2635_s0 + $0xb4] sm:$0xf0]  ;;  %v1401_v37 = vld [vmem:[%s2635_s0 + $0xe8] sm:$0xf0] }
  0xb2   :  { %v739_v42 = vpop.f32.mrf.mxu1  ;;  %v1404_v38 = vor.u32 %v1669_v36, %v1401_v37  ;;  %v1700_v43 = vld [vmem:[%s2635_s0 + $0x1d4] sm:$0xf0] }
  0xb3   :  { %v886_v54 = vmax.f32 %v730_v47, 0.0 }
  0xb5   :  { %1588 = vmatmul.msk.bf16.gmra.mxu1 %vm449_vm0, %v1380_v41 }
  0xb6   :  { %v562_v44 = vpop.f32.mrf.mxu0 }
  0xb7   :  { %v563_v48 = vadd.f32 %v1963_v20, %v562_v44 }
  0xb9   :  { %v732_v50 = vadd.f32 %v731_v13, %v563_v48  ;;  %v1376_v13 = vor.u32 %v1664_v9, %v1375_v8 }
  0xba   :  { %v741_v51 = vpop.f32.mrf.mxu1 }
  0xbb   :  { %v887_v55 = vmax.f32 %v732_v50, 0.0  ;;  %v1668_v50 = vld [vmem:[%s2635_s0 + $0xd4] sm:$0xf0] }
  0xbd   :  { %v949_v56 = vpack.c.bf16 %v887_v55, %v886_v54  ;;  %v1392_v54 = vor.u32 %v1668_v50, %v1391_v49 }
  0xbe   :  { %v565_v58 = vpop.f32.mrf.mxu0 }
  0xbf   :  { %1061 = vmatmul.bf16.gmra.mxu2 %v949_v56  ;;  %v566_v63 = vadd.f32 %v1963_v20, %v565_v58  ;;  %v1671_v56 = vld [vmem:[%s2635_s0 + $0xf4] sm:$0xf] }
  0xc1   :  { %604 = vmatmul.bf16.gmra.mxu0 %v1368_v57  ;;  %v735_v3 = vadd.f32 %v734_v22, %v566_v63  ;;  %v1511_v22 = vld [vmem:[%s2635_s0 + $0x1c0] sm:$0xf]  ;;  %v1409_v57 = vld [vmem:[%s2635_s0 + $0xf8] sm:$0xf0]  ;;  %v1702_v63 = vld [vmem:[%s2635_s0 + $0x1e4] sm:$0xf0] }
  0xc2   :  { %v744_v62 = vpop.f32.mrf.mxu1  ;;  %v1512_v26 = vor.u32 %v1698_v23, %v1511_v22  ;;  %v1412_v58 = vor.u32 %v1671_v56, %v1409_v57 }
  0xc3   :  { %v888_v10 = vmax.f32 %v735_v3, 0.0 }
  0xc4   :  { %694 = vmatmul.bf16.gmra.mxu3 %v1512_v26  ;;  %v1407_v26 = vld [vmem:[%s2635_s0 + $0xf0] sm:$0xf] }
  0xc5   :  { %1589 = vmatmul.msk.bf16.gmra.mxu1 %vm449_vm0, %v1388_v61 }
  0xc6   :  { %v567_v0 = vpop.f32.mrf.mxu0 }
  0xc7   :  { %v568_v4 = vadd.f32 %v1963_v20, %v567_v0 }
  0xc9   :  { %v737_v6 = vadd.f32 %v736_v31, %v568_v4 }
  0xca   :  { %v746_v7 = vpop.f32.mrf.mxu1 }
  0xcb   :  { %v889_v11 = vmax.f32 %v737_v6, 0.0  ;;  %v1670_v6 = vld [vmem:[%s2635_s0 + $0xe4] sm:$0xf0] }
  0xcd   :  { %v950_v12 = vpack.c.bf16 %v889_v11, %v888_v10  ;;  %v1400_v10 = vor.u32 %v1670_v6, %v1399_v5 }
  0xce   :  { %v570_v14 = vpop.f32.mrf.mxu0 }
  0xcf   :  { %1066 = vmatmul.bf16.gmra.mxu2 %v950_v12  ;;  %v571_v19 = vadd.f32 %v1963_v20, %v570_v14  ;;  %v1673_v12 = vld [vmem:[%s2635_s0 + $0x104] sm:$0xf] }
  0xd1   :  { %609 = vmatmul.bf16.gmra.mxu0 %v1376_v13  ;;  %v740_v24 = vadd.f32 %v739_v42, %v571_v19  ;;  %v1519_v42 = vld [vmem:[%s2635_s0 + $0x1d0] sm:$0xf]  ;;  %v1417_v13 = vld [vmem:[%s2635_s0 + $0x108] sm:$0xf0]  ;;  %v1704_v19 = vld [vmem:[%s2635_s0 + $0x1f4] sm:$0xf0] }
  0xd2   :  { %v749_v18 = vpop.f32.mrf.mxu1  ;;  %v1520_v46 = vor.u32 %v1700_v43, %v1519_v42  ;;  %v1420_v14 = vor.u32 %v1673_v12, %v1417_v13 }
  0xd3   :  { %v890_v31 = vmax.f32 %v740_v24, 0.0 }
  0xd4   :  { %699 = vmatmul.bf16.gmra.mxu3 %v1520_v46  ;;  %v1415_v46 = vld [vmem:[%s2635_s0 + $0x100] sm:$0xf] }
  0xd5   :  { %1590 = vmatmul.msk.bf16.gmra.mxu1 %vm449_vm0, %v1396_v17 }
  0xd6   :  { %v572_v21 = vpop.f32.mrf.mxu0 }
  0xd7   :  { %v573_v25 = vadd.f32 %v1963_v20, %v572_v21 }
  0xd9   :  { %v742_v27 = vadd.f32 %v741_v51, %v573_v25 }
  0xda   :  { %v751_v28 = vpop.f32.mrf.mxu1 }
  0xdb   :  { %v891_v32 = vmax.f32 %v742_v27, 0.0  ;;  %v1672_v27 = vld [vmem:[%s2635_s0 + $0xf4] sm:$0xf0] }
  0xdd   :  { %v951_v33 = vpack.c.bf16 %v891_v32, %v890_v31  ;;  %v1408_v31 = vor.u32 %v1672_v27, %v1407_v26  ;;  %v1431_v27 = vld [vmem:[%s2635_s0 + $0x120] sm:$0xf] }
  0xde   :  { %v575_v35 = vpop.f32.mrf.mxu0 }
  0xdf   :  { %1071 = vmatmul.bf16.gmra.mxu2 %v951_v33  ;;  %v576_v40 = vadd.f32 %v1963_v20, %v575_v35  ;;  %v1675_v33 = vld [vmem:[%s2635_s0 + $0x114] sm:$0xf] }
  0xe1   :  { %614 = vmatmul.bf16.gmra.mxu0 %v1384_v34  ;;  %v745_v44 = vadd.f32 %v744_v62, %v576_v40  ;;  %v1527_v62 = vld [vmem:[%s2635_s0 + $0x1e0] sm:$0xf]  ;;  %v1425_v34 = vld [vmem:[%s2635_s0 + $0x118] sm:$0xf0]  ;;  %v1497_v40 = vld [vmem:[%s2635_s0 + $0x1a8] sm:$0xf0] }
  0xe2   :  { %v754_v39 = vpop.f32.mrf.mxu1  ;;  %v1528_v2 = vor.u32 %v1702_v63, %v1527_v62  ;;  %v1428_v35 = vor.u32 %v1675_v33, %v1425_v34 }
  0xe3   :  { %v892_v51 = vmax.f32 %v745_v44, 0.0 }
  0xe4   :  { %704 = vmatmul.bf16.gmra.mxu3 %v1528_v2  ;;  %v1423_v2 = vld [vmem:[%s2635_s0 + $0x110] sm:$0xf] }
  0xe5   :  { %1591 = vmatmul.msk.bf16.gmra.mxu1 %vm449_vm0, %v1404_v38 }
  0xe6   :  { %v577_v41 = vpop.f32.mrf.mxu0 }
  0xe7   :  { %v578_v45 = vadd.f32 %v1963_v20, %v577_v41 }
  0xe9   :  { %v747_v47 = vadd.f32 %v746_v7, %v578_v45 }
  0xea   :  { %v756_v48 = vpop.f32.mrf.mxu1 }
  0xeb   :  { %v893_v52 = vmax.f32 %v747_v47, 0.0  ;;  %v1674_v47 = vld [vmem:[%s2635_s0 + $0x104] sm:$0xf0] }
  0xed   :  { %v952_v53 = vpack.c.bf16 %v893_v52, %v892_v51  ;;  %v1416_v51 = vor.u32 %v1674_v47, %v1415_v46 }
  0xee   :  { %v580_v55 = vpop.f32.mrf.mxu0 }
  0xef   :  { %1076 = vmatmul.bf16.gmra.mxu2 %v952_v53  ;;  %v581_v60 = vadd.f32 %v1963_v20, %v580_v55  ;;  %v1677_v53 = vld [vmem:[%s2635_s0 + $0x124] sm:$0xf] }
  0xf1   :  { %619 = vmatmul.bf16.gmra.mxu0 %v1392_v54  ;;  %v750_v0 = vadd.f32 %v749_v18, %v581_v60  ;;  %v1535_v18 = vld [vmem:[%s2635_s0 + $0x1f0] sm:$0xf]  ;;  %v1433_v54 = vld [vmem:[%s2635_s0 + $0x128] sm:$0xf0]  ;;  %v1505_v60 = vld [vmem:[%s2635_s0 + $0x1b8] sm:$0xf0] }
  0xf2   :  { %v759_v59 = vpop.f32.mrf.mxu1  ;;  %v1536_v23 = vor.u32 %v1704_v19, %v1535_v18  ;;  %v1436_v55 = vor.u32 %v1677_v53, %v1433_v54  ;;  %v1697_v18 = vld [vmem:[%s2635_s0 + $0x1c4] sm:$0xf]  ;;  %v1513_v19 = vld [vmem:[%s2635_s0 + $0x1c8] sm:$0xf0]  ;;  %v2218_v53 = vpop.f32.mrf.mxu3 }
  0xf3   :  { %v894_v7 = vmax.f32 %v750_v0, 0.0 }
  0xf4   :  { %709 = vmatmul.bf16.gmra.mxu3 %v1536_v23  ;;  %v1516_v23 = vor.u32 %v1697_v18, %v1513_v19 }
  0xf5   :  { %1592 = vmatmul.msk.bf16.gmra.mxu1 %vm449_vm0, %v1412_v58 }
  0xf6   :  { %v582_v61 = vpop.f32.mrf.mxu0 }
  0xf7   :  { %v583_v1 = vadd.f32 %v1963_v20, %v582_v61 }
  0xf9   :  { %v752_v3 = vadd.f32 %v751_v28, %v583_v1 }
  0xfa   :  { %v761_v4 = vpop.f32.mrf.mxu1 }
  0xfb   :  { %v895_v8 = vmax.f32 %v752_v3, 0.0  ;;  %v1676_v3 = vld [vmem:[%s2635_s0 + $0x114] sm:$0xf0] }
  0xfd   :  { %v953_v9 = vpack.c.bf16 %v895_v8, %v894_v7  ;;  %v1424_v7 = vor.u32 %v1676_v3, %v1423_v2  ;;  %v2234_v3 = vpop.f32.mrf.mxu3 }
  0xfe   :  { %v585_v11 = vpop.f32.mrf.mxu0 }
  0xff   :  { %1081 = vmatmul.bf16.gmra.mxu2 %v953_v9  ;;  %v586_v16 = vadd.f32 %v1963_v20, %v585_v11  ;;  %v1679_v9 = vld [vmem:[%s2635_s0 + $0x134] sm:$0xf]  ;;  %v2161_v11 = vld [vmem:[%s2638_s4] ss:$0 sm:$0xff] }
 0x101   :  { %624 = vmatmul.bf16.gmra.mxu0 %v1400_v10  ;;  %v755_v21 = vadd.f32 %v754_v39, %v586_v16  ;;  %v1693_v39 = vld [vmem:[%s2635_s0 + $0x1a4] sm:$0xf]  ;;  %v1441_v10 = vld [vmem:[%s2635_s0 + $0x138] sm:$0xf0] }
 0x102   :  { %v764_v15 = vpop.f32.mrf.mxu1  ;;  %v1500_v43 = vor.u32 %v1693_v39, %v1497_v40  ;;  %v1444_v12 = vor.u32 %v1679_v9, %v1441_v10 }
 0x103   :  { %v896_v28 = vmax.f32 %v755_v21, 0.0 }
 0x104   :  { %1603 = vmatmul.msk.bf16.vlgmr.msrb.gmra.mxu3 %vm449_vm0, %v1500_v43  ;;  %v1699_v43 = vld [vmem:[%s2635_s0 + $0x1d4] sm:$0xf] }
 0x105   :  { %1593 = vmatmul.msk.bf16.gmra.mxu1 %vm449_vm0, %v1420_v14 }
 0x106   :  { %v587_v17 = vpop.f32.mrf.mxu0 }
 0x107   :  { %v588_v22 = vadd.f32 %v1963_v20, %v587_v17 }
 0x109   :  { %v757_v24 = vadd.f32 %v756_v48, %v588_v22 }
 0x10a   :  { %v766_v25 = vpop.f32.mrf.mxu1 }
 0x10b   :  { %v897_v29 = vmax.f32 %v757_v24, 0.0 }
 0x10d   :  { %v954_v30 = vpack.c.bf16 %v897_v29, %v896_v28  ;;  %v1678_v28 = vld [vmem:[%s2635_s0 + $0x124] sm:$0xf0] }
 0x10e   :  { %v590_v32 = vpop.f32.mrf.mxu0  ;;  %v1432_v33 = vor.u32 %v1678_v28, %v1431_v27 }
 0x10f   :  { %1086 = vmatmul.bf16.gmra.mxu2 %v954_v30  ;;  %v591_v37 = vadd.f32 %v1963_v20, %v590_v32 }
 0x111   :  { %629 = vmatmul.bf16.gmra.mxu0 %v1408_v31  ;;  %v760_v41 = vadd.f32 %v759_v59, %v591_v37  ;;  %v1695_v59 = vld [vmem:[%s2635_s0 + $0x1b4] sm:$0xf] }
 0x112   :  { %v769_v36 = vpop.f32.mrf.mxu1  ;;  %v1508_v63 = vor.u32 %v1695_v59, %v1505_v60  ;;  %v1683_v60 = vld [vmem:[%s2635_s0 + $0x154] sm:$0xf] }
 0x113   :  { %v898_v48 = vmax.f32 %v760_v41, 0.0 }
 0x114   :  { %1604 = vmatmul.msk.bf16.gmra.mxu3 %vm449_vm0, %v1508_v63 }
 0x115   :  { %1594 = vmatmul.msk.bf16.gmra.mxu1 %vm449_vm0, %v1428_v35  ;;  %v1681_v35 = vld [vmem:[%s2635_s0 + $0x144] sm:$0xf] }
 0x116   :  { %v592_v38 = vpop.f32.mrf.mxu0 }
 0x117   :  { %v593_v42 = vadd.f32 %v1963_v20, %v592_v38 }
 0x119   :  { %v762_v44 = vadd.f32 %v761_v4, %v593_v42 }
 0x11a   :  { %v771_v45 = vpop.f32.mrf.mxu1 }
 0x11b   :  { %v899_v49 = vmax.f32 %v762_v44, 0.0  ;;  %v1521_v44 = vld [vmem:[%s2635_s0 + $0x1d8] sm:$0xf0] }
 0x11c   :  { %v1524_v47 = vor.u32 %v1699_v43, %v1521_v44  ;;  %v1684_v43 = vld [vmem:[%s2635_s0 + $0x154] sm:$0xf0] }
 0x11d   :  { %v955_v50 = vpack.c.bf16 %v899_v49, %v898_v48 }
 0x11e   :  { %v595_v52 = vpop.f32.mrf.mxu0 }
 0x11f   :  { %1091 = vmatmul.bf16.gmra.mxu2 %v955_v50  ;;  %v596_v57 = vadd.f32 %v1963_v20, %v595_v52  ;;  %v1680_v52 = vld [vmem:[%s2635_s0 + $0x134] sm:$0xf0] }
 0x121   :  { %634 = vmatmul.bf16.gmra.mxu0 %v1416_v51  ;;  %v765_v61 = vadd.f32 %v764_v15, %v596_v57  ;;  %v1439_v51 = vld [vmem:[%s2635_s0 + $0x130] sm:$0xf] }
 0x122   :  { %v2134_v56 = vpop.f32.mrf.mxu1 }
 0x123   :  { %v900_v4 = vmax.f32 %v765_v61, 0.0  ;;  %v1457_v61 = vld [vmem:[%s2635_s0 + $0x158] sm:$0xf0] }
 0x124   :  { %1605 = vmatmul.msk.bf16.gmra.mxu3 %vm449_vm0, %v1516_v23  ;;  %v1685_v23 = vld [vmem:[%s2635_s0 + $0x164] sm:$0xf] }
 0x125   :  { %1595 = vmatmul.msk.bf16.gmra.mxu1 %vm449_vm0, %v1436_v55 }
 0x126   :  { %v597_v58 = vpop.f32.mrf.mxu0 }
 0x127   :  { %v598_v62 = vadd.f32 %v1963_v20, %v597_v58  ;;  %v1440_v58 = vor.u32 %v1680_v52, %v1439_v51 }
 0x129   :  { %v767_v0 = vadd.f32 %v766_v25, %v598_v62  ;;  %v1460_v62 = vor.u32 %v1683_v60, %v1457_v61 }
 0x12a   :  { %v776_v1 = vpop.f32.mrf.mxu1 }
 0x12b   :  { %v901_v5 = vmax.f32 %v767_v0, 0.0 }
 0x12d   :  { %v956_v6 = vpack.c.bf16 %v901_v5, %v900_v4  ;;  %v1701_v5 = vld [vmem:[%s2635_s0 + $0x1e4] sm:$0xf] }
 0x12e   :  { %v600_v8 = vpop.f32.mrf.mxu0 }
 0x12f   :  { %1096 = vmatmul.bf16.gmra.mxu2 %v956_v6  ;;  %v601_v15 = vadd.f32 %v1963_v20, %v600_v8  ;;  %v1529_v6 = vld [vmem:[%s2635_s0 + $0x1e8] sm:$0xf0] }
 0x130   :  { %v1532_v9 = vor.u32 %v1701_v5, %v1529_v6 }
 0x131   :  { %639 = vmatmul.bf16.gmra.mxu0 %v1424_v7  ;;  %v770_v21 = vadd.f32 %v769_v36, %v601_v15  ;;  %v1449_v36 = vld [vmem:[%s2635_s0 + $0x148] sm:$0xf0]  ;;  %v1447_v15 = vld [vmem:[%s2635_s0 + $0x140] sm:$0xf] }
 0x132   :  { %v2163_v13 = vpop.f32.mrf.mxu1  ;;  %v1057_v14 = vpop.f32.mrf.mxu2  ;;  %v1452_v37 = vor.u32 %v1681_v35, %v1449_v36 }
 0x133   :  { %v1058_v16 = vadd.f32 %v2161_v11, %v1057_v14  ;;  %v902_v29 = vmax.f32 %v770_v21, 0.0 }
 0x134   :  { %1606 = vmatmul.msk.bf16.gmra.mxu3 %vm449_vm0, %v1524_v47 }
 0x135   :  { %1217 = vst [vmem:[%s2639_s5] sm:$0xff] %v1058_v16  ;;  %1596 = vmatmul.msk.bf16.gmra.mxu1 %vm449_vm0, %v1444_v12  ;;  %v1682_v16 = vld [vmem:[%s2635_s0 + $0x144] sm:$0xf0] }
 0x136   :  { %v602_v17 = vpop.f32.mrf.mxu0  ;;  %v1448_v21 = vor.u32 %v1682_v16, %v1447_v15 }
 0x137   :  { %v603_v22 = vadd.f32 %v1963_v20, %v602_v17 }
 0x139   :  { %v772_v24 = vadd.f32 %v771_v45, %v603_v22 }
 0x13a   :  { %v781_v25 = vpop.f32.mrf.mxu1  ;;  %v1059_v26 = vpop.f32.mrf.mxu2 }
 0x13b   :  { %v1060_v30 = vadd.f32 %v2161_v11, %v1059_v26  ;;  %v903_v31 = vmax.f32 %v772_v24, 0.0  ;;  %v1465_v24 = vld [vmem:[%s2635_s0 + $0x168] sm:$0xf0] }
 0x13c   :  { %v1468_v26 = vor.u32 %v1685_v23, %v1465_v24  ;;  %v1471_v23 = vld [vmem:[%s2635_s0 + $0x170] sm:$0xf]  ;;  %v1688_v24 = vld [vmem:[%s2635_s0 + $0x174] sm:$0xf0] }
 0x13d   :  { %1218 = vst [vmem:[%s2639_s5 + $0x8] sm:$0xff] %v1060_v30  ;;  %v957_v32 = vpack.c.bf16 %v903_v31, %v902_v29 }
 0x13e   :  { %v605_v34 = vpop.f32.mrf.mxu0 }
 0x13f   :  { %1101 = vmatmul.bf16.gmra.mxu2 %v957_v32  ;;  %v606_v40 = vadd.f32 %v1963_v20, %v605_v34  ;;  %v1703_v32 = vld [vmem:[%s2635_s0 + $0x1f4] sm:$0xf] }
 0x141   :  { %644 = vmatmul.bf16.gmra.mxu0 %v1432_v33  ;;  %v775_v45 = vadd.f32 %v2134_v56, %v606_v40  ;;  %v1537_v33 = vld [vmem:[%s2635_s0 + $0x1f8] sm:$0xf0] }
 0x142   :  { %v2195_v38 = vpop.f32.mrf.mxu1  ;;  %v1062_v39 = vpop.f32.mrf.mxu2  ;;  %v1540_v36 = vor.u32 %v1703_v32, %v1537_v33  ;;  %v1691_v33 = vld [vmem:[%s2635_s0 + $0x194] sm:$0xf] }
 0x143   :  { %v1063_v41 = vadd.f32 %v2161_v11, %v1062_v39  ;;  %v904_v54 = vmax.f32 %v775_v45, 0.0 }
 0x144   :  { %1607 = vmatmul.msk.bf16.gmra.mxu3 %vm449_vm0, %v1532_v9  ;;  %v1481_v9 = vld [vmem:[%s2635_s0 + $0x188] sm:$0xf0] }
 0x145   :  { %1219 = vst [vmem:[%s2639_s5 + $0x10] sm:$0xff] %v1063_v41  ;;  %1597 = vmatmul.msk.bf16.gmra.mxu1 %vm449_vm0, %v1452_v37 }
 0x146   :  { %v607_v42 = vpop.f32.mrf.mxu0 }
 0x147   :  { %v608_v46 = vadd.f32 %v1963_v20, %v607_v42  ;;  %v1455_v42 = vld [vmem:[%s2635_s0 + $0x150] sm:$0xf] }
 0x148   :  { %v1456_v47 = vor.u32 %v1684_v43, %v1455_v42 }
 0x149   :  { %v777_v48 = vadd.f32 %v776_v1, %v608_v46 }
 0x14a   :  { %v786_v49 = vpop.f32.mrf.mxu1  ;;  %v1064_v50 = vpop.f32.mrf.mxu2 }
 0x14b   :  { %v1065_v55 = vadd.f32 %v2161_v11, %v1064_v50  ;;  %v905_v56 = vmax.f32 %v777_v48, 0.0  ;;  %v1473_v50 = vld [vmem:[%s2635_s0 + $0x178] sm:$0xf0] }
 0x14d   :  { %1220 = vst [vmem:[%s2639_s5 + $0x18] sm:$0xff] %v1065_v55  ;;  %v958_v57 = vpack.c.bf16 %v905_v56, %v904_v54 }
 0x14e   :  { %v610_v59 = vpop.f32.mrf.mxu0 }
 0x14f   :  { %1106 = vmatmul.bf16.gmra.mxu2 %v958_v57  ;;  %v611_v1 = vadd.f32 %v1963_v20, %v610_v59 }
 0x151   :  { %649 = vmatmul.bf16.gmra.mxu0 %v1440_v58  ;;  %v780_v7 = vadd.f32 %v2163_v13, %v611_v1  ;;  %v1686_v1 = vld [vmem:[%s2635_s0 + $0x164] sm:$0xf0] }
 0x152   :  { %v2230_v63 = vpop.f32.mrf.mxu1  ;;  %v1067_v0 = vpop.f32.mrf.mxu2 }
 0x153   :  { %v1068_v2 = vadd.f32 %v2161_v11, %v1067_v0  ;;  %v906_v17 = vmax.f32 %v780_v7, 0.0  ;;  %v1463_v0 = vld [vmem:[%s2635_s0 + $0x160] sm:$0xf] }
 0x154   :  { %v1464_v6 = vor.u32 %v1686_v1, %v1463_v0 }
 0x155   :  { %1221 = vst [vmem:[%s2639_s5 + $0x20] sm:$0xff] %v1068_v2  ;;  %1598 = vmatmul.msk.bf16.gmra.mxu1 %vm449_vm0, %v1460_v62 }
 0x156   :  { %v612_v4 = vpop.f32.mrf.mxu0 }
 0x157   :  { %v613_v8 = vadd.f32 %v1963_v20, %v612_v4 }
 0x159   :  { %v782_v10 = vadd.f32 %v781_v25, %v613_v8  ;;  %v2265_v25 = vpop.f32.mrf.mxu3  ;;  %v1689_v8 = vld [vmem:[%s2635_s0 + $0x184] sm:$0xf] }
 0x15a   :  { %v791_v12 = vpop.f32.mrf.mxu1  ;;  %v1069_v14 = vpop.f32.mrf.mxu2 }
 0x15b   :  { %v1070_v18 = vadd.f32 %v2161_v11, %v1069_v14  ;;  %v907_v13 = vmax.f32 %v782_v10, 0.0  ;;  %v1484_v10 = vor.u32 %v1689_v8, %v1481_v9 }
 0x15d   :  { %1222 = vst [vmem:[%s2639_s5 + $0x28] sm:$0xff] %v1070_v18  ;;  %v959_v19 = vpack.c.bf16 %v907_v13, %v906_v17 }
 0x15e   :  { %v615_v22 = vpop.f32.mrf.mxu0 }
 0x15f   :  { %1111 = vmatmul.bf16.gmra.mxu2 %v959_v19  ;;  %v616_v29 = vadd.f32 %v1963_v20, %v615_v22 }
 0x161   :  { %654 = vmatmul.bf16.gmra.mxu0 %v1448_v21  ;;  %v785_v34 = vadd.f32 %v2195_v38, %v616_v29  ;;  %v2283_v37 = vpop.f32.mrf.mxu3  ;;  %1608 = vmatmul.msk.bf16.gmra.mxu3 %vm449_vm0, %v1540_v36 }
 0x162   :  { %v2267_v27 = vpop.f32.mrf.mxu1  ;;  %v1072_v28 = vpop.f32.mrf.mxu2 }
 0x163   :  { %v1073_v30 = vadd.f32 %v2161_v11, %v1072_v28  ;;  %v908_v44 = vmax.f32 %v785_v34, 0.0  ;;  %v1489_v34 = vld [vmem:[%s2635_s0 + $0x198] sm:$0xf0] }
 0x165   :  { %1223 = vst [vmem:[%s2639_s5 + $0x30] sm:$0xff] %v1073_v30  ;;  %1599 = vmatmul.msk.bf16.gmra.mxu1 %vm449_vm0, %v1468_v26 }
 0x166   :  { %v617_v31 = vpop.f32.mrf.mxu0 }
 0x167   :  { %v618_v35 = vadd.f32 %v1963_v20, %v617_v31  ;;  %v1472_v31 = vor.u32 %v1688_v24, %v1471_v23 }
 0x169   :  { %v787_v39 = vadd.f32 %v786_v49, %v618_v35  ;;  %v1687_v49 = vld [vmem:[%s2635_s0 + $0x174] sm:$0xf]  ;;  %v2341_v30 = vpop.f32.mrf.mxu3  ;;  %v1492_v35 = vor.u32 %v1691_v33, %v1489_v34 }
 0x16a   :  { %v796_v40 = vpop.f32.mrf.mxu1  ;;  %v1074_v41 = vpop.f32.mrf.mxu2  ;;  %v1476_v51 = vor.u32 %v1687_v49, %v1473_v50 }
 0x16b   :  { %v909_v38 = vmax.f32 %v787_v39, 0.0  ;;  %v1075_v45 = vadd.f32 %v2161_v11, %v1074_v41 }
 0x16d   :  { %1224 = vst [vmem:[%s2639_s5 + $0x38] sm:$0xff] %v1075_v45  ;;  %v960_v46 = vpack.c.bf16 %v909_v38, %v908_v44 }
 0x16e   :  { %v620_v48 = vpop.f32.mrf.mxu0 }
 0x16f   :  { %1116 = vmatmul.bf16.gmra.mxu2 %v960_v46  ;;  %v621_v55 = vadd.f32 %v1963_v20, %v620_v48 }
 0x171   :  { %659 = vmatmul.bf16.gmra.mxu0 %v1456_v47  ;;  %v790_v58 = vadd.f32 %v2230_v63, %v621_v55  ;;  %v2358_v43 = vpop.f32.mrf.mxu3 }
 0x172   :  { %v799_v52 = vpop.f32.mrf.mxu1  ;;  %v1077_v54 = vpop.f32.mrf.mxu2 }
 0x173   :  { %v1078_v56 = vadd.f32 %v2161_v11, %v1077_v54  ;;  %v910_v2 = vmax.f32 %v790_v58, 0.0 }
 0x175   :  { %1225 = vst [vmem:[%s2639_s5 + $0x40] sm:$0xff] %v1078_v56  ;;  %1600 = vmatmul.msk.bf16.gmra.mxu1 %vm449_vm0, %v1476_v51 }
 0x176   :  { %v622_v57 = vpop.f32.mrf.mxu0 }
 0x177   :  { %v623_v59 = vadd.f32 %v1963_v20, %v622_v57 }
 0x179   :  { %v792_v60 = vadd.f32 %v791_v12, %v623_v59  ;;  %v2365_v55 = vpop.f32.mrf.mxu3 }
 0x17a   :  { %v801_v61 = vpop.f32.mrf.mxu1  ;;  %v1079_v62 = vpop.f32.mrf.mxu2 }
 0x17b   :  { %v911_v4 = vmax.f32 %v792_v60, 0.0  ;;  %v1080_v5 = vadd.f32 %v2161_v11, %v1079_v62 }
 0x17d   :  { %1226 = vst [vmem:[%s2639_s5 + $0x48] sm:$0xff] %v1080_v5  ;;  %v961_v63 = vpack.c.bf16 %v911_v4, %v910_v2 }
 0x17e   :  { %v625_v7 = vpop.f32.mrf.mxu0 }
 0x17f   :  { %1121 = vmatmul.bf16.gmra.mxu2 %v961_v63  ;;  %v626_v15 = vadd.f32 %v1963_v20, %v625_v7 }
 0x181   :  { %664 = vmatmul.bf16.gmra.mxu0 %v1464_v6  ;;  %v795_v18 = vadd.f32 %v2267_v27, %v626_v15  ;;  %v2373_v2 = vpop.f32.mrf.mxu3 }
 0x182   :  { %v804_v12 = vpop.f32.mrf.mxu1  ;;  %v1082_v14 = vpop.f32.mrf.mxu2 }
 0x183   :  { %v1083_v16 = vadd.f32 %v2161_v11, %v1082_v14  ;;  %v912_v26 = vmax.f32 %v795_v18, 0.0 }
 0x185   :  { %1227 = vst [vmem:[%s2639_s5 + $0x50] sm:$0xff] %v1083_v16  ;;  %1601 = vmatmul.msk.bf16.gmra.mxu1 %vm449_vm0, %v1484_v10 }
 0x186   :  { %v627_v17 = vpop.f32.mrf.mxu0 }
 0x187   :  { %v628_v13 = vadd.f32 %v1963_v20, %v627_v17 }
 0x189   :  { %v797_v19 = vadd.f32 %v796_v40, %v628_v13  ;;  %v2381_v14 = vpop.f32.mrf.mxu3 }
 0x18a   :  { %v806_v21 = vpop.f32.mrf.mxu1  ;;  %v1084_v22 = vpop.f32.mrf.mxu2 }
 0x18b   :  { %v913_v28 = vmax.f32 %v797_v19, 0.0  ;;  %v1085_v29 = vadd.f32 %v2161_v11, %v1084_v22 }
 0x18d   :  { %1228 = vst [vmem:[%s2639_s5 + $0x58] sm:$0xff] %v1085_v29  ;;  %v962_v27 = vpack.c.bf16 %v913_v28, %v912_v26 }
 0x18e   :  { %v630_v32 = vpop.f32.mrf.mxu0 }
 0x18f   :  { %1126 = vmatmul.bf16.gmra.mxu2 %v962_v27  ;;  %v631_v40 = vadd.f32 %v1963_v20, %v630_v32 }
 0x191   :  { %669 = vmatmul.bf16.gmra.mxu0 %v1472_v31  ;;  %v800_v44 = vadd.f32 %v799_v52, %v631_v40  ;;  %v2391_v28 = vpop.f32.mrf.mxu3 }
 0x192   :  { %v809_v36 = vpop.f32.mrf.mxu1  ;;  %v1087_v39 = vpop.f32.mrf.mxu2 }
 0x193   :  { %v1088_v41 = vadd.f32 %v2161_v11, %v1087_v39  ;;  %v914_v48 = vmax.f32 %v800_v44, 0.0 }
 0x195   :  { %1229 = vst [vmem:[%s2639_s5 + $0x60] sm:$0xff] %v1088_v41  ;;  %1602 = vmatmul.msk.bf16.gmra.mxu1 %vm449_vm0, %v1492_v35 }
 0x196   :  { %v632_v42 = vpop.f32.mrf.mxu0 }
 0x197   :  { %v633_v38 = vadd.f32 %v1963_v20, %v632_v42 }
 0x199   :  { %v802_v45 = vadd.f32 %v801_v61, %v633_v38 }
 0x19a   :  { %v811_v46 = vpop.f32.mrf.mxu1  ;;  %v1089_v47 = vpop.f32.mrf.mxu2 }
 0x19b   :  { %v915_v49 = vmax.f32 %v802_v45, 0.0  ;;  %v1090_v50 = vadd.f32 %v2161_v11, %v1089_v47 }
 0x19d   :  { %1230 = vst [vmem:[%s2639_s5 + $0x68] sm:$0xff] %v1090_v50  ;;  %v963_v51 = vpack.c.bf16 %v915_v49, %v914_v48 }
 0x19e   :  { %v635_v54 = vpop.f32.mrf.mxu0 }
 0x19f   :  { %1131 = vmatmul.bf16.gmra.mxu2 %v963_v51  ;;  %v636_v57 = vadd.f32 %v1963_v20, %v635_v54 }
 0x1a1   :  { %v805_v60 = vadd.f32 %v804_v12, %v636_v57 }
 0x1a2   :  { %v814_v56 = vpop.f32.mrf.mxu1  ;;  %v1092_v52 = vpop.f32.mrf.mxu2 }
 0x1a3   :  { %v1093_v58 = vadd.f32 %v2161_v11, %v1092_v52  ;;  %v916_v4 = vmax.f32 %v805_v60, 0.0 }
 0x1a5   :  { %1231 = vst [vmem:[%s2639_s5 + $0x70] sm:$0xff] %v1093_v58 }
 0x1a6   :  { %v637_v59 = vpop.f32.mrf.mxu0 }
 0x1a7   :  { %v638_v61 = vadd.f32 %v1963_v20, %v637_v59 }
 0x1a9   :  { %v807_v62 = vadd.f32 %v806_v21, %v638_v61 }
 0x1aa   :  { %v816_v0 = vpop.f32.mrf.mxu1  ;;  %v1094_v1 = vpop.f32.mrf.mxu2 }
 0x1ab   :  { %v917_v5 = vmax.f32 %v807_v62, 0.0  ;;  %v1095_v63 = vadd.f32 %v2161_v11, %v1094_v1 }
 0x1ad   :  { %1232 = vst [vmem:[%s2639_s5 + $0x78] sm:$0xff] %v1095_v63  ;;  %v964_v6 = vpack.c.bf16 %v917_v5, %v916_v4 }
 0x1ae   :  { %v640_v7 = vpop.f32.mrf.mxu0 }
 0x1af   :  { %1136 = vmatmul.bf16.gmra.mxu2 %v964_v6  ;;  %v641_v10 = vadd.f32 %v1963_v20, %v640_v7 }
 0x1b1   :  { %v810_v16 = vadd.f32 %v809_v36, %v641_v10  ;;  %v2399_v36 = vpop.f32.mrf.mxu3 }
 0x1b2   :  { %v819_v8 = vpop.f32.mrf.mxu1  ;;  %v1097_v9 = vpop.f32.mrf.mxu2 }
 0x1b3   :  { %v1098_v12 = vadd.f32 %v2161_v11, %v1097_v9  ;;  %v918_v21 = vmax.f32 %v810_v16, 0.0 }
 0x1b5   :  { %1233 = vst [vmem:[%s2639_s5 + $0x80] sm:$0xff] %v1098_v12  ;;  %v2429_v12 = vld [vmem:[%s2636_s2] ss:$0 sm:$0xff] }
 0x1b6   :  { %v642_v15 = vpop.f32.mrf.mxu0 }
 0x1b7   :  { %v643_v17 = vadd.f32 %v1963_v20, %v642_v15 }
 0x1b9   :  { %v812_v18 = vadd.f32 %v811_v46, %v643_v17  ;;  %v2405_v49 = vpop.f32.mrf.mxu3 }
 0x1ba   :  { %v821_v13 = vpop.f32.mrf.mxu1  ;;  %v1099_v19 = vpop.f32.mrf.mxu2 }
 0x1bb   :  { %v919_v22 = vmax.f32 %v812_v18, 0.0  ;;  %v1100_v23 = vadd.f32 %v2161_v11, %v1099_v19 }
 0x1bd   :  { %1234 = vst [vmem:[%s2639_s5 + $0x88] sm:$0xff] %v1100_v23  ;;  %v965_v24 = vpack.c.bf16 %v919_v22, %v918_v21 }
 0x1be   :  { %v645_v26 = vpop.f32.mrf.mxu0 }
 0x1bf   :  { %1141 = vmatmul.bf16.gmra.mxu2 %v965_v24  ;;  %v646_v31 = vadd.f32 %v1963_v20, %v645_v26 }
 0x1c1   :  { %v815_v34 = vadd.f32 %v814_v56, %v646_v31 }
 0x1c2   :  { %v824_v29 = vpop.f32.mrf.mxu1  ;;  %v1102_v27 = vpop.f32.mrf.mxu2 }
 0x1c3   :  { %v1103_v32 = vadd.f32 %v2161_v11, %v1102_v27  ;;  %v920_v42 = vmax.f32 %v815_v34, 0.0 }
 0x1c5   :  { %1235 = vst [vmem:[%s2639_s5 + $0x90] sm:$0xff] %v1103_v32 }
 0x1c6   :  { %v647_v33 = vpop.f32.mrf.mxu0 }
 0x1c7   :  { %v648_v35 = vadd.f32 %v1963_v20, %v647_v33 }
 0x1c9   :  { %v817_v39 = vadd.f32 %v816_v0, %v648_v35  ;;  %v2414_v0 = vpop.f32.mrf.mxu3 }
 0x1ca   :  { %v826_v40 = vpop.f32.mrf.mxu1  ;;  %v1104_v41 = vpop.f32.mrf.mxu2 }
 0x1cb   :  { %v921_v44 = vmax.f32 %v817_v39, 0.0  ;;  %v1105_v38 = vadd.f32 %v2161_v11, %v1104_v41 }
 0x1cd   :  { %1236 = vst [vmem:[%s2639_s5 + $0x98] sm:$0xff] %v1105_v38  ;;  %v966_v45 = vpack.c.bf16 %v921_v44, %v920_v42 }
 0x1ce   :  { %v650_v46 = vpop.f32.mrf.mxu0 }
 0x1cf   :  { %1146 = vmatmul.bf16.gmra.mxu2 %v966_v45  ;;  %v651_v50 = vadd.f32 %v1963_v20, %v650_v46 }
 0x1d1   :  { %v820_v56 = vadd.f32 %v819_v8, %v651_v50  ;;  %v2424_v9 = vpop.f32.mrf.mxu3 }
 0x1d2   :  { %v829_v47 = vpop.f32.mrf.mxu1  ;;  %v1107_v48 = vpop.f32.mrf.mxu2 }
 0x1d3   :  { %v1108_v51 = vadd.f32 %v2161_v11, %v1107_v48  ;;  %v922_v60 = vmax.f32 %v820_v56, 0.0  ;;  %v676_v56 = vadd.f32 %v2429_v12, %v2218_v53 }
 0x1d5   :  { %1237 = vst [vmem:[%s2639_s5 + $0xa0] sm:$0xff] %v1108_v51 }
 0x1d6   :  { %v652_v54 = vpop.f32.mrf.mxu0 }
 0x1d7   :  { %v653_v52 = vadd.f32 %v1963_v20, %v652_v54 }
 0x1d9   :  { %v822_v57 = vadd.f32 %v821_v13, %v653_v52  ;;  %v2436_v23 = vpop.f32.mrf.mxu3 }
 0x1da   :  { %v831_v58 = vpop.f32.mrf.mxu1  ;;  %v1109_v59 = vpop.f32.mrf.mxu2 }
 0x1db   :  { %v923_v61 = vmax.f32 %v822_v57, 0.0  ;;  %v1110_v62 = vadd.f32 %v2161_v11, %v1109_v59 }
 0x1dd   :  { %1238 = vst [vmem:[%s2639_s5 + $0xa8] sm:$0xff] %v1110_v62  ;;  %v967_v1 = vpack.c.bf16 %v923_v61, %v922_v60 }
 0x1de   :  { %v655_v4 = vpop.f32.mrf.mxu0 }
 0x1df   :  { %1151 = vmatmul.bf16.gmra.mxu2 %v967_v1  ;;  %v656_v6 = vadd.f32 %v1963_v20, %v655_v4 }
 0x1e1   :  { %v825_v10 = vadd.f32 %v824_v29, %v656_v6 }
 0x1e2   :  { %v834_v5 = vpop.f32.mrf.mxu1  ;;  %v1112_v63 = vpop.f32.mrf.mxu2 }
 0x1e3   :  { %v1113_v7 = vadd.f32 %v2161_v11, %v1112_v63  ;;  %v924_v18 = vmax.f32 %v825_v10, 0.0 }
 0x1e5   :  { %1239 = vst [vmem:[%s2639_s5 + $0xb0] sm:$0xff] %v1113_v7 }
 0x1e6   :  { %v657_v8 = vpop.f32.mrf.mxu0 }
 0x1e7   :  { %v658_v15 = vadd.f32 %v2429_v12, %v657_v8 }
 0x1e9   :  { %v827_v16 = vadd.f32 %v826_v40, %v658_v15  ;;  %v2444_v40 = vpop.f32.mrf.mxu3 }
 0x1ea   :  { %v836_v17 = vpop.f32.mrf.mxu1  ;;  %v1114_v20 = vpop.f32.mrf.mxu2 }
 0x1eb   :  { %v925_v13 = vmax.f32 %v827_v16, 0.0  ;;  %v1115_v19 = vadd.f32 %v2161_v11, %v1114_v20 }
 0x1ed   :  { %1240 = vst [vmem:[%s2639_s5 + $0xb8] sm:$0xff] %v1115_v19  ;;  %v968_v21 = vpack.c.bf16 %v925_v13, %v924_v18  ;;  %v681_v13 = vadd.f32 %v2429_v12, %v2265_v25 }
 0x1ee   :  { %v660_v22 = vpop.f32.mrf.mxu0 }
 0x1ef   :  { %1156 = vmatmul.bf16.gmra.mxu2 %v968_v21  ;;  %v661_v29 = vadd.f32 %v2429_v12, %v660_v22  ;;  %v683_v22 = vadd.f32 %v2429_v12, %v2283_v37 }
 0x1f1   :  { %v830_v32 = vadd.f32 %v829_v47, %v661_v29  ;;  %v854_v51 = vpop.f32.mrf.mxu3 }
 0x1f2   :  { %v839_v24 = vpop.f32.mrf.mxu1  ;;  %v1117_v26 = vpop.f32.mrf.mxu2 }
 0x1f3   :  { %v1118_v27 = vadd.f32 %v2161_v11, %v1117_v26  ;;  %v926_v41 = vmax.f32 %v830_v32, 0.0 }
 0x1f5   :  { %1241 = vst [vmem:[%s2639_s5 + $0xc0] sm:$0xff] %v1118_v27 }
 0x1f6   :  { %v662_v31 = vpop.f32.mrf.mxu0 }
 0x1f7   :  { %v663_v33 = vadd.f32 %v2429_v12, %v662_v31 }
 0x1f9   :  { %v832_v34 = vadd.f32 %v831_v58, %v663_v33  ;;  %v678_v58 = vadd.f32 %v2429_v12, %v2234_v3  ;;  %v856_v10 = vpop.f32.mrf.mxu3 }
 0x1fa   :  { %v841_v35 = vpop.f32.mrf.mxu1  ;;  %v1119_v39 = vpop.f32.mrf.mxu2 }
 0x1fb   :  { %v927_v42 = vmax.f32 %v832_v34, 0.0  ;;  %v1120_v44 = vadd.f32 %v2161_v11, %v1119_v39 }
 0x1fd   :  { %1242 = vst [vmem:[%s2639_s5 + $0xc8] sm:$0xff] %v1120_v44  ;;  %v969_v38 = vpack.c.bf16 %v927_v42, %v926_v41 }
 0x1fe   :  { %v665_v45 = vpop.f32.mrf.mxu0 }
 0x1ff   :  { %1161 = vmatmul.bf16.gmra.mxu2 %v969_v38  ;;  %v666_v48 = vadd.f32 %v2429_v12, %v665_v45  ;;  %v688_v38 = vadd.f32 %v2429_v12, %v2358_v43 }
 0x201   :  { %v835_v52 = vadd.f32 %v834_v5, %v666_v48  ;;  %v859_v26 = vpop.f32.mrf.mxu3  ;;  %v857_v48 = vadd.f32 %v856_v10, %v688_v38 }
 0x202   :  { %v844_v46 = vpop.f32.mrf.mxu1  ;;  %v1122_v47 = vpop.f32.mrf.mxu2 }
 0x203   :  { %v1123_v50 = vadd.f32 %v2161_v11, %v1122_v47  ;;  %v845_v59 = vadd.f32 %v844_v46, %v676_v56  ;;  %v928_v1 = vmax.f32 %v835_v52, 0.0  ;;  %v937_v56 = vmax.f32 %v857_v48, 0.0 }
 0x205   :  { %1243 = vst [vmem:[%s2639_s5 + $0xd0] sm:$0xff] %v1123_v50  ;;  %v932_v7 = vmax.f32 %v845_v59, 0.0 }
 0x206   :  { %v667_v54 = vpop.f32.mrf.mxu0 }
 0x207   :  { %v668_v57 = vadd.f32 %v2429_v12, %v667_v54 }
 0x209   :  { %v837_v60 = vadd.f32 %v836_v17, %v668_v57  ;;  %v861_v46 = vpop.f32.mrf.mxu3 }
 0x20a   :  { %v846_v61 = vpop.f32.mrf.mxu1  ;;  %v1124_v62 = vpop.f32.mrf.mxu2 }
 0x20b   :  { %v929_v4 = vmax.f32 %v837_v60, 0.0  ;;  %v847_v63 = vadd.f32 %v846_v61, %v678_v58  ;;  %v1125_v6 = vadd.f32 %v2161_v11, %v1124_v62  ;;  %v691_v58 = vadd.f32 %v2429_v12, %v2365_v55 }
 0x20d   :  { %v933_v8 = vmax.f32 %v847_v63, 0.0  ;;  %1244 = vst [vmem:[%s2639_s5 + $0xd8] sm:$0xff] %v1125_v6  ;;  %v970_v53 = vpack.c.bf16 %v929_v4, %v928_v1  ;;  %v860_v60 = vadd.f32 %v859_v26, %v691_v58 }
 0x20e   :  { %v670_v5 = vpop.f32.mrf.mxu0 }
 0x20f   :  { %v972_v15 = vpack.c.bf16 %v933_v8, %v932_v7  ;;  %1166 = vmatmul.bf16.gmra.mxu2 %v970_v53  ;;  %v671_v17 = vadd.f32 %v2429_v12, %v670_v5  ;;  %v938_v4 = vmax.f32 %v860_v60, 0.0  ;;  %v696_v8 = vadd.f32 %v2429_v12, %v2381_v14 }
 0x210   :  { %v698_v53 = vadd.f32 %v2429_v12, %v2391_v28 }
 0x211   :  { %1176 = vmatmul.bf16.vlgmr.msra.gmra.mxu3 %v972_v15  ;;  %v840_v19 = vadd.f32 %v839_v24, %v671_v17 }
 0x212   :  { %v849_v3 = vpop.f32.mrf.mxu1  ;;  %v1127_v16 = vpop.f32.mrf.mxu2 }
 0x213   :  { %v1128_v20 = vadd.f32 %v2161_v11, %v1127_v16  ;;  %v850_v29 = vadd.f32 %v849_v3, %v681_v13  ;;  %v930_v33 = vmax.f32 %v840_v19, 0.0  ;;  %v701_v13 = vadd.f32 %v2429_v12, %v2399_v36 }
 0x214   :  { %v703_v19 = vadd.f32 %v2429_v12, %v2405_v49 }
 0x215   :  { %1245 = vst [vmem:[%s2639_s5 + $0xe0] sm:$0xff] %v1128_v20  ;;  %v934_v42 = vmax.f32 %v850_v29, 0.0 }
 0x216   :  { %v672_v18 = vpop.f32.mrf.mxu0 }
 0x217   :  { %v673_v21 = vadd.f32 %v2429_v12, %v672_v18 }
 0x219   :  { %v842_v27 = vadd.f32 %v841_v35, %v673_v21  ;;  %v686_v35 = vadd.f32 %v2429_v12, %v2341_v30  ;;  %v864_v30 = vpop.f32.mrf.mxu3 }
 0x21a   :  { %v851_v31 = vpop.f32.mrf.mxu1  ;;  %v1129_v32 = vpop.f32.mrf.mxu2  ;;  %v865_v10 = vadd.f32 %v864_v30, %v696_v8 }
 0x21b   :  { %v931_v34 = vmax.f32 %v842_v27, 0.0  ;;  %v852_v39 = vadd.f32 %v851_v31, %v683_v22  ;;  %v1130_v41 = vadd.f32 %v2161_v11, %v1129_v32  ;;  %v855_v47 = vadd.f32 %v854_v51, %v686_v35 }
 0x21c   :  { %v693_v51 = vadd.f32 %v2429_v12, %v2373_v2  ;;  %v940_v16 = vmax.f32 %v865_v10, 0.0 }
 0x21d   :  { %v935_v44 = vmax.f32 %v852_v39, 0.0  ;;  %1246 = vst [vmem:[%s2639_s5 + $0xe8] sm:$0xff] %v1130_v41  ;;  %v971_v25 = vpack.c.bf16 %v931_v34, %v930_v33  ;;  %v936_v54 = vmax.f32 %v855_v47, 0.0  ;;  %v706_v39 = vadd.f32 %v2429_v12, %v2414_v0 }
 0x21e   :  { %v862_v61 = vadd.f32 %v861_v46, %v693_v51  ;;  %v708_v41 = vadd.f32 %v2429_v12, %v2424_v9  ;;  %v711_v46 = vadd.f32 %v2429_v12, %v2436_v23  ;;  %v713_v47 = vadd.f32 %v2429_v12, %v2444_v40 }
 0x21f   :  { %v973_v24 = vpack.c.bf16 %v935_v44, %v934_v42  ;;  %1171 = vmatmul.bf16.gmra.mxu2 %v971_v25  ;;  %v974_v43 = vpack.c.bf16 %v937_v56, %v936_v54 }
 0x220   :  { %v939_v63 = vmax.f32 %v862_v61, 0.0 }
 0x221   :  { %1181 = vmatmul.bf16.gmra.mxu3 %v973_v24  ;;  %v866_v62 = vpop.f32.mrf.mxu3 }
 0x222   :  { %v1132_v37 = vpop.f32.mrf.mxu2  ;;  %v975_v55 = vpack.c.bf16 %v939_v63, %v938_v4  ;;  %v867_v15 = vadd.f32 %v866_v62, %v698_v53 }
 0x223   :  { %v1133_v45 = vadd.f32 %v2161_v11, %v1132_v37 }
 0x224   :  { %v941_v17 = vmax.f32 %v867_v15, 0.0 }
 0x225   :  { %1247 = vst [vmem:[%s2639_s5 + $0xf0] sm:$0xff] %v1133_v45 }
 0x226   :  { %v976_v14 = vpack.c.bf16 %v941_v17, %v940_v16 }
 0x229   :  { %v869_v2 = vpop.f32.mrf.mxu3 }
 0x22a   :  { %v1134_v50 = vpop.f32.mrf.mxu2  ;;  %v870_v26 = vadd.f32 %v869_v2, %v701_v13 }
 0x22b   :  { %v1135_v52 = vadd.f32 %v2161_v11, %v1134_v50 }
 0x22c   :  { %v942_v31 = vmax.f32 %v870_v26, 0.0  ;;  %v1742_v26 = vld [vmem:[%s2638_s4] ss:$0 sm:$0xff] }
 0x22d   :  { %1248 = vst [vmem:[%s2639_s5 + $0xf8] sm:$0xff] %v1135_v52 }
 0x231   :  { %1186 = vmatmul.bf16.gmra.mxu3 %v974_v43  ;;  %v871_v18 = vpop.f32.mrf.mxu3 }
 0x232   :  { %v1137_v57 = vpop.f32.mrf.mxu2  ;;  %v872_v29 = vadd.f32 %v871_v18, %v703_v19 }
 0x233   :  { %v1138_v59 = vadd.f32 %v2161_v11, %v1137_v57 }
 0x234   :  { %v943_v32 = vmax.f32 %v872_v29, 0.0 }
 0x235   :  { %1249 = vst [vmem:[%s2639_s5 + $0x100] sm:$0xff] %v1138_v59 }
 0x236   :  { %v977_v36 = vpack.c.bf16 %v943_v32, %v942_v31 }
 0x239   :  { %v874_v22 = vpop.f32.mrf.mxu3 }
 0x23a   :  { %v1139_v1 = vpop.f32.mrf.mxu2  ;;  %v875_v44 = vadd.f32 %v874_v22, %v706_v39 }
 0x23b   :  { %v1140_v6 = vadd.f32 %v2161_v11, %v1139_v1 }
 0x23c   :  { %v944_v35 = vmax.f32 %v875_v44, 0.0 }
 0x23d   :  { %1250 = vst [vmem:[%s2639_s5 + $0x108] sm:$0xff] %v1140_v6 }
 0x241   :  { %1191 = vmatmul.bf16.gmra.mxu3 %v975_v55  ;;  %v876_v49 = vpop.f32.mrf.mxu3 }
 0x242   :  { %v1142_v7 = vpop.f32.mrf.mxu2  ;;  %v877_v25 = vadd.f32 %v876_v49, %v708_v41 }
 0x243   :  { %v1143_v5 = vadd.f32 %v2161_v11, %v1142_v7 }
 0x244   :  { %v945_v38 = vmax.f32 %v877_v25, 0.0 }
 0x245   :  { %1251 = vst [vmem:[%s2639_s5 + $0x110] sm:$0xff] %v1143_v5 }
 0x246   :  { %v978_v0 = vpack.c.bf16 %v945_v38, %v944_v35 }
 0x249   :  { %v879_v24 = vpop.f32.mrf.mxu3 }
 0x24a   :  { %v1144_v3 = vpop.f32.mrf.mxu2  ;;  %v880_v54 = vadd.f32 %v879_v24, %v711_v46 }
 0x24b   :  { %v1145_v20 = vadd.f32 %v2161_v11, %v1144_v3 }
 0x24c   :  { %v946_v30 = vmax.f32 %v880_v54, 0.0 }
 0x24d   :  { %1252 = vst [vmem:[%s2639_s5 + $0x118] sm:$0xff] %v1145_v20 }
 0x251   :  { %1196 = vmatmul.bf16.gmra.mxu3 %v976_v14  ;;  %v881_v50 = vpop.f32.mrf.mxu3 }
 0x252   :  { %v1147_v28 = vpop.f32.mrf.mxu2  ;;  %v882_v56 = vadd.f32 %v881_v50, %v713_v47 }
 0x253   :  { %v1148_v21 = vadd.f32 %v2161_v11, %v1147_v28 }
 0x254   :  { %v947_v43 = vmax.f32 %v882_v56, 0.0 }
 0x255   :  { %1253 = vst [vmem:[%s2639_s5 + $0x120] sm:$0xff] %v1148_v21 }
 0x256   :  { %v979_v23 = vpack.c.bf16 %v947_v43, %v946_v30 }
 0x25a   :  { %v1149_v27 = vpop.f32.mrf.mxu2 }
 0x25b   :  { %v1150_v33 = vadd.f32 %v2161_v11, %v1149_v27 }
 0x25d   :  { %1254 = vst [vmem:[%s2639_s5 + $0x128] sm:$0xff] %v1150_v33 }
 0x261   :  { %1201 = vmatmul.bf16.gmra.mxu3 %v977_v36 }
 0x262   :  { %v1152_v34 = vpop.f32.mrf.mxu2 }
 0x263   :  { %v1153_v42 = vadd.f32 %v2161_v11, %v1152_v34 }
 0x265   :  { %1255 = vst [vmem:[%s2639_s5 + $0x130] sm:$0xff] %v1153_v42 }
 0x26a   :  { %v1154_v37 = vpop.f32.mrf.mxu2 }
 0x26b   :  { %v1155_v45 = vadd.f32 %v2161_v11, %v1154_v37 }
 0x26d   :  { %1256 = vst [vmem:[%s2639_s5 + $0x138] sm:$0xff] %v1155_v45 }
 0x271   :  { %1206 = vmatmul.bf16.gmra.mxu3 %v978_v0 }
 0x272   :  { %v1157_v9 = vpop.f32.mrf.mxu2 }
 0x273   :  { %v1158_v48 = vadd.f32 %v2161_v11, %v1157_v9 }
 0x275   :  { %1257 = vst [vmem:[%s2639_s5 + $0x140] sm:$0xff] %v1158_v48 }
 0x27a   :  { %v1159_v52 = vpop.f32.mrf.mxu2 }
 0x27b   :  { %v1160_v57 = vadd.f32 %v2161_v11, %v1159_v52 }
 0x27d   :  { %1258 = vst [vmem:[%s2639_s5 + $0x148] sm:$0xff] %v1160_v57 }
 0x281   :  { %1211 = vmatmul.bf16.gmra.mxu3 %v979_v23 }
 0x282   :  { %v1162_v12 = vpop.f32.mrf.mxu2 }
 0x283   :  { %v1163_v40 = vadd.f32 %v2161_v11, %v1162_v12 }
 0x285   :  { %1259 = vst [vmem:[%s2639_s5 + $0x150] sm:$0xff] %v1163_v40 }
 0x28a   :  { %v1164_v58 = vpop.f32.mrf.mxu2 }
 0x28b   :  { %v1165_v51 = vadd.f32 %v2161_v11, %v1164_v58 }
 0x28d   :  { %1260 = vst [vmem:[%s2639_s5 + $0x158] sm:$0xff] %v1165_v51 }
 0x292   :  { %v1167_v59 = vpop.f32.mrf.mxu2 }
 0x293   :  { %v1168_v60 = vadd.f32 %v2161_v11, %v1167_v59 }
 0x294   :  { %v1177_v61 = vpop.f32.mrf.mxu3 }
 0x295   :  { %1261 = vst [vmem:[%s2639_s5 + $0x160] sm:$0xff] %v1168_v60  ;;  %v1178_v62 = vadd.f32 %v2161_v11, %v1177_v61 }
 0x297   :  { %1265 = vst [vmem:[%s2639_s5 + $0x180] sm:$0xff] %v1178_v62 }
 0x29a   :  { %v1169_v1 = vpop.f32.mrf.mxu2 }
 0x29b   :  { %v1170_v4 = vadd.f32 %v2161_v11, %v1169_v1 }
 0x29c   :  { %v1179_v63 = vpop.f32.mrf.mxu3 }
 0x29d   :  { %1262 = vst [vmem:[%s2639_s5 + $0x168] sm:$0xff] %v1170_v4  ;;  %v1180_v6 = vadd.f32 %v2161_v11, %v1179_v63 }
 0x29f   :  { %1266 = vst [vmem:[%s2639_s5 + $0x188] sm:$0xff] %v1180_v6 }
 0x2a2   :  { %v1172_v55 = vpop.f32.mrf.mxu2 }
 0x2a3   :  { %v1173_v2 = vadd.f32 %v2161_v11, %v1172_v55 }
 0x2a4   :  { %v1182_v7 = vpop.f32.mrf.mxu3 }
 0x2a5   :  { %1263 = vst [vmem:[%s2639_s5 + $0x170] sm:$0xff] %v1173_v2  ;;  %v1183_v8 = vadd.f32 %v2161_v11, %v1182_v7 }
 0x2a7   :  { %1267 = vst [vmem:[%s2639_s5 + $0x190] sm:$0xff] %v1183_v8 }
 0x2aa   :  { %v1174_v53 = vpop.f32.mrf.mxu2 }
 0x2ab   :  { %v1175_v5 = vadd.f32 %v2161_v11, %v1174_v53 }
 0x2ac   :  { %v1184_v10 = vpop.f32.mrf.mxu3 }
 0x2ad   :  { %1264 = vst [vmem:[%s2639_s5 + $0x178] sm:$0xff] %v1175_v5  ;;  %v1185_v15 = vadd.f32 %v2161_v11, %v1184_v10 }
 0x2af   :  { %1268 = vst [vmem:[%s2639_s5 + $0x198] sm:$0xff] %v1185_v15 }
 0x2b4   :  { %v1187_v3 = vpop.f32.mrf.mxu3 }
 0x2b5   :  { %v1188_v16 = vadd.f32 %v2161_v11, %v1187_v3 }
 0x2b7   :  { %1269 = vst [vmem:[%s2639_s5 + $0x1a0] sm:$0xff] %v1188_v16 }
 0x2bc   :  { %v1189_v17 = vpop.f32.mrf.mxu3 }
 0x2bd   :  { %v1190_v20 = vadd.f32 %v2161_v11, %v1189_v17 }
 0x2bf   :  { %1270 = vst [vmem:[%s2639_s5 + $0x1a8] sm:$0xff] %v1190_v20 }
 0x2c4   :  { %v1192_v18 = vpop.f32.mrf.mxu3 }
 0x2c5   :  { %v1193_v14 = vadd.f32 %v2161_v11, %v1192_v18 }
 0x2c7   :  { %1271 = vst [vmem:[%s2639_s5 + $0x1b0] sm:$0xff] %v1193_v14 }
 0x2cc   :  { %v1194_v28 = vpop.f32.mrf.mxu3 }
 0x2cd   :  { %v1195_v13 = vadd.f32 %v2161_v11, %v1194_v28 }
 0x2cf   :  { %1272 = vst [vmem:[%s2639_s5 + $0x1b8] sm:$0xff] %v1195_v13 }
 0x2d4   :  { %v1197_v19 = vpop.f32.mrf.mxu3 }
 0x2d5   :  { %v1198_v21 = vadd.f32 %v2161_v11, %v1197_v19 }
 0x2d7   :  { %1273 = vst [vmem:[%s2639_s5 + $0x1c0] sm:$0xff] %v1198_v21 }
 0x2dc   :  { %v1199_v22 = vpop.f32.mrf.mxu3 }
 0x2dd   :  { %v1200_v29 = vadd.f32 %v1742_v26, %v1199_v22 }
 0x2df   :  { %1274 = vst [vmem:[%s2639_s5 + $0x1c8] sm:$0xff] %v1200_v29 }
 0x2e4   :  { %v1202_v27 = vpop.f32.mrf.mxu3 }
 0x2e5   :  { %v1203_v31 = vadd.f32 %v1742_v26, %v1202_v27 }
 0x2e7   :  { %1275 = vst [vmem:[%s2639_s5 + $0x1d0] sm:$0xff] %v1203_v31 }
 0x2ec   :  { %v1204_v11 = vpop.f32.mrf.mxu3 }
 0x2ed   :  { %v1205_v32 = vadd.f32 %v1742_v26, %v1204_v11 }
 0x2ef   :  { %1276 = vst [vmem:[%s2639_s5 + $0x1d8] sm:$0xff] %v1205_v32 }
 0x2f4   :  { %v1207_v33 = vpop.f32.mrf.mxu3 }
 0x2f5   :  { %v1208_v36 = vadd.f32 %v1742_v26, %v1207_v33 }
 0x2f7   :  { %1277 = vst [vmem:[%s2639_s5 + $0x1e0] sm:$0xff] %v1208_v36 }
 0x2fc   :  { %v1209_v49 = vpop.f32.mrf.mxu3 }
 0x2fd   :  { %v1210_v34 = vadd.f32 %v1742_v26, %v1209_v49 }
 0x2ff   :  { %1278 = vst [vmem:[%s2639_s5 + $0x1e8] sm:$0xff] %v1210_v34 }
 0x304   :  { %v1212_v39 = vpop.f32.mrf.mxu3 }
 0x305   :  { %v1213_v41 = vadd.f32 %v1742_v26, %v1212_v39 }
 0x307   :  { %1279 = vst [vmem:[%s2639_s5 + $0x1f0] sm:$0xff] %v1213_v41 }
 0x30c   :  { %v1214_v42 = vpop.f32.mrf.mxu3 }
 0x30d   :  { %v1215_v44 = vadd.f32 %v1742_v26, %v1214_v42 }
 0x30f   :  { %1280 = vst [vmem:[%s2639_s5 + $0x1f8] sm:$0xff] %v1215_v44 }

// kernel: custom-call
= control target key start
LH: loop header
LB: loop body
LE: loop exit
PB: predicated region body
PF: predicated region fallthrough
CT: control target
= control target key end

     0   :  { %5 = vsyncpa [#allocation9], 0  ;;  %v1021_v0 = vmov 2147483648   ;;  %v1022_v1 = vmov 2147483647   ;;  %s1144_s0 = inlined_call_operand.vmem [shape: f32[2,768], index: 0, kind: input, shape index: {}]   ;;  %s1145_s1 = inlined_call_operand.hbm [shape: f32[2,8], index: 1, kind: output, shape index: {0}]   ;;  %s1146_s2 = inlined_call_operand.vmem [shape: s32[2,8], index: 2, kind: output, shape index: {1}]  }
   0x1   :  { %7 = vst [vmem:[#allocation12] sm:$0xff] %v1021_v0 }
   0x2   :  { %8 = vst [vmem:[#allocation14] sm:$0xff] %v1022_v1 }
   0x3   :  { %v955_v2 = vld [vmem:[%s1144_s0 + $0x8] sm:$0xf]  ;;  %v44_v3 = vlaneseq  ;;  %v27_v4 = vld [vmem:[%s1144_s0] sm:$0xff]  ;;  %v1023_v6 = vmov 2147483648   ;;  %v1024_v7 = vmov 2147483647  }
   0x4   :  { %40 = vst [vmem:[#allocation16 + $0x8] sm:$0xf] %v955_v2  ;;  %v55_v10 = vsub.s32 2147483647, %v27_v4  ;;  %vm54_vm0 = vcmp.lt.s32.totalorder %v27_v4, 0  ;;  %s1057_s0 = smov 0  }
   0x5   :  { %v1053_v5 = vshrl.u32 %v44_v3, 7  ;;  %85 = vst [vmem:[#allocation13] sm:$0xff] %v1023_v6  ;;  %v45_v8 = vand.u32 127, %v44_v3 }
   0x6   :  { %86 = vst [vmem:[#allocation15] sm:$0xff] %v1024_v7  ;;  %v56_v13 = vsel %vm54_vm0, %v55_v10, %v27_v4 }
   0x7   :  { %v48_v9 = vshrl.u32 %v1053_v5, 1 }
   0x9   :  { %v50_v11 = vmul.u32 128, %v48_v9 }
   0xb   :  { %v51_v12 = vadd.s32 %v50_v11, %v45_v8  ;;  %v62_v14 = vld [vmem:[#allocation16 + $0x8] sm:$0xff] }
   0xc   :  { %vm63_vm1 = vcmp.lt.s32.totalorder %v62_v14, 0  ;;  %v64_v15 = vsub.s32 2147483647, %v62_v14 }
   0xd   :  { %vm58_vm2 = vcmp.lt.s32.totalorder %v51_v12, 768  ;;  %v66_v16 = vadd.s32 512, %v51_v12  ;;  %80 = vst [vmem:[#allocation17] sm:$0xff] %v51_v12 }
   0xe   :  { %v59_v17 = vsel %vm58_vm2, %v56_v13, 2147483648  ;;  %v65_v18 = vsel %vm63_vm1, %v64_v15, %v62_v14 }
   0xf   :  { %60 = vst [vmem:[#allocation16] sm:$0xff] %v59_v17  ;;  %vm67_vm3 = vcmp.lt.s32.totalorder %v66_v16, 768 }
  0x10   :  { %v68_v19 = vsel %vm67_vm3, %v65_v18, 2147483648  ;;  %83 = vst [vmem:[#allocation17 + $0x8] sm:$0xff] %v66_v16 }
  0x11   :  { %69 = vst [vmem:[#allocation16 + $0x8] sm:$0xff] %v68_v19 }
  0x12 LB: > { %s420_s13 = scalar_lea.vmem [#allocation13], %s1019_s0  ;;  %s422_s14 = scalar_lea.vmem [#allocation15], %s1019_s0  ;;  %s1019_s0 = sphi %s1057_s0, %s93_s0  }
  0x13   : > { %s93_s0 = sadd.s32 1, %s1019_s0  }
  0x14   : > { %v95_v21 = vld [vmem:[#allocation17] sm:$0xff]  ;;  %p90_p2 = scmp.ge.s32.totalorder %s93_s0, 8  }
  0x15   :  { %s1030_s0 = smov (%p90_p2), [#allocation8]  }
  0x16   : > { %v94_v20 = vld [vmem:[#allocation16] sm:$0xff] }
  0x17   : > { %v100_v23 = vld [vmem:[#allocation17 + $0x8] sm:$0xff] }
  0x18   : > { %v98_v22 = vld [vmem:[#allocation16 + $0x8] sm:$0xff]  ;;  %vm104_vm6 = vcmp.lt.s32.totalorder %v100_v23, %v95_v21 }
  0x19   : > { %vm102_vm4 = vcmp.gt.s32.totalorder %v98_v22, %v94_v20  ;;  %vm103_vm5 = vcmp.eq.s32.totalorder %v98_v22, %v94_v20 }
  0x1a   : > { %vm105_vm7 = vmand %vm103_vm5, %vm104_vm6 }
  0x1b   : > { %vm106_vm8 = vmor %vm102_vm4, %vm105_vm7 }
  0x1c   : > { %v107_v24 = vsel %vm106_vm8, %v98_v22, %v94_v20  ;;  %v108_v25 = vsel %vm106_vm8, %v100_v23, %v95_v21 }
  0x1d   : > { %v110_v26 = vrot.slane %v107_v24, 2  ;;  %v111_v27 = vrot.slane %v108_v25, 2 }
  0x1f   : > { %vm113_vm9 = vcmp.gt.s32.totalorder %v110_v26, %v107_v24  ;;  %vm114_vm10 = vcmp.eq.s32.totalorder %v110_v26, %v107_v24  ;;  %vm115_vm11 = vcmp.lt.s32.totalorder %v111_v27, %v108_v25 }
  0x20   : > { %vm116_vm12 = vmand %vm114_vm10, %vm115_vm11 }
  0x21   : > { %vm117_vm13 = vmor %vm113_vm9, %vm116_vm12 }
  0x22   : > { %v118_v28 = vsel %vm117_vm13, %v110_v26, %v107_v24  ;;  %v119_v29 = vsel %vm117_vm13, %v111_v27, %v108_v25 }
  0x23   : > { %v121_v30 = vrot.slane %v118_v28, 2  ;;  %v122_v31 = vrot.slane %v119_v29, 2 }
  0x25   : > { %vm124_vm14 = vcmp.gt.s32.totalorder %v121_v30, %v118_v28  ;;  %vm125_vm15 = vcmp.eq.s32.totalorder %v121_v30, %v118_v28  ;;  %vm126_vm0 = vcmp.lt.s32.totalorder %v122_v31, %v119_v29 }
  0x26   : > { %vm127_vm1 = vmand %vm125_vm15, %vm126_vm0 }
  0x27   : > { %vm128_vm2 = vmor %vm124_vm14, %vm127_vm1 }
  0x28   : > { %v129_v32 = vsel %vm128_vm2, %v121_v30, %v118_v28  ;;  %v130_v33 = vsel %vm128_vm2, %v122_v31, %v119_v29 }
  0x29   : > { %v132_v34 = vrot.slane %v129_v32, 2  ;;  %v133_v35 = vrot.slane %v130_v33, 2 }
  0x2b   : > { %vm135_vm3 = vcmp.gt.s32.totalorder %v132_v34, %v129_v32  ;;  %vm136_vm4 = vcmp.eq.s32.totalorder %v132_v34, %v129_v32  ;;  %vm137_vm5 = vcmp.lt.s32.totalorder %v133_v35, %v130_v33 }
  0x2c   : > { %vm138_vm6 = vmand %vm136_vm4, %vm137_vm5 }
  0x2d   : > { %vm139_vm7 = vmor %vm135_vm3, %vm138_vm6 }
  0x2e   : > { %v141_v36 = vsel %vm139_vm7, %v133_v35, %v130_v33  ;;  %v140_v37 = vsel %vm139_vm7, %v132_v34, %v129_v32 }
  0x2f   : > { %175 = vxpose.xlu1.b32.start [1/16] %v141_v36, 128  ;;  %143 = vxpose.xlu0.b32.start [1/16] %v140_v37, 128 }
  0x37   : > { %176 = vxpose.xlu1.b32.cont [2/16] %v141_v36, 128  ;;  %144 = vxpose.xlu0.b32.cont [2/16] %v140_v37, 128 }
  0x3f   : > { %177 = vxpose.xlu1.b32.cont [3/16] %v141_v36, 128  ;;  %145 = vxpose.xlu0.b32.cont [3/16] %v140_v37, 128 }
  0x47   : > { %178 = vxpose.xlu1.b32.cont [4/16] %v141_v36, 128  ;;  %146 = vxpose.xlu0.b32.cont [4/16] %v140_v37, 128 }
  0x4f   : > { %179 = vxpose.xlu1.b32.cont [5/16] %v141_v36, 128  ;;  %147 = vxpose.xlu0.b32.cont [5/16] %v140_v37, 128 }
  0x57   : > { %180 = vxpose.xlu1.b32.cont [6/16] %v141_v36, 128  ;;  %148 = vxpose.xlu0.b32.cont [6/16] %v140_v37, 128 }
  0x5f   : > { %181 = vxpose.xlu1.b32.cont [7/16] %v141_v36, 128  ;;  %149 = vxpose.xlu0.b32.cont [7/16] %v140_v37, 128 }
  0x67   : > { %182 = vxpose.xlu1.b32.cont [8/16] %v141_v36, 128  ;;  %150 = vxpose.xlu0.b32.cont [8/16] %v140_v37, 128 }
  0x6f   : > { %183 = vxpose.xlu1.b32.cont [9/16] %v141_v36, 128  ;;  %151 = vxpose.xlu0.b32.cont [9/16] %v140_v37, 128 }
  0x77   : > { %184 = vxpose.xlu1.b32.cont [10/16] %v141_v36, 128  ;;  %152 = vxpose.xlu0.b32.cont [10/16] %v140_v37, 128 }
  0x7f   : > { %185 = vxpose.xlu1.b32.cont [11/16] %v141_v36, 128  ;;  %153 = vxpose.xlu0.b32.cont [11/16] %v140_v37, 128 }
  0x87   : > { %186 = vxpose.xlu1.b32.cont [12/16] %v141_v36, 128  ;;  %154 = vxpose.xlu0.b32.cont [12/16] %v140_v37, 128 }
  0x8f   : > { %187 = vxpose.xlu1.b32.cont [13/16] %v141_v36, 128  ;;  %155 = vxpose.xlu0.b32.cont [13/16] %v140_v37, 128 }
  0x97   : > { %188 = vxpose.xlu1.b32.cont [14/16] %v141_v36, 128  ;;  %156 = vxpose.xlu0.b32.cont [14/16] %v140_v37, 128 }
  0x9f   : > { %189 = vxpose.xlu1.b32.cont [15/16] %v141_v36, 128  ;;  %157 = vxpose.xlu0.b32.cont [15/16] %v140_v37, 128 }
  0xa7   : > { %190 = vxpose.xlu1.b32.end [16/16] %v141_v36, 128  ;;  %158 = vxpose.xlu0.b32.end [16/16] %v140_v37, 128 }
  0xd3   : > { %v191_v38 = vpop.trf.xlu1  ;;  %v159_v39 = vpop.trf.xlu0 }
  0xdb   : > { %v192_v40 = vpop.trf.xlu1  ;;  %v160_v41 = vpop.trf.xlu0 }
  0xdc   : > { %vm211_vm8 = vcmp.lt.s32.totalorder %v192_v40, %v191_v38  ;;  %vm209_vm9 = vcmp.gt.s32.totalorder %v160_v41, %v159_v39  ;;  %vm210_vm10 = vcmp.eq.s32.totalorder %v160_v41, %v159_v39 }
  0xdd   : > { %vm212_vm11 = vmand %vm210_vm10, %vm211_vm8 }
  0xde   : > { %vm213_vm12 = vmor %vm209_vm9, %vm212_vm11 }
  0xdf   : > { %v214_v42 = vsel %vm213_vm12, %v160_v41, %v159_v39  ;;  %v215_v43 = vsel %vm213_vm12, %v192_v40, %v191_v38 }
  0xe3   : > { %v193_v44 = vpop.trf.xlu1  ;;  %v161_v45 = vpop.trf.xlu0 }
  0xe4   : > { %vm220_vm13 = vcmp.lt.s32.totalorder %v193_v44, %v215_v43  ;;  %vm218_vm14 = vcmp.gt.s32.totalorder %v161_v45, %v214_v42  ;;  %vm219_vm15 = vcmp.eq.s32.totalorder %v161_v45, %v214_v42 }
  0xe5   : > { %vm221_vm0 = vmand %vm219_vm15, %vm220_vm13 }
  0xe6   : > { %vm222_vm1 = vmor %vm218_vm14, %vm221_vm0 }
  0xe7   : > { %v223_v46 = vsel %vm222_vm1, %v161_v45, %v214_v42  ;;  %v224_v47 = vsel %vm222_vm1, %v193_v44, %v215_v43 }
  0xeb   : > { %v194_v48 = vpop.trf.xlu1  ;;  %v162_v49 = vpop.trf.xlu0 }
  0xec   : > { %vm229_vm2 = vcmp.lt.s32.totalorder %v194_v48, %v224_v47  ;;  %vm227_vm3 = vcmp.gt.s32.totalorder %v162_v49, %v223_v46  ;;  %vm228_vm4 = vcmp.eq.s32.totalorder %v162_v49, %v223_v46 }
  0xed   : > { %vm230_vm5 = vmand %vm228_vm4, %vm229_vm2 }
  0xee   : > { %vm231_vm6 = vmor %vm227_vm3, %vm230_vm5 }
  0xef   : > { %v232_v50 = vsel %vm231_vm6, %v162_v49, %v223_v46  ;;  %v233_v51 = vsel %vm231_vm6, %v194_v48, %v224_v47 }
  0xf3   : > { %v195_v52 = vpop.trf.xlu1  ;;  %v163_v53 = vpop.trf.xlu0 }
  0xf4   : > { %vm238_vm7 = vcmp.lt.s32.totalorder %v195_v52, %v233_v51  ;;  %vm236_vm8 = vcmp.gt.s32.totalorder %v163_v53, %v232_v50  ;;  %vm237_vm9 = vcmp.eq.s32.totalorder %v163_v53, %v232_v50 }
  0xf5   : > { %vm239_vm10 = vmand %vm237_vm9, %vm238_vm7 }
  0xf6   : > { %vm240_vm11 = vmor %vm236_vm8, %vm239_vm10 }
  0xf7   : > { %v241_v54 = vsel %vm240_vm11, %v163_v53, %v232_v50  ;;  %v242_v55 = vsel %vm240_vm11, %v195_v52, %v233_v51 }
  0xfb   : > { %v196_v56 = vpop.trf.xlu1  ;;  %v164_v57 = vpop.trf.xlu0 }
  0xfc   : > { %vm247_vm12 = vcmp.lt.s32.totalorder %v196_v56, %v242_v55  ;;  %vm245_vm13 = vcmp.gt.s32.totalorder %v164_v57, %v241_v54  ;;  %vm246_vm14 = vcmp.eq.s32.totalorder %v164_v57, %v241_v54 }
  0xfd   : > { %vm248_vm15 = vmand %vm246_vm14, %vm247_vm12 }
  0xfe   : > { %vm249_vm0 = vmor %vm245_vm13, %vm248_vm15 }
  0xff   : > { %v250_v58 = vsel %vm249_vm0, %v164_v57, %v241_v54  ;;  %v251_v59 = vsel %vm249_vm0, %v196_v56, %v242_v55 }
 0x103   : > { %v197_v60 = vpop.trf.xlu1  ;;  %v165_v61 = vpop.trf.xlu0 }
 0x104   : > { %vm256_vm1 = vcmp.lt.s32.totalorder %v197_v60, %v251_v59  ;;  %vm254_vm2 = vcmp.gt.s32.totalorder %v165_v61, %v250_v58  ;;  %vm255_vm3 = vcmp.eq.s32.totalorder %v165_v61, %v250_v58 }
 0x105   : > { %vm257_vm4 = vmand %vm255_vm3, %vm256_vm1 }
 0x106   : > { %vm258_vm5 = vmor %vm254_vm2, %vm257_vm4 }
 0x107   : > { %v259_v62 = vsel %vm258_vm5, %v165_v61, %v250_v58  ;;  %v260_v63 = vsel %vm258_vm5, %v197_v60, %v251_v59 }
 0x10b   : > { %v198_v0 = vpop.trf.xlu1  ;;  %v166_v1 = vpop.trf.xlu0 }
 0x10c   : > { %vm265_vm6 = vcmp.lt.s32.totalorder %v198_v0, %v260_v63  ;;  %vm263_vm7 = vcmp.gt.s32.totalorder %v166_v1, %v259_v62  ;;  %vm264_vm8 = vcmp.eq.s32.totalorder %v166_v1, %v259_v62 }
 0x10d   : > { %vm266_vm9 = vmand %vm264_vm8, %vm265_vm6 }
 0x10e   : > { %vm267_vm10 = vmor %vm263_vm7, %vm266_vm9 }
 0x10f   : > { %v268_v2 = vsel %vm267_vm10, %v166_v1, %v259_v62  ;;  %v269_v4 = vsel %vm267_vm10, %v198_v0, %v260_v63 }
 0x113   : > { %v199_v6 = vpop.trf.xlu1  ;;  %v167_v7 = vpop.trf.xlu0 }
 0x114   : > { %vm274_vm11 = vcmp.lt.s32.totalorder %v199_v6, %v269_v4  ;;  %vm272_vm12 = vcmp.gt.s32.totalorder %v167_v7, %v268_v2  ;;  %vm273_vm13 = vcmp.eq.s32.totalorder %v167_v7, %v268_v2 }
 0x115   : > { %vm275_vm14 = vmand %vm273_vm13, %vm274_vm11 }
 0x116   : > { %vm276_vm15 = vmor %vm272_vm12, %vm275_vm14 }
 0x117   : > { %v277_v8 = vsel %vm276_vm15, %v167_v7, %v268_v2  ;;  %v278_v9 = vsel %vm276_vm15, %v199_v6, %v269_v4  ;;  %v1025_v7 = vmov 2147483648  }
 0x11b   : > { %v200_v10 = vpop.trf.xlu1  ;;  %v168_v11 = vpop.trf.xlu0 }
 0x11c   : > { %vm283_vm0 = vcmp.lt.s32.totalorder %v200_v10, %v278_v9  ;;  %vm281_vm1 = vcmp.gt.s32.totalorder %v168_v11, %v277_v8  ;;  %vm282_vm2 = vcmp.eq.s32.totalorder %v168_v11, %v277_v8 }
 0x11d   : > { %vm284_vm3 = vmand %vm282_vm2, %vm283_vm0 }
 0x11e   : > { %vm285_vm4 = vmor %vm281_vm1, %vm284_vm3 }
 0x11f   : > { %v286_v12 = vsel %vm285_vm4, %v168_v11, %v277_v8  ;;  %v287_v13 = vsel %vm285_vm4, %v200_v10, %v278_v9  ;;  %v1026_v8 = vmov 2147483647  }
 0x123   : > { %v201_v14 = vpop.trf.xlu1  ;;  %v169_v15 = vpop.trf.xlu0 }
 0x124   : > { %vm292_vm5 = vcmp.lt.s32.totalorder %v201_v14, %v287_v13  ;;  %vm290_vm6 = vcmp.gt.s32.totalorder %v169_v15, %v286_v12  ;;  %vm291_vm7 = vcmp.eq.s32.totalorder %v169_v15, %v286_v12 }
 0x125   : > { %vm293_vm8 = vmand %vm291_vm7, %vm292_vm5 }
 0x126   : > { %vm294_vm9 = vmor %vm290_vm6, %vm293_vm8 }
 0x127   : > { %v295_v16 = vsel %vm294_vm9, %v169_v15, %v286_v12  ;;  %v296_v17 = vsel %vm294_vm9, %v201_v14, %v287_v13  ;;  %v518_v13 = vld [vmem:[#allocation12] sm:$0xff] (%p90_p2)  ;;  %v519_v14 = vld [vmem:[#allocation14] sm:$0xff] (%p90_p2)  ;;  %v1027_v15 = vmov (%p90_p2), 839939668  }
 0x12b   : > { %v202_v18 = vpop.trf.xlu1  ;;  %v170_v19 = vpop.trf.xlu0 }
 0x12c   : > { %vm301_vm10 = vcmp.lt.s32.totalorder %v202_v18, %v296_v17  ;;  %vm299_vm11 = vcmp.gt.s32.totalorder %v170_v19, %v295_v16  ;;  %vm300_vm12 = vcmp.eq.s32.totalorder %v170_v19, %v295_v16 }
 0x12d   : > { %vm302_vm13 = vmand %vm300_vm12, %vm301_vm10 }
 0x12e   : > { %vm303_vm14 = vmor %vm299_vm11, %vm302_vm13 }
 0x12f   : > { %v304_v20 = vsel %vm303_vm14, %v170_v19, %v295_v16  ;;  %v305_v21 = vsel %vm303_vm14, %v202_v18, %v296_v17  ;;  %v543_v16 = vunpack.c.l.s4 (%p90_p2), %v1027_v15  ;;  %v558_v18 = vand.u32 (%p90_p2), 4, %v1053_v5 }
 0x130   :  { %v1028_v19 = vmov (%p90_p2), 1417023538  }
 0x131   :  { %v1069_v17 = vunpack.c.0.s8 (%p90_p2), %v543_v16 }
 0x133   : > { %v203_v22 = vpop.trf.xlu1  ;;  %v171_v23 = vpop.trf.xlu0 }
 0x134   : > { %vm310_vm15 = vcmp.lt.s32.totalorder %v203_v22, %v305_v21  ;;  %vm308_vm0 = vcmp.gt.s32.totalorder %v171_v23, %v304_v20  ;;  %vm309_vm1 = vcmp.eq.s32.totalorder %v171_v23, %v304_v20 }
 0x135   : > { %vm311_vm2 = vmand %vm309_vm1, %vm310_vm15 }
 0x136   : > { %vm312_vm3 = vmor %vm308_vm0, %vm311_vm2 }
 0x137   : > { %v313_v24 = vsel %vm312_vm3, %v171_v23, %v304_v20  ;;  %v314_v25 = vsel %vm312_vm3, %v203_v22, %v305_v21  ;;  %v565_v20 = vunpack.c.l.s4 (%p90_p2), %v1028_v19 }
 0x13b   : > { %v204_v26 = vpop.trf.xlu1  ;;  %v172_v27 = vpop.trf.xlu0 }
 0x13c   : > { %vm319_vm4 = vcmp.lt.s32.totalorder %v204_v26, %v314_v25  ;;  %vm317_vm5 = vcmp.gt.s32.totalorder %v172_v27, %v313_v24  ;;  %vm318_vm6 = vcmp.eq.s32.totalorder %v172_v27, %v313_v24 }
 0x13d   : > { %vm320_vm7 = vmand %vm318_vm6, %vm319_vm4 }
 0x13e   : > { %vm321_vm8 = vmor %vm317_vm5, %vm320_vm7 }
 0x13f   : > { %v322_v28 = vsel %vm321_vm8, %v172_v27, %v313_v24  ;;  %v323_v29 = vsel %vm321_vm8, %v204_v26, %v314_v25 }
 0x143   : > { %v205_v30 = vpop.trf.xlu1  ;;  %v173_v31 = vpop.trf.xlu0 }
 0x144   : > { %vm328_vm9 = vcmp.lt.s32.totalorder %v205_v30, %v323_v29  ;;  %vm326_vm10 = vcmp.gt.s32.totalorder %v173_v31, %v322_v28  ;;  %vm327_vm11 = vcmp.eq.s32.totalorder %v173_v31, %v322_v28 }
 0x145   : > { %vm329_vm12 = vmand %vm327_vm11, %vm328_vm9 }
 0x146   : > { %vm330_vm13 = vmor %vm326_vm10, %vm329_vm12 }
 0x147   : > { %v331_v32 = vsel %vm330_vm13, %v173_v31, %v322_v28  ;;  %v332_v33 = vsel %vm330_vm13, %v205_v30, %v323_v29  ;;  %v1080_v29 = vunpack.c.0.s8 (%p90_p2), %v565_v20  ;;  %v580_v30 = vand.u32 (%p90_p2), 2, %v1053_v5 }
 0x14b   : > { %v206_v34 = vpop.trf.xlu1  ;;  %v174_v35 = vpop.trf.xlu0 }
 0x14c   : > { %vm337_vm14 = vcmp.lt.s32.totalorder %v206_v34, %v332_v33  ;;  %vm335_vm15 = vcmp.gt.s32.totalorder %v174_v35, %v331_v32  ;;  %vm336_vm0 = vcmp.eq.s32.totalorder %v174_v35, %v331_v32 }
 0x14d   : > { %vm338_vm1 = vmand %vm336_vm0, %vm337_vm14 }
 0x14e   : > { %vm339_vm2 = vmor %vm335_vm15, %vm338_vm1 }
 0x14f   : > { %v340_v36 = vsel %vm339_vm2, %v174_v35, %v331_v32  ;;  %v341_v37 = vsel %vm339_vm2, %v206_v34, %v332_v33  ;;  %v1029_v33 = vmov (%p90_p2), 1732584193  }
 0x150   : > { %v343_v38 = vrot.slane %v340_v36, 1  ;;  %v344_v39 = vrot.slane %v341_v37, 1  ;;  %v587_v34 = vunpack.c.l.s4 (%p90_p2), %v1029_v33 }
 0x152   : > { %vm346_vm3 = vcmp.gt.s32.totalorder %v343_v38, %v340_v36  ;;  %vm347_vm4 = vcmp.eq.s32.totalorder %v343_v38, %v340_v36  ;;  %vm348_vm5 = vcmp.lt.s32.totalorder %v344_v39, %v341_v37 }
 0x153   : > { %vm349_vm6 = vmand %vm347_vm4, %vm348_vm5 }
 0x154   : > { %vm350_vm7 = vmor %vm346_vm3, %vm349_vm6 }
 0x155   : > { %v351_v40 = vsel %vm350_vm7, %v343_v38, %v340_v36  ;;  %v352_v41 = vsel %vm350_vm7, %v344_v39, %v341_v37  ;;  %v1093_v39 = vunpack.c.0.s8 (%p90_p2), %v587_v34 }
 0x156   : > { %v354_v42 = vrot.slane %v351_v40, 1  ;;  %v355_v43 = vrot.slane %v352_v41, 1 }
 0x158   : > { %vm357_vm8 = vcmp.gt.s32.totalorder %v354_v42, %v351_v40  ;;  %vm358_vm9 = vcmp.eq.s32.totalorder %v354_v42, %v351_v40  ;;  %vm359_vm10 = vcmp.lt.s32.totalorder %v355_v43, %v352_v41 }
 0x159   : > { %vm360_vm11 = vmand %vm358_vm9, %vm359_vm10 }
 0x15a   : > { %vm361_vm12 = vmor %vm357_vm8, %vm360_vm11 }
 0x15b   : > { %v362_v44 = vsel %vm361_vm12, %v354_v42, %v351_v40  ;;  %v363_v45 = vsel %vm361_vm12, %v355_v43, %v352_v41  ;;  %v602_v43 = vand.u32 (%p90_p2), 1, %v1053_v5 }
 0x15c   : > { %v365_v46 = vrot.slane %v362_v44, 1  ;;  %v366_v47 = vrot.slane %v363_v45, 1 }
 0x15e   : > { %vm370_vm13 = vcmp.lt.s32.totalorder %v366_v47, %v363_v45  ;;  %vm368_vm14 = vcmp.gt.s32.totalorder %v365_v46, %v362_v44  ;;  %vm369_vm15 = vcmp.eq.s32.totalorder %v365_v46, %v362_v44 }
 0x15f   : > { %vm371_vm0 = vmand %vm369_vm15, %vm370_vm13 }
 0x160   : > { %vm372_vm1 = vmor %vm368_vm14, %vm371_vm0 }
 0x161   : > { %v373_v48 = vsel %vm372_vm1, %v365_v46, %v362_v44  ;;  %v374_v49 = vsel %vm372_vm1, %v366_v47, %v363_v45 }
 0x162   : > { %v376_v50 = vrot.slane %v373_v48, 1  ;;  %v377_v51 = vrot.slane %v374_v49, 1 }
 0x164   : > { %vm379_vm2 = vcmp.gt.s32.totalorder %v376_v50, %v373_v48  ;;  %vm380_vm3 = vcmp.eq.s32.totalorder %v376_v50, %v373_v48  ;;  %vm381_vm4 = vcmp.lt.s32.totalorder %v377_v51, %v374_v49 }
 0x165   : > { %vm382_vm5 = vmand %vm380_vm3, %vm381_vm4 }
 0x166   : > { %vm383_vm6 = vmor %vm379_vm2, %vm382_vm5 }
 0x167   : > { %v384_v52 = vsel %vm383_vm6, %v376_v50, %v373_v48  ;;  %v385_v53 = vsel %vm383_vm6, %v377_v51, %v374_v49 }
 0x168   : > { %v387_v54 = vrot.slane %v384_v52, 1  ;;  %v388_v55 = vrot.slane %v385_v53, 1 }
 0x16a   : > { %vm390_vm7 = vcmp.gt.s32.totalorder %v387_v54, %v384_v52  ;;  %vm391_vm8 = vcmp.eq.s32.totalorder %v387_v54, %v384_v52  ;;  %vm392_vm9 = vcmp.lt.s32.totalorder %v388_v55, %v385_v53 }
 0x16b   : > { %vm393_vm10 = vmand %vm391_vm8, %vm392_vm9 }
 0x16c   : > { %vm394_vm11 = vmor %vm390_vm7, %vm393_vm10 }
 0x16d   : > { %v395_v56 = vsel %vm394_vm11, %v387_v54, %v384_v52  ;;  %v396_v57 = vsel %vm394_vm11, %v388_v55, %v385_v53 }
 0x16e   : > { %v398_v58 = vrot.slane %v395_v56, 1  ;;  %v399_v59 = vrot.slane %v396_v57, 1 }
 0x170   : > { %vm401_vm12 = vcmp.gt.s32.totalorder %v398_v58, %v395_v56  ;;  %vm402_vm13 = vcmp.eq.s32.totalorder %v398_v58, %v395_v56  ;;  %vm403_vm14 = vcmp.lt.s32.totalorder %v399_v59, %v396_v57 }
 0x171   : > { %vm404_vm15 = vmand %vm402_vm13, %vm403_vm14 }
 0x172   : > { %vm405_vm0 = vmor %vm401_vm12, %vm404_vm15 }
 0x173   : > { %v406_v60 = vsel %vm405_vm0, %v398_v58, %v395_v56  ;;  %v407_v61 = vsel %vm405_vm0, %v399_v59, %v396_v57  ;;  %vm1076_vm0 = vcmp.ne.s32.totalorder (%p90_p2), %v558_v18, 0 }
 0x174   : > { %v409_v62 = vrot.slane %v406_v60, 1  ;;  %v410_v63 = vrot.slane %v407_v61, 1 }
 0x176   : > { %vm412_vm1 = vcmp.gt.s32.totalorder %v409_v62, %v406_v60  ;;  %vm413_vm2 = vcmp.eq.s32.totalorder %v409_v62, %v406_v60  ;;  %vm414_vm3 = vcmp.lt.s32.totalorder %v410_v63, %v407_v61 }
 0x177   : > { %vm415_vm4 = vmand %vm413_vm2, %vm414_vm3 }
 0x178   : > { %vm416_vm5 = vmor %vm412_vm1, %vm415_vm4 }
 0x179   : > { %v418_v0 = vsel %vm416_vm5, %v410_v63, %v407_v61  ;;  %v417_v1 = vsel %vm416_vm5, %v409_v62, %v406_v60 }
 0x17a   : > { %425 = vxpose.xlu2.b32.start.end [1/1] (short) (narrow) %v418_v0, 8  ;;  %421 = vst [vmem:[%s420_s13] sm:$0x1] %v417_v1  ;;  %s886_s13 = sshll.u32 (%p90_p2), %s1030_s0, 4  ;;  %s887_s13 = int_to_ptr.vmem [resolvable:$true] %s886_s13 }
 0x17b   : > { %423 = vst [vmem:[%s422_s14] sm:$0x1] %v418_v0 }
 0x181   :  { %v506_v11 = vld [vmem:[#allocation13 + $0x7] ss:$-1 sm:$0xff] (%p90_p2) }
 0x182   :  { %v512_v12 = vld [vmem:[#allocation15 + $0x7] ss:$-1 sm:$0xff] (%p90_p2)  ;;  %vm524_vm8 = vcmp.gt.s32.totalorder (%p90_p2), %v518_v13, %v506_v11  ;;  %vm525_vm9 = vcmp.eq.s32.totalorder (%p90_p2), %v518_v13, %v506_v11 }
 0x183   :  { %vm526_vm10 = vcmp.lt.s32.totalorder (%p90_p2), %v519_v14, %v512_v12 }
 0x184   :  { %vm527_vm11 = vmand (%p90_p2), %vm525_vm9, %vm526_vm10  ;;  %vm1087_vm9 = vcmp.ne.s32.totalorder (%p90_p2), %v580_v30, 0 }
 0x185   :  { %vm528_vm12 = vmor (%p90_p2), %vm524_vm8, %vm527_vm11 }
 0x186   :  { %v529_v21 = vsel (%p90_p2), %vm528_vm12, %v518_v13, %v506_v11  ;;  %v531_v22 = vsel (%p90_p2), %vm528_vm12, %v506_v11, %v518_v13  ;;  %v533_v23 = vsel (%p90_p2), %vm528_vm12, %v519_v14, %v512_v12 }
 0x187   :  { %v545_v24 = vperm.slane (%p90_p2), %v529_v21, %v1069_v17  ;;  %v549_v25 = vperm.slane (%p90_p2), %v533_v23, %v1069_v17  ;;  %v690_v26 = vperm.slane (%p90_p2), %v531_v22, %v1069_v17 }
 0x189   :  { %vm551_vm13 = vcmp.gt.s32.totalorder (%p90_p2), %v529_v21, %v545_v24  ;;  %vm552_vm14 = vcmp.eq.s32.totalorder (%p90_p2), %v529_v21, %v545_v24  ;;  %vm553_vm15 = vcmp.lt.s32.totalorder (%p90_p2), %v533_v23, %v549_v25  ;;  %vm697_vm2 = vcmp.eq.s32.totalorder (%p90_p2), %v531_v22, %v690_v26 }
 0x18a   :  { %vm554_vm1 = vmand (%p90_p2), %vm552_vm14, %vm553_vm15  ;;  %vm696_vm5 = vcmp.gt.s32.totalorder (%p90_p2), %v531_v22, %v690_v26 }
 0x18b   :  { %vm555_vm4 = vmor (%p90_p2), %vm551_vm13, %vm554_vm1 }
 0x213   : > { %v441_v2 = vpop.trf.xlu2 }
 0x214   : > { %v480_v4 = vrot.slane %v441_v2, 1  ;;  %964 = vpush %v441_v2 }
 0x216   : > { %966 = vpush %v480_v4 }
 0x245   : > { %s965_s15 = spop %964 }
 0x246   : > { %s458_s16 = sshrl.u32 %s965_s15, 9  ;;  %s460_s17 = ssub.s32 0, %s965_s15 }
 0x247   : > { %p459_p0 = scmp.lt.s32.totalorder %s965_s15, 0  ;;  %s956_s18 = smin.u32 %s965_s15, %s460_s17 }
 0x248   : > { %s462_s19 = sand.u32 511, %s956_s18   ;;  %s958_s20 = sshll.u32 %s458_s16, 3 }
 0x249   : > { %s463_s21 = ssub.s32 0, %s462_s19  ;;  %s967_s22 = spop %966 }
 0x24a   : > { %s1154_s21 = smov (!%p459_p0, %s463_s21), %s462_s19  ;;  %s484_s26 = ssub.s32 0, %s967_s22 }
 0x24b   : > { %s465_s23 = sshrl.u32 %s1154_s21, 7  ;;  %s467_s24 = sand.u32 127, %s1154_s21  }
 0x24c   : > { %s957_s25 = sshll.u32 %s465_s23, 8  ;;  %s960_s28 = smin.u32 %s967_s22, %s484_s26 }
 0x24d   : > { %s468_s27 = sadd.s32 %s957_s25, %s467_s24  ;;  %p483_p1 = scmp.lt.s32.totalorder %s967_s22, 0 }
 0x24e   : > { %v470_v6 = vstv %s468_s27  ;;  %s486_s29 = sand.u32 511, %s960_s28   ;;  %s474_s3 = scalar_lea.vmem [#allocation16], %s958_s20 }
 0x24f   : > { %vm472_vm6 = vcmp.eq.s32.totalorder %v44_v3, %v470_v6  ;;  %s487_s30 = ssub.s32 0, %s486_s29  ;;  %s477_s4 = scalar_lea.vmem [#allocation17], %s958_s20 }
 0x250   : > { %475 = vst.msk [vmem:[%s474_s3] sm:$0xff] %vm472_vm6, %v1025_v7  ;;  %s1156_s30 = smov (!%p483_p1, %s487_s30), %s486_s29  ;;  %s482_s5 = sshrl.u32 %s967_s22, 9 }
 0x251   : > { %478 = vst.msk [vmem:[%s477_s4] sm:$0xff] %vm472_vm6, %v1026_v8  ;;  %s489_s6 = sshrl.u32 %s1156_s30, 7  ;;  %s491_s7 = sand.u32 127, %s1156_s30   ;;  %vm560_vm6 = vmxor (%p90_p2), %vm555_vm4, %vm1076_vm0 }
 0x252   : > { %s961_s8 = sshll.u32 %s489_s6, 8  ;;  %s962_s10 = sshll.u32 %s482_s5, 3  ;;  %v561_v31 = vsel (%p90_p2), %vm560_vm6, %v529_v21, %v545_v24  ;;  %v562_v32 = vsel (%p90_p2), %vm560_vm6, %v533_v23, %v549_v25 }
 0x253   : > { %s492_s9 = sadd.s32 %s961_s8, %s491_s7  ;;  %s498_s11 = scalar_lea.vmem [#allocation16], %s962_s10  ;;  %v567_v35 = vperm.slane (%p90_p2), %v561_v31, %v1080_v29  ;;  %v571_v36 = vperm.slane (%p90_p2), %v562_v32, %v1080_v29 }
 0x254   : > { %v494_v9 = vstv %s492_s9  ;;  %s501_s12 = scalar_lea.vmem [#allocation17], %s962_s10  ;;  %s888_s16 = sshll.u32 (%p90_p2), %s1145_s1, 4  ;;  %s889_s16 = int_to_ptr.hbm [resolvable:$true] %s888_s16 }
 0x255   : > { %v495_v10 = vadd.s32 128, %v494_v9  ;;  %92 = sbr.rel (!%p90_p2) target bundleno = 18 (0x12), region = 107  ;;  %vm573_vm11 = vcmp.gt.s32.totalorder (%p90_p2), %v561_v31, %v567_v35  ;;  %vm575_vm13 = vcmp.lt.s32.totalorder (%p90_p2), %v562_v32, %v571_v36 }
 0x257   : > { %vm496_vm7 = vcmp.eq.s32.totalorder %v44_v3, %v495_v10  ;;  %v535_v3 = vsel (%p90_p2), %vm528_vm12, %v512_v12, %v519_v14  ;;  %vm574_vm12 = vcmp.eq.s32.totalorder (%p90_p2), %v561_v31, %v567_v35 }
 0x258   : > { %499 = vst.msk [vmem:[%s498_s11] sm:$0xff] %vm496_vm7, %v1025_v7  ;;  %v694_v27 = vperm.slane (%p90_p2), %v535_v3, %v1069_v17  ;;  %vm576_vm14 = vmand (%p90_p2), %vm574_vm12, %vm575_vm13 }
 0x259   : > { %502 = vst.msk [vmem:[%s501_s12] sm:$0xff] %vm496_vm7, %v1026_v8  ;;  %vm577_vm15 = vmor (%p90_p2), %vm573_vm11, %vm576_vm14  ;;  %vm1102_vm11 = vcmp.ne.s32.totalorder (%p90_p2), %v602_v43, 0 }
 0x25a   :  { %vm698_vm3 = vcmp.lt.s32.totalorder %v535_v3, %v694_v27  ;;  %vm582_vm1 = vmxor %vm577_vm15, %vm1087_vm9 }
 0x25b   :  { %vm699_vm7 = vmand %vm697_vm2, %vm698_vm3  ;;  %v583_v44 = vsel %vm582_vm1, %v561_v31, %v567_v35  ;;  %v584_v45 = vsel %vm582_vm1, %v562_v32, %v571_v36 }
 0x25c   :  { %vm700_vm8 = vmor %vm696_vm5, %vm699_vm7  ;;  %v589_v46 = vperm.slane %v583_v44, %v1093_v39  ;;  %v593_v47 = vperm.slane %v584_v45, %v1093_v39 }
 0x25d   :  { %vm705_vm10 = vmxor %vm700_vm8, %vm1076_vm0 }
 0x25e   :  { %v706_v38 = vsel %vm705_vm10, %v531_v22, %v690_v26  ;;  %v707_v40 = vsel %vm705_vm10, %v535_v3, %v694_v27  ;;  %vm595_vm7 = vcmp.gt.s32.totalorder %v583_v44, %v589_v46  ;;  %vm596_vm8 = vcmp.eq.s32.totalorder %v583_v44, %v589_v46 }
 0x25f   :  { %v712_v41 = vperm.slane %v706_v38, %v1080_v29  ;;  %v716_v42 = vperm.slane %v707_v40, %v1080_v29  ;;  %vm597_vm10 = vcmp.lt.s32.totalorder %v584_v45, %v593_v47 }
 0x260   :  { %vm598_vm13 = vmand %vm596_vm8, %vm597_vm10 }
 0x261   :  { %vm718_vm2 = vcmp.gt.s32.totalorder %v706_v38, %v712_v41  ;;  %vm719_vm3 = vcmp.eq.s32.totalorder %v706_v38, %v712_v41  ;;  %vm720_vm4 = vcmp.lt.s32.totalorder %v707_v40, %v716_v42  ;;  %vm599_vm14 = vmor %vm595_vm7, %vm598_vm13 }
 0x262   :  { %vm721_vm5 = vmand %vm719_vm3, %vm720_vm4 }
 0x263   :  { %vm722_vm6 = vmor %vm718_vm2, %vm721_vm5 }
 0x264   :  { %vm727_vm12 = vmxor %vm722_vm6, %vm1087_vm9 }
 0x265   :  { %v728_v5 = vsel %vm727_vm12, %v706_v38, %v712_v41  ;;  %v729_v49 = vsel %vm727_vm12, %v707_v40, %v716_v42  ;;  %vm604_vm15 = vmxor %vm599_vm14, %vm1102_vm11 }
 0x266   :  { %v734_v50 = vperm.slane %v728_v5, %v1093_v39  ;;  %v738_v51 = vperm.slane %v729_v49, %v1093_v39  ;;  %v605_v52 = vsel %vm604_vm15, %v583_v44, %v589_v46  ;;  %v606_v53 = vsel %vm604_vm15, %v584_v45, %v593_v47 }
 0x267   :  { %v617_v54 = vperm.slane %v605_v52, %v1069_v17  ;;  %v621_v55 = vperm.slane %v606_v53, %v1069_v17 }
 0x268   :  { %vm740_vm1 = vcmp.gt.s32.totalorder %v728_v5, %v734_v50  ;;  %vm741_vm2 = vcmp.eq.s32.totalorder %v728_v5, %v734_v50  ;;  %vm742_vm3 = vcmp.lt.s32.totalorder %v729_v49, %v738_v51 }
 0x269   :  { %vm743_vm4 = vmand %vm741_vm2, %vm742_vm3  ;;  %vm623_vm5 = vcmp.gt.s32.totalorder %v605_v52, %v617_v54  ;;  %vm624_vm6 = vcmp.eq.s32.totalorder %v605_v52, %v617_v54  ;;  %vm625_vm7 = vcmp.lt.s32.totalorder %v606_v53, %v621_v55 }
 0x26a   :  { %vm744_vm8 = vmor %vm740_vm1, %vm743_vm4 }
 0x26b   :  { %vm626_vm10 = vmand %vm624_vm6, %vm625_vm7 }
 0x26c   :  { %vm627_vm12 = vmor %vm623_vm5, %vm626_vm10 }
 0x26d   :  { %vm632_vm13 = vmxor %vm627_vm12, %vm1076_vm0 }
 0x26e   :  { %v633_v56 = vsel %vm632_vm13, %v605_v52, %v617_v54  ;;  %v634_v57 = vsel %vm632_vm13, %v606_v53, %v621_v55  ;;  %vm749_vm14 = vmxor %vm744_vm8, %vm1102_vm11 }
 0x26f   :  { %v639_v58 = vperm.slane %v633_v56, %v1080_v29  ;;  %v643_v59 = vperm.slane %v634_v57, %v1080_v29  ;;  %v750_v60 = vsel %vm749_vm14, %v728_v5, %v734_v50  ;;  %v751_v61 = vsel %vm749_vm14, %v729_v49, %v738_v51 }
 0x270   :  { %v762_v62 = vperm.slane %v750_v60, %v1069_v17  ;;  %v766_v63 = vperm.slane %v751_v61, %v1069_v17 }
 0x271   :  { %vm645_vm15 = vcmp.gt.s32.totalorder %v633_v56, %v639_v58  ;;  %vm646_vm1 = vcmp.eq.s32.totalorder %v633_v56, %v639_v58  ;;  %vm647_vm2 = vcmp.lt.s32.totalorder %v634_v57, %v643_v59 }
 0x272   :  { %vm648_vm3 = vmand %vm646_vm1, %vm647_vm2  ;;  %vm769_vm4 = vcmp.eq.s32.totalorder %v750_v60, %v762_v62  ;;  %vm770_vm5 = vcmp.lt.s32.totalorder %v751_v61, %v766_v63  ;;  %vm768_vm7 = vcmp.gt.s32.totalorder %v750_v60, %v762_v62 }
 0x273   :  { %vm649_vm6 = vmor %vm645_vm15, %vm648_vm3 }
 0x274   :  { %vm654_vm8 = vmxor %vm649_vm6, %vm1087_vm9 }
 0x275   :  { %v655_v0 = vsel %vm654_vm8, %v633_v56, %v639_v58  ;;  %v656_v1 = vsel %vm654_vm8, %v634_v57, %v643_v59  ;;  %vm771_vm10 = vmand %vm769_vm4, %vm770_vm5 }
 0x276   :  { %v661_v2 = vperm.slane %v655_v0, %v1093_v39  ;;  %v665_v4 = vperm.slane %v656_v1, %v1093_v39  ;;  %vm772_vm12 = vmor %vm768_vm7, %vm771_vm10 }
 0x277   :  { %vm777_vm13 = vmxor %vm772_vm12, %vm1076_vm0 }
 0x278   :  { %vm667_vm14 = vcmp.gt.s32.totalorder %v655_v0, %v661_v2  ;;  %vm668_vm1 = vcmp.eq.s32.totalorder %v655_v0, %v661_v2  ;;  %vm669_vm2 = vcmp.lt.s32.totalorder %v656_v1, %v665_v4  ;;  %v778_v6 = vsel %vm777_vm13, %v750_v60, %v762_v62 }
 0x279   :  { %vm670_vm15 = vmand %vm668_vm1, %vm669_vm2  ;;  %v779_v7 = vsel %vm777_vm13, %v751_v61, %v766_v63  ;;  %v784_v8 = vperm.slane %v778_v6, %v1080_v29 }
 0x27a   :  { %vm671_vm3 = vmor %vm667_vm14, %vm670_vm15  ;;  %v788_v9 = vperm.slane %v779_v7, %v1080_v29 }
 0x27b   :  { %vm676_vm4 = vmxor %vm671_vm3, %vm1102_vm11  ;;  %vm790_vm5 = vcmp.gt.s32.totalorder %v778_v6, %v784_v8  ;;  %vm791_vm6 = vcmp.eq.s32.totalorder %v778_v6, %v784_v8 }
 0x27c   :  { %v677_v10 = vsel %vm676_vm4, %v655_v0, %v661_v2  ;;  %v678_v11 = vsel %vm676_vm4, %v656_v1, %v665_v4  ;;  %vm792_vm7 = vcmp.lt.s32.totalorder %v779_v7, %v788_v9 }
 0x27d   :  { %680 = vst [vmem:[#allocation12] sm:$0xff] %v677_v10  ;;  %vm793_vm0 = vmand %vm791_vm6, %vm792_vm7 }
 0x27e   :  { %681 = vst [vmem:[#allocation14] sm:$0xff] %v678_v11  ;;  %vm794_vm8 = vmor %vm790_vm5, %vm793_vm0 }
 0x27f   :  { %vm799_vm10 = vmxor %vm794_vm8, %vm1087_vm9 }
 0x280   :  { %v800_v12 = vsel %vm799_vm10, %v778_v6, %v784_v8  ;;  %v801_v13 = vsel %vm799_vm10, %v779_v7, %v788_v9 }
 0x281   :  { %v806_v14 = vperm.slane %v800_v12, %v1093_v39  ;;  %v810_v15 = vperm.slane %v801_v13, %v1093_v39 }
 0x283   :  { %vm812_vm12 = vcmp.gt.s32.totalorder %v800_v12, %v806_v14  ;;  %vm813_vm13 = vcmp.eq.s32.totalorder %v800_v12, %v806_v14  ;;  %vm814_vm14 = vcmp.lt.s32.totalorder %v801_v13, %v810_v15 }
 0x284   :  { %vm815_vm1 = vmand %vm813_vm13, %vm814_vm14  ;;  %v828_v19 = vld [vmem:[#allocation12] sm:$0xff] }
 0x285   :  { %vm816_vm2 = vmor %vm812_vm12, %vm815_vm1  ;;  %v852_v18 = vld [vmem:[#allocation14] sm:$0xff]  ;;  %vm829_vm9 = vcmp.lt.s32.totalorder %v828_v19, 0  ;;  %v830_v20 = vsub.s32 2147483647, %v828_v19 }
 0x286   :  { %vm821_vm15 = vmxor %vm816_vm2, %vm1102_vm11  ;;  %853 = vxpose.xlu0.b32.start.end [1/1] (short) (narrow) %v852_v18, 8 }
 0x287   :  { %v822_v16 = vsel %vm821_vm15, %v800_v12, %v806_v14  ;;  %v823_v17 = vsel %vm821_vm15, %v801_v13, %v810_v15  ;;  %v831_v21 = vsel %vm829_vm9, %v830_v20, %v828_v19 }
 0x288   :  { %825 = vst [vmem:[#allocation13] sm:$0xff] %v822_v16 }
 0x289   :  { %826 = vst [vmem:[#allocation15] sm:$0xff] %v823_v17 }
 0x28a   :  { %832 = vst [vmem:[#allocation12] sm:$0xff] %v831_v21 }
 0x28e   :  { %834 = vxpose.xlu0.b32.start.end [1/1] (short) (narrow) %v831_v21, 8 }
 0x32a   :  { %v854_v22 = vpop.trf.xlu0 }
 0x32b   :  { %870 = vst [vmem:[#allocation10] sm:$0xff] %v854_v22 }
 0x332   :  { %v879_v23 = vld [vmem:[#allocation10] sm:$0x3]  ;;  %v835_v3 = vpop.trf.xlu0 }
 0x333   :  { %882 = vst [vmem:[#allocation11] sm:$0x3] %v879_v23 }
 0x334   :  { %851 = vst [vmem:[#allocation7] sm:$0xff] %v835_v3 }
 0x33a   :  { %v908_v24 = vld [vmem:[#allocation11] sm:$0x3] }
 0x33b   :  { %909 = vst [vmem:[%s1146_s2] sm:$0x3] %v908_v24  ;;  %v873_v25 = vld [vmem:[#allocation7] sm:$0x3] }
 0x33c   :  { %876 = vst [vmem:[#allocation8] sm:$0x3] %v873_v25 }
 0x33d   :  { %891 = dma.vmem_to_hbm [thread:$0]  %s887_s13, 32, %s889_s16, [#allocation9]  }
 0x33e   :  { %1015 = dma.done.wait [#allocation9], 32  }
 0x33f   :  { %1016 = vsyncadd [#allocation9], 4294967264 }
 0x340   :  { %927 = vsyncpa [#allocation9], 1 }

// kernel: generalized_rcnn_forward.5
= control target key start
LH: loop header
LB: loop body
LE: loop exit
PB: predicated region body
PF: predicated region fallthrough
CT: control target
= control target key end

     0   :  { %vm466_vm0 = vcmask 130048   ;;  %s1476_s1 = inlined_call_operand.vmem [shape: bf16[784,128], index: 1, kind: input, shape index: {}]   ;;  %s1477_s2 = inlined_call_operand.vmem [shape: f32[1,128], index: 2, kind: input, shape index: {}]   ;;  %s1478_s0 = inlined_call_operand.vmem [shape: bf16[16,784], index: 0, kind: input, shape index: {}]   ;;  %s1479_s4 = inlined_call_operand.vmem [shape: f32[1,128], index: 4, kind: input, shape index: {}]   ;;  %s1480_s3 = inlined_call_operand.vmem [shape: bf16[128,128], index: 3, kind: input, shape index: {}]   ;;  %s1481_s5 = inlined_call_operand.vmem [shape: bf16[128,128], index: 5, kind: input, shape index: {}]   ;;  %s1482_s6 = inlined_call_operand.vmem [shape: f32[1,128], index: 6, kind: input, shape index: {}]   ;;  %s1483_s7 = inlined_call_operand.vmem [shape: f32[16,128], index: 7, kind: output, shape index: {}]  }
   0x1   :  { %v1100_v0 = vld [vmem:[%s1476_s1 + $0x38] sm:$0xff]  ;;  %v1099_v4 = vld [vmem:[%s1476_s1 + $0x30] sm:$0xff]  ;;  %v1098_v8 = vld [vmem:[%s1476_s1 + $0x28] sm:$0xff] }
   0x2   :  { %v1108_v1 = vld [vmem:[%s1476_s1 + $0x78] sm:$0xff]  ;;  %470 = vmatpush.bf16.msra.mxu0 %v1100_v0  ;;  %v1107_v5 = vld [vmem:[%s1476_s1 + $0x70] sm:$0xff]  ;;  %v1106_v9 = vld [vmem:[%s1476_s1 + $0x68] sm:$0xff] }
   0x3   :  { %v1116_v2 = vld [vmem:[%s1476_s1 + $0xb8] sm:$0xff]  ;;  %484 = vmatpush.bf16.msra.mxu1 %v1108_v1  ;;  %v1115_v6 = vld [vmem:[%s1476_s1 + $0xb0] sm:$0xff]  ;;  %v1114_v10 = vld [vmem:[%s1476_s1 + $0xa8] sm:$0xff] }
   0x4   :  { %v1124_v3 = vld [vmem:[%s1476_s1 + $0xf8] sm:$0xff]  ;;  %498 = vmatpush.bf16.msra.mxu2 %v1116_v2  ;;  %v1123_v7 = vld [vmem:[%s1476_s1 + $0xf0] sm:$0xff]  ;;  %v1122_v11 = vld [vmem:[%s1476_s1 + $0xe8] sm:$0xff] }
   0x5   :  { %512 = vmatpush.bf16.msra.mxu3 %v1124_v3  ;;  %v1097_v12 = vld [vmem:[%s1476_s1 + $0x20] sm:$0xff]  ;;  %v1096_v16 = vld [vmem:[%s1476_s1 + $0x18] sm:$0xff]  ;;  %v1095_v20 = vld [vmem:[%s1476_s1 + $0x10] sm:$0xff] }
   0x6   :  { %471 = vmatpush.bf16.msra.mxu0 %v1099_v4  ;;  %v1105_v13 = vld [vmem:[%s1476_s1 + $0x60] sm:$0xff]  ;;  %v1104_v17 = vld [vmem:[%s1476_s1 + $0x58] sm:$0xff]  ;;  %v1103_v21 = vld [vmem:[%s1476_s1 + $0x50] sm:$0xff] }
   0x7   :  { %485 = vmatpush.bf16.msra.mxu1 %v1107_v5  ;;  %v1113_v14 = vld [vmem:[%s1476_s1 + $0xa0] sm:$0xff]  ;;  %v1112_v18 = vld [vmem:[%s1476_s1 + $0x98] sm:$0xff]  ;;  %v1111_v22 = vld [vmem:[%s1476_s1 + $0x90] sm:$0xff] }
   0x8   :  { %499 = vmatpush.bf16.msra.mxu2 %v1115_v6  ;;  %v1121_v15 = vld [vmem:[%s1476_s1 + $0xe0] sm:$0xff]  ;;  %v1120_v19 = vld [vmem:[%s1476_s1 + $0xd8] sm:$0xff]  ;;  %v1119_v23 = vld [vmem:[%s1476_s1 + $0xd0] sm:$0xff] }
   0x9   :  { %513 = vmatpush.bf16.msra.mxu3 %v1123_v7  ;;  %v1094_v24 = vld [vmem:[%s1476_s1 + $0x8] sm:$0xff]  ;;  %v1093_v28 = vld [vmem:[%s1476_s1] sm:$0xff]  ;;  %v1089_v31 = vld [vmem:[%s1478_s0 + $0x18] sm:$0xf0] }
   0xa   :  { %472 = vmatpush.bf16.msra.mxu0 %v1098_v8  ;;  %v1102_v25 = vld [vmem:[%s1476_s1 + $0x48] sm:$0xff]  ;;  %v1101_v29 = vld [vmem:[%s1476_s1 + $0x40] sm:$0xff]  ;;  %v1132_v34 = vld [vmem:[%s1476_s1 + $0x138] sm:$0xff] }
   0xb   :  { %486 = vmatpush.bf16.msra.mxu1 %v1106_v9  ;;  %v1110_v26 = vld [vmem:[%s1476_s1 + $0x88] sm:$0xff]  ;;  %v799_v30 = vld [vmem:[%s1478_s0] sm:$0xf]  ;;  %v1086_v32 = vld [vmem:[%s1478_s0 + $0x4] sm:$0xf] }
   0xc   :  { %500 = vmatpush.bf16.msra.mxu2 %v1114_v10  ;;  %v1118_v27 = vld [vmem:[%s1476_s1 + $0xc8] sm:$0xff]  ;;  %v801_v33 = vld [vmem:[%s1478_s0 + $0x1c] sm:$0xf0]  ;;  %v1140_v35 = vld [vmem:[%s1476_s1 + $0x178] sm:$0xff]  ;;  %v800_v40 = vor.u32 %v1089_v31, %v799_v30 }
   0xd   :  { %514 = vmatpush.bf16.msra.mxu3 %v1122_v11  ;;  %v1109_v36 = vld [vmem:[%s1476_s1 + $0x80] sm:$0xff]  ;;  %v807_v38 = vld [vmem:[%s1478_s0 + $0x8] sm:$0xf]  ;;  %v1087_v41 = vld [vmem:[%s1478_s0 + $0xc] sm:$0xf]  ;;  %v804_v43 = vor.u32 %v1086_v32, %v801_v33 }
   0xe   :  { %473 = vmatpush.bf16.msra.mxu0 %v1097_v12  ;;  %v1117_v37 = vld [vmem:[%s1476_s1 + $0xc0] sm:$0xff]  ;;  %v809_v42 = vld [vmem:[%s1478_s0 + $0x24] sm:$0xf0]  ;;  %v1131_v45 = vld [vmem:[%s1476_s1 + $0x130] sm:$0xff] }
   0xf   :  { %487 = vmatpush.bf16.msra.mxu1 %v1105_v13  ;;  %v1090_v39 = vld [vmem:[%s1478_s0 + $0x20] sm:$0xf0]  ;;  %v1139_v46 = vld [vmem:[%s1476_s1 + $0x170] sm:$0xff]  ;;  %v812_v48 = vor.u32 %v1087_v41, %v809_v42  ;;  %v1130_v49 = vld [vmem:[%s1476_s1 + $0x128] sm:$0xff] }
  0x10   :  { %501 = vmatpush.bf16.msra.mxu2 %v1113_v14  ;;  %v1141_v44 = vld [vmem:[%s1476_s1 + $0x180] sm:$0xff]  ;;  %v808_v47 = vor.u32 %v1090_v39, %v807_v38  ;;  %v1138_v50 = vld [vmem:[%s1476_s1 + $0x168] sm:$0xff]  ;;  %v1128_v53 = vld [vmem:[%s1476_s1 + $0x118] sm:$0xff] }
  0x11   :  { %515 = vmatpush.bf16.msra.mxu3 %v1121_v15  ;;  %v1129_v51 = vld [vmem:[%s1476_s1 + $0x120] sm:$0xff]  ;;  %v1136_v54 = vld [vmem:[%s1476_s1 + $0x158] sm:$0xff]  ;;  %v1092_v56 = vld [vmem:[%s1478_s0 + $0x30] sm:$0xf0] }
  0x12   :  { %474 = vmatpush.bf16.msra.mxu0 %v1096_v16  ;;  %v1137_v52 = vld [vmem:[%s1476_s1 + $0x160] sm:$0xff]  ;;  %v823_v55 = vld [vmem:[%s1478_s0 + $0x18] sm:$0xf]  ;;  %v1127_v57 = vld [vmem:[%s1476_s1 + $0x110] sm:$0xff] }
  0x13   :  { %488 = vmatpush.bf16.msra.mxu1 %v1104_v17  ;;  %v1135_v58 = vld [vmem:[%s1476_s1 + $0x150] sm:$0xff]  ;;  %v824_v59 = vor.u32 %v1092_v56, %v823_v55  ;;  %v1126_v60 = vld [vmem:[%s1476_s1 + $0x108] sm:$0xff]  ;;  %v1125_v62 = vld [vmem:[%s1476_s1 + $0x100] sm:$0xff] }
  0x14   :  { %502 = vmatpush.bf16.msra.mxu2 %v1112_v18  ;;  %v1134_v61 = vld [vmem:[%s1476_s1 + $0x148] sm:$0xff]  ;;  %v1133_v63 = vld [vmem:[%s1476_s1 + $0x140] sm:$0xff]  ;;  %v815_v0 = vld [vmem:[%s1478_s0 + $0x10] sm:$0xf] }
  0x15   :  { %516 = vmatpush.bf16.msra.mxu3 %v1120_v19  ;;  %v1091_v1 = vld [vmem:[%s1478_s0 + $0x28] sm:$0xf0]  ;;  %v1088_v2 = vld [vmem:[%s1478_s0 + $0x14] sm:$0xf]  ;;  %v817_v3 = vld [vmem:[%s1478_s0 + $0x2c] sm:$0xf0] }
  0x16   :  { %475 = vmatpush.bf16.msra.mxu0 %v1095_v20  ;;  %v816_v4 = vor.u32 %v1091_v1, %v815_v0  ;;  %v820_v5 = vor.u32 %v1088_v2, %v817_v3  ;;  %v1149_v6 = vld [vmem:[%s1480_s3 + $0x38] sm:$0xff]  ;;  %v1148_v7 = vld [vmem:[%s1480_s3 + $0x30] sm:$0xff]  ;;  %v1147_v8 = vld [vmem:[%s1480_s3 + $0x28] sm:$0xff] }
  0x17   :  { %489 = vmatpush.bf16.msra.mxu1 %v1103_v21  ;;  %v1146_v9 = vld [vmem:[%s1480_s3 + $0x20] sm:$0xff]  ;;  %v1145_v10 = vld [vmem:[%s1480_s3 + $0x18] sm:$0xff]  ;;  %v1144_v11 = vld [vmem:[%s1480_s3 + $0x10] sm:$0xff] }
  0x18   :  { %503 = vmatpush.bf16.msra.mxu2 %v1111_v22  ;;  %v1143_v12 = vld [vmem:[%s1480_s3 + $0x8] sm:$0xff]  ;;  %v1142_v16 = vld [vmem:[%s1480_s3] sm:$0xff]  ;;  %v1157_v18 = vld [vmem:[%s1481_s5 + $0x38] sm:$0xff] }
  0x19   :  { %517 = vmatpush.bf16.msra.mxu3 %v1119_v23  ;;  %v1158_v17 = vld [vmem:[%s1477_s2] ss:$0 sm:$0xff]  ;;  %v1156_v20 = vld [vmem:[%s1481_s5 + $0x30] sm:$0xff] }
  0x1a   :  { %476 = vmatpush.bf16.msra.mxu0 %v1094_v24  ;;  %v1159_v55 = vld [vmem:[%s1479_s4] ss:$0 sm:$0xff] }
  0x1b   :  { %490 = vmatpush.bf16.msra.mxu1 %v1102_v25  ;;  %v1155_v25 = vld [vmem:[%s1481_s5 + $0x28] sm:$0xff]  ;;  %v1160_v0 = vld [vmem:[%s1482_s6] ss:$0 sm:$0xff] }
  0x1c   :  { %504 = vmatpush.bf16.msra.mxu2 %v1110_v26 }
  0x1d   :  { %518 = vmatpush.bf16.msra.mxu3 %v1118_v27 }
  0x1e   :  { %477 = vmatpush.bf16.msra.mxu0 %v1093_v28 }
  0x1f   :  { %491 = vmatpush.bf16.msra.mxu1 %v1101_v29  ;;  %v1154_v29 = vld [vmem:[%s1481_s5 + $0x20] sm:$0xff] }
  0x20   :  { %505 = vmatpush.bf16.msra.mxu2 %v1109_v36 }
  0x21   :  { %519 = vmatpush.bf16.msra.mxu3 %v1117_v37  ;;  %478 = vmatmul.bf16.vlgmr.msra.gmra.mxu0 %v800_v40 }
  0x22   :  { %526 = vmatpush.bf16.msrb.mxu0 %v1132_v34  ;;  %492 = vmatmul.bf16.vlgmr.msra.gmra.mxu1 %v804_v43 }
  0x23   :  { %540 = vmatpush.bf16.msrb.mxu1 %v1140_v35  ;;  %506 = vmatmul.bf16.vlgmr.msra.gmra.mxu2 %v808_v47 }
  0x24   :  { %561 = vmatpush.bf16.msrb.mxu2 %v1141_v44  ;;  %520 = vmatmul.bf16.vlgmr.msra.gmra.mxu3 %v812_v48 }
  0x25   :  { %639 = vmatpush.bf16.msrb.mxu3 %v1149_v6 }
  0x26   :  { %527 = vmatpush.bf16.msrb.mxu0 %v1131_v45 }
  0x27   :  { %541 = vmatpush.bf16.msrb.mxu1 %v1139_v46 }
  0x28   :  { %724 = vmatpush.bf16.msra.mxu2 %v1157_v18 }
  0x29   :  { %640 = vmatpush.bf16.msrb.mxu3 %v1148_v7 }
  0x2a   :  { %528 = vmatpush.bf16.msrb.mxu0 %v1130_v49 }
  0x2b   :  { %542 = vmatpush.bf16.msrb.mxu1 %v1138_v50  ;;  %v1153_v50 = vld [vmem:[%s1481_s5 + $0x18] sm:$0xff] }
  0x2c   :  { %725 = vmatpush.bf16.msra.mxu2 %v1156_v20 }
  0x2d   :  { %641 = vmatpush.bf16.msrb.mxu3 %v1147_v8 }
  0x2e   :  { %529 = vmatpush.bf16.msrb.mxu0 %v1129_v51  ;;  %v1152_v51 = vld [vmem:[%s1481_s5 + $0x10] sm:$0xff] }
  0x2f   :  { %543 = vmatpush.bf16.msrb.mxu1 %v1137_v52  ;;  %v1151_v52 = vld [vmem:[%s1481_s5 + $0x8] sm:$0xff] }
  0x30   :  { %726 = vmatpush.bf16.msra.mxu2 %v1155_v25 }
  0x31   :  { %642 = vmatpush.bf16.msrb.mxu3 %v1146_v9 }
  0x32   :  { %530 = vmatpush.bf16.msrb.mxu0 %v1128_v53  ;;  %v1150_v53 = vld [vmem:[%s1481_s5] sm:$0xff] }
  0x33   :  { %544 = vmatpush.bf16.msrb.mxu1 %v1136_v54  ;;  %1021 = vmatmul.msk.bf16.vlgmr.msrb.gmra.mxu2 %vm466_vm0, %v824_v59 }
  0x34   :  { %727 = vmatpush.bf16.msra.mxu2 %v1154_v29 }
  0x35   :  { %643 = vmatpush.bf16.msrb.mxu3 %v1145_v10 }
  0x36   :  { %531 = vmatpush.bf16.msrb.mxu0 %v1127_v57 }
  0x37   :  { %545 = vmatpush.bf16.msrb.mxu1 %v1135_v58 }
  0x38   :  { %728 = vmatpush.bf16.msra.mxu2 %v1153_v50 }
  0x39   :  { %644 = vmatpush.bf16.msrb.mxu3 %v1144_v11 }
  0x3a   :  { %532 = vmatpush.bf16.msrb.mxu0 %v1126_v60 }
  0x3b   :  { %546 = vmatpush.bf16.msrb.mxu1 %v1134_v61 }
  0x3c   :  { %729 = vmatpush.bf16.msra.mxu2 %v1152_v51 }
  0x3d   :  { %645 = vmatpush.bf16.msrb.mxu3 %v1143_v12 }
  0x3e   :  { %533 = vmatpush.bf16.msrb.mxu0 %v1125_v62  ;;  %v738_v62 = vlaneseq }
  0x3f   :  { %547 = vmatpush.bf16.msrb.mxu1 %v1133_v63 }
  0x40   :  { %730 = vmatpush.bf16.msra.mxu2 %v1151_v52  ;;  %v1452_v63 = vand.u32 127, %v738_v62 }
  0x41   :  { %534 = vmatmul.bf16.vlgmr.msrb.gmra.mxu0 %v816_v4  ;;  %646 = vmatpush.bf16.msrb.mxu3 %v1142_v16 }
  0x42   :  { %548 = vmatmul.bf16.vlgmr.msrb.gmra.mxu1 %v820_v5  ;;  %vm740_vm1 = vcmp.lt.s32.totalorder %v1452_v63, 5 }
  0x44   :  { %731 = vmatpush.bf16.msra.mxu2 %v1150_v53 }
  0x9e   :  { %v479_v13 = vpop.f32.mrf.mxu0 }
  0x9f   :  { %v493_v14 = vpop.f32.mrf.mxu1  ;;  %v480_v19 = vadd.f32 %v1158_v17, %v479_v13 }
  0xa1   :  { %v494_v24 = vadd.f32 %v493_v14, %v480_v19 }
  0xa6   :  { %v507_v15 = vpop.f32.mrf.mxu2  ;;  %v481_v21 = vpop.f32.mrf.mxu0 }
  0xa7   :  { %v495_v22 = vpop.f32.mrf.mxu1  ;;  %v521_v26 = vpop.f32.mrf.mxu3  ;;  %v482_v27 = vadd.f32 %v1158_v17, %v481_v21  ;;  %v508_v28 = vadd.f32 %v507_v15, %v494_v24 }
  0xa9   :  { %v496_v30 = vadd.f32 %v495_v22, %v482_v27  ;;  %v522_v33 = vadd.f32 %v521_v26, %v508_v28 }
  0xae   :  { %v509_v23 = vpop.f32.mrf.mxu2 }
  0xaf   :  { %v510_v35 = vadd.f32 %v509_v23, %v496_v30  ;;  %v523_v37 = vpop.f32.mrf.mxu3 }
  0xb1   :  { %v524_v38 = vadd.f32 %v523_v37, %v510_v35 }
  0xb6   :  { %v563_v34 = vpop.f32.mrf.mxu2 }
  0xbe   :  { %v535_v31 = vpop.f32.mrf.mxu0  ;;  %v565_v45 = vpop.f32.mrf.mxu2 }
  0xbf   :  { %v549_v32 = vpop.f32.mrf.mxu1  ;;  %v536_v36 = vadd.f32 %v535_v31, %v522_v33 }
  0xc1   :  { %v550_v39 = vadd.f32 %v549_v32, %v536_v36 }
  0xc3   :  { %v564_v43 = vadd.f32 %v563_v34, %v550_v39 }
  0xc5   :  { %v568_v47 = vmax.f32 %v564_v43, 0.0 }
  0xc6   :  { %v537_v40 = vpop.f32.mrf.mxu0 }
  0xc7   :  { %v538_v41 = vadd.f32 %v537_v40, %v524_v38  ;;  %v551_v42 = vpop.f32.mrf.mxu1 }
  0xc9   :  { %v552_v44 = vadd.f32 %v551_v42, %v538_v41 }
  0xcb   :  { %v566_v46 = vadd.f32 %v565_v45, %v552_v44 }
  0xcd   :  { %v569_v48 = vmax.f32 %v566_v46, 0.0 }
  0xcf   :  { %v570_v49 = vpack.c.bf16 %v569_v48, %v568_v47 }
  0xd1   :  { %647 = vmatmul.bf16.vlgmr.msrb.gmra.mxu3 %v570_v49 }
 0x154   :  { %v648_v54 = vpop.f32.mrf.mxu3 }
 0x155   :  { %v649_v56 = vadd.f32 %v1159_v55, %v648_v54 }
 0x157   :  { %v653_v59 = vmax.f32 %v649_v56, 0.0 }
 0x15c   :  { %v650_v57 = vpop.f32.mrf.mxu3 }
 0x15d   :  { %v651_v58 = vadd.f32 %v1159_v55, %v650_v57 }
 0x15f   :  { %v654_v60 = vmax.f32 %v651_v58, 0.0 }
 0x161   :  { %v655_v61 = vpack.c.bf16 %v654_v60, %v653_v59 }
 0x163   :  { %732 = vmatmul.bf16.vlgmr.msra.gmra.mxu2 %v655_v61 }
 0x1e6   :  { %v733_v1 = vpop.f32.mrf.mxu2 }
 0x1e7   :  { %v734_v2 = vadd.f32 %v1160_v0, %v733_v1 }
 0x1e9   :  { %v741_v3 = vsel %vm740_vm1, %v734_v2, -inf }
 0x1ea   :  { %743 = vmax.xlane.f32.xlu0 %v741_v3 }
 0x1ee   :  { %v735_v4 = vpop.f32.mrf.mxu2 }
 0x1ef   :  { %v736_v5 = vadd.f32 %v1160_v0, %v735_v4 }
 0x1f1   :  { %v742_v6 = vsel %vm740_vm1, %v736_v5, -inf }
 0x1f2   :  { %745 = vmax.xlane.f32.xlu0 %v742_v6 }
 0x25d   :  { %v744_v7 = vpop.xlane.xlu0 %743 }
 0x25e   :  { %v747_v8 = vsub.f32 %v741_v3, %v744_v7 }
 0x260   :  { %v749_v9 = vmul.f32 1.442695, %v747_v8 }
 0x262   :  { %1161 = vpow2.f32 %v749_v9 }
 0x265   :  { %v746_v10 = vpop.xlane.xlu0 %745 }
 0x266   :  { %v748_v11 = vsub.f32 %v742_v6, %v746_v10 }
 0x268   :  { %v1162_v12 = vpop.eup %1161  ;;  %v751_v13 = vmul.f32 1.442695, %v748_v11 }
 0x269   :  { %v753_v14 = vsel %vm740_vm1, %v1162_v12, 0.0 }
 0x26a   :  { %1163 = vpow2.f32 %v751_v13  ;;  %755 = vadd.xlane.f32.xlu1 %v753_v14 }
 0x270   :  { %v1164_v15 = vpop.eup %1163 }
 0x271   :  { %v754_v16 = vsel %vm740_vm1, %v1164_v15, 0.0 }
 0x272   :  { %757 = vadd.xlane.f32.xlu1 %v754_v16 }
 0x2dd   :  { %v756_v17 = vpop.xlane.xlu1 %755 }
 0x2de   :  { %1165 = vrcp.f32 %v756_v17  ;;  %v770_v22 = vand.u32 2147483648, %v756_v17  ;;  %v768_v24 = vand.u32 2147483647, %v756_v17  ;;  %vm764_vm3 = vweird.f32 %v756_v17 }
 0x2e0   :  { %v771_v27 = vor.u32 1.1754944e-38, %v770_v22  ;;  %vm769_vm5 = vcmp.eq.f32.partialorder %v768_v24, 8.507059e+37 }
 0x2e4   :  { %v1166_v18 = vpop.eup %1165 }
 0x2e5   :  { %v760_v19 = vmul.f32 %v1166_v18, %v756_v17  ;;  %v758_v20 = vpop.xlane.xlu1 %757  ;;  %vm765_vm2 = vweird.f32 %v1166_v18 }
 0x2e6   :  { %1167 = vrcp.f32 %v758_v20  ;;  %vm766_vm4 = vmor %vm764_vm3, %vm765_vm2  ;;  %v785_v33 = vand.u32 2147483648, %v758_v20  ;;  %v783_v36 = vand.u32 2147483647, %v758_v20  ;;  %vm779_vm7 = vweird.f32 %v758_v20 }
 0x2e7   :  { %v761_v21 = vsub.f32 1.0, %v760_v19 }
 0x2e8   :  { %v786_v38 = vor.u32 1.1754944e-38, %v785_v33  ;;  %vm784_vm9 = vcmp.eq.f32.partialorder %v783_v36, 8.507059e+37 }
 0x2e9   :  { %v762_v23 = vmul.f32 %v1166_v18, %v761_v21 }
 0x2eb   :  { %v763_v25 = vadd.f32 %v1166_v18, %v762_v23 }
 0x2ec   :  { %v1168_v26 = vpop.eup %1167 }
 0x2ed   :  { %v767_v28 = vsel %vm766_vm4, %v1166_v18, %v763_v25  ;;  %v775_v29 = vmul.f32 %v1168_v26, %v758_v20  ;;  %vm780_vm6 = vweird.f32 %v1168_v26 }
 0x2ee   :  { %v772_v30 = vsel %vm769_vm5, %v771_v27, %v767_v28  ;;  %vm781_vm8 = vmor %vm779_vm7, %vm780_vm6 }
 0x2ef   :  { %v773_v31 = vmul.f32 %v772_v30, %v753_v14  ;;  %v776_v32 = vsub.f32 1.0, %v775_v29 }
 0x2f1   :  { %v789_v34 = vsel %vm740_vm1, %v773_v31, %v734_v2  ;;  %v777_v35 = vmul.f32 %v1168_v26, %v776_v32 }
 0x2f2   :  { %791 = vst [vmem:[%s1483_s7] sm:$0xff] %v789_v34 }
 0x2f3   :  { %v778_v37 = vadd.f32 %v1168_v26, %v777_v35 }
 0x2f5   :  { %v782_v39 = vsel %vm781_vm8, %v1168_v26, %v778_v37 }
 0x2f6   :  { %v787_v40 = vsel %vm784_vm9, %v786_v38, %v782_v39 }
 0x2f7   :  { %v788_v41 = vmul.f32 %v787_v40, %v754_v16 }
 0x2f9   :  { %v790_v42 = vsel %vm740_vm1, %v788_v41, %v736_v5 }
 0x2fa   :  { %792 = vst [vmem:[%s1483_s7 + $0x8] sm:$0xff] %v790_v42 }

</bundles_post_ra>
